<compile_context>
chip_gen: v7x
topology: tpu7x:2x2x1
jax: 0.10.0
libtpu: 0.0.40
codegen_flags: <defaults>
</compile_context>

<pallas_src>
import jax
import jax.numpy as jnp
from jax.experimental import pallas as pl
from jax.experimental.pallas import tpu as pltpu


# ---------------------------------------------------------------------------
# Batch-tile selection: multiple of 16 (bf16 sublane tile), capped at 128,
# and kept <= Bp/2 when possible so v7x's two TensorCores both get work.
# ---------------------------------------------------------------------------
def _choose_tb(batch, cap=128):
    b16 = max(16, ((batch + 15) // 16) * 16)
    tb = min(cap, b16)
    if b16 >= 32:
        tb = min(tb, b16 // 2)
    tb = max(16, (tb // 16) * 16)
    return tb


# ---------------------------------------------------------------------------
# One-time parameter preparation (hoisted out of the forward pass)
# ---------------------------------------------------------------------------
def prepare_params(params):
    """Turn torch-layout weights into MXU-friendly bf16 matrices (done once)."""
    (w1, b1, w2, b2, fw1, fb1, fw2, fb2, fw3, fb3) = params
    f32, bf16 = jnp.float32, jnp.bfloat16

    # conv1 as width-Toeplitz matmuls; horizontal half of the 2x2 max-pool is
    # folded into even/odd column variants.  Output lane = c*12 + wp.
    win = jnp.arange(28)[None, :, None]
    wp = jnp.arange(12)[None, None, :]
    jj = jnp.arange(5)[:, None, None]
    s1e = (win == 2 * wp + jj).astype(f32)                    # [5, 28, 12]
    s1o = (win == 2 * wp + 1 + jj).astype(f32)
    t1e = jnp.einsum("jwp,cij->iwcp", s1e, w1[:, 0]).reshape(5, 28, 72)
    t1o = jnp.einsum("jwp,cij->iwcp", s1o, w1[:, 0]).reshape(5, 28, 72)
    # merge even/odd into one 256-lane weight: even at 0..71, odd at 128..199
    t1m = jnp.zeros((5, 28, 256), f32)
    t1m = t1m.at[:, :, 0:72].set(t1e).at[:, :, 128:200].set(t1o).astype(bf16)
    b1r = jnp.repeat(b1, 12)                                  # [72]
    b1b = jnp.zeros((256,), f32).at[0:72].set(b1r).at[128:200].set(b1r)[None, :]

    # conv2 likewise.  Input row = ci*12 + wp (rows 72..127 zero), output lane
    # even = co*4 + wp3 at 0..59, odd at 64..123.
    w_ = jnp.arange(12)[None, :, None]
    p_ = jnp.arange(4)[None, None, :]
    j_ = jnp.arange(5)[:, None, None]
    s2e = (w_ == 2 * p_ + j_).astype(f32)                     # [5, 12, 4]
    s2o = (w_ == 2 * p_ + 1 + j_).astype(f32)
    t2e = jnp.einsum("jwp,ocij->icwop", s2e, w2).reshape(5, 72, 60)
    t2o = jnp.einsum("jwp,ocij->icwop", s2o, w2).reshape(5, 72, 60)
    t2m = jnp.zeros((5, 128, 128), f32)
    t2m = t2m.at[:, :72, 0:60].set(t2e).at[:, :72, 64:124].set(t2o).astype(bf16)
    b2r = jnp.repeat(b2, 4)                                   # [60]
    b2b = jnp.zeros((128,), f32).at[0:60].set(b2r).at[64:124].set(b2r)[None, :]

    # fc1: fold torch flatten (index co*16 + h*4 + w) and pool-2 layout
    # (lane = co*4 + wp3, leading dim = hp3) into ONE [512, 128] matrix whose
    # row index is h*128 + lane (rows 60..127 of each height block are zero).
    g1 = jnp.transpose(fw1.reshape(128, 15, 4, 4), (2, 1, 3, 0)).reshape(4, 60, 128)
    g1m = jnp.zeros((4, 128, 128), f32).at[:, :60, :].set(g1)
    g1m = g1m.reshape(512, 128).astype(bf16)
    fb1r = fb1[None, :].astype(f32)                           # [1, 128]

    w2m = jnp.pad(fw2.T, ((0, 0), (0, 44))).astype(bf16)      # [128, 128]
    fb2r = jnp.pad(fb2, (0, 44))[None, :].astype(f32)
    w3m = jnp.pad(fw3.T, ((0, 44), (0, 81))).astype(bf16)     # [128, 128]
    fb3r = jnp.pad(fb3, (0, 81))[None, :].astype(f32)

    return (t1m, b1b, t2m, b2b, g1m, fb1r, w2m, fb2r, w3m, fb3r)


# ---------------------------------------------------------------------------
# Fused kernel: one batch tile per grid step, all intermediates in VMEM
# ---------------------------------------------------------------------------
def _emnist_fused_kernel(x_ref, t1m_ref, b1b_ref, t2m_ref, b2b_ref,
                         g1m_ref, fb1_ref, w2m_ref, fb2_ref, w3m_ref, fb3_ref,
                         o_ref):
    f32, bf16 = jnp.float32, jnp.bfloat16
    tb = x_ref.shape[1]

    # ---- conv1 (5x5, 1->6): 5 Toeplitz taps, even/odd pool columns merged
    # into 256 output lanes; bias folded into the accumulator init.
    rows = x_ref[pl.ds(0, 24), :, :].reshape(24 * tb, 28)
    acc1 = jnp.dot(rows, t1m_ref[0], preferred_element_type=f32) + b1b_ref[...]
    for i in range(1, 5):
        rows = x_ref[pl.ds(i, 24), :, :].reshape(24 * tb, 28)
        acc1 = acc1 + jnp.dot(rows, t1m_ref[i], preferred_element_type=f32)
    # width pool = max of vreg-aligned lane halves, then ReLU.
    x1 = jnp.maximum(jnp.maximum(acc1[:, :128], acc1[:, 128:]), 0.0)  # [24*tb,128]
    # height pool: 24 -> 12 rows (single vectorized max on untiled leading dims)
    x1r = x1.reshape(12, 2, tb, 128)
    x1p = jnp.maximum(x1r[:, 0], x1r[:, 1]).astype(bf16)              # [12,tb,128]

    # ---- conv2 (5x5, 6->15): K padded to 128 (zero rows), even/odd merged
    # into 128 output lanes; bias folded into the accumulator init.
    rows = x1p[0:8].reshape(8 * tb, 128)
    acc2 = jnp.dot(rows, t2m_ref[0], preferred_element_type=f32) + b2b_ref[...]
    for i in range(1, 5):
        rows = x1p[i:i + 8].reshape(8 * tb, 128)
        acc2 = acc2 + jnp.dot(rows, t2m_ref[i], preferred_element_type=f32)
    # width pool: max of lane halves via XLU roll (lanes 0..63 hold the result)
    x2 = jnp.maximum(jnp.maximum(acc2, pltpu.roll(acc2, shift=64, axis=1)), 0.0)
    # height pool: 8 -> 4 rows
    x2r = x2.reshape(4, 2, tb, 128)
    p2 = jnp.maximum(x2r[:, 0], x2r[:, 1]).astype(bf16)               # [4,tb,128]

    # ---- fc1: lane-concat the 4 pooled height slices -> one [tb,512]x[512,128]
    # dot (flatten folded into g1m, unused lanes hit zero rows), then ReLU.
    fin = jnp.concatenate([p2[0], p2[1], p2[2], p2[3]], axis=-1)      # [tb, 512]
    h1 = jnp.maximum(
        jnp.dot(fin, g1m_ref[...], preferred_element_type=f32) + fb1_ref[...], 0.0)

    # ---- fc2 + ReLU, fc3 (lane-padded to 128; sliced to 47 outside).
    h2 = jnp.maximum(
        jnp.dot(h1.astype(bf16), w2m_ref[...], preferred_element_type=f32)
        + fb2_ref[...], 0.0)
    o_ref[...] = (jnp.dot(h2.astype(bf16), w3m_ref[...], preferred_element_type=f32)
                  + fb3_ref[...])


def emnist_nn_forward(x, prep, tb=None):
    """x: [B, 1, 28, 28] float32 (NCHW, same as PyTorch)."""
    (t1m, b1b, t2m, b2b, g1m, fb1r, w2m, fb2r, w3m, fb3r) = prep
    B = x.shape[0]
    if tb is None:
        tb = _choose_tb(B)
    Bp = ((B + tb - 1) // tb) * tb

    # [28, B, 28] bf16 input slab (halves per-step DMA bytes).
    xt = jnp.transpose(x[:, 0], (1, 0, 2)).astype(jnp.bfloat16)
    if Bp != B:
        xt = jnp.pad(xt, ((0, 0), (0, Bp - B), (0, 0)))

    out = pl.pallas_call(
        _emnist_fused_kernel,
        out_shape=jax.ShapeDtypeStruct((Bp, 128), jnp.float32),
        grid_spec=pltpu.PrefetchScalarGridSpec(
            num_scalar_prefetch=0,
            grid=(Bp // tb,),
            in_specs=[
                pl.BlockSpec((28, tb, 28), lambda g: (0, g, 0)),    # x tile
                pl.BlockSpec((5, 28, 256), lambda g: (0, 0, 0)),    # conv1 w
                pl.BlockSpec((1, 256), lambda g: (0, 0)),           # conv1 b
                pl.BlockSpec((5, 128, 128), lambda g: (0, 0, 0)),   # conv2 w
                pl.BlockSpec((1, 128), lambda g: (0, 0)),           # conv2 b
                pl.BlockSpec((512, 128), lambda g: (0, 0)),         # fc1 w
                pl.BlockSpec((1, 128), lambda g: (0, 0)),           # fc1 b
                pl.BlockSpec((128, 128), lambda g: (0, 0)),         # fc2 w
                pl.BlockSpec((1, 128), lambda g: (0, 0)),           # fc2 b
                pl.BlockSpec((128, 128), lambda g: (0, 0)),         # fc3 w
                pl.BlockSpec((1, 128), lambda g: (0, 0)),           # fc3 b
            ],
            out_specs=pl.BlockSpec((tb, 128), lambda g: (g, 0)),
        ),
        compiler_params=pltpu.CompilerParams(
            dimension_semantics=("parallel",)),
    )(xt, t1m, b1b, t2m, b2b, g1m, fb1r, w2m, fb2r, w3m, fb3r)
    return out[:B, :47]


# ---------------------------------------------------------------------------
# Deterministic parameter init (PyTorch-style uniform(-1/sqrt(fan_in), ...))
# ---------------------------------------------------------------------------
def init_params(key):
    def unif(k, shape, fan_in):
        bound = 1.0 / jnp.sqrt(jnp.float32(fan_in))
        return jax.random.uniform(k, shape, jnp.float32, -bound, bound)

    ks = jax.random.split(key, 10)
    w1 = unif(ks[0], (6, 1, 5, 5), 1 * 5 * 5)
    b1 = unif(ks[1], (6,), 1 * 5 * 5)
    w2 = unif(ks[2], (15, 6, 5, 5), 6 * 5 * 5)
    b2 = unif(ks[3], (15,), 6 * 5 * 5)
    fw1 = unif(ks[4], (128, 240), 240)
    fb1 = unif(ks[5], (128,), 240)
    fw2 = unif(ks[6], (84, 128), 128)
    fb2 = unif(ks[7], (84,), 128)
    fw3 = unif(ks[8], (47, 84), 84)
    fb3 = unif(ks[9], (47,), 84)
    return (w1, b1, w2, b2, fw1, fb1, fw2, fb2, fw3, fb3)


# ---------------------------------------------------------------------------
# Pure-JAX reference (mirrors the PyTorch forward) for a correctness check
# ---------------------------------------------------------------------------
def ref_forward(x, params):
    (w1, b1, w2, b2, fw1, fb1, fw2, fb2, fw3, fb3) = params
    dn = ("NCHW", "OIHW", "NCHW")
    y = jax.lax.conv_general_dilated(x, w1, (1, 1), "VALID", dimension_numbers=dn)
    y = jax.nn.relu(y + b1[None, :, None, None])
    y = jax.lax.reduce_window(y, -jnp.inf, jax.lax.max,
                              (1, 1, 2, 2), (1, 1, 2, 2), "VALID")
    y = jax.lax.conv_general_dilated(y, w2, (1, 1), "VALID", dimension_numbers=dn)
    y = jax.nn.relu(y + b2[None, :, None, None])
    y = jax.lax.reduce_window(y, -jnp.inf, jax.lax.max,
                              (1, 1, 2, 2), (1, 1, 2, 2), "VALID")
    y = y.reshape(y.shape[0], -1)
    y = jax.nn.relu(y @ fw1.T + fb1)
    y = jax.nn.relu(y @ fw2.T + fb2)
    return y @ fw3.T + fb3


if __name__ == "__main__":
    key = jax.random.PRNGKey(0)
    k_x, k_p = jax.random.split(key)

    B = 50  # pads to 64, batch tile 32 -> 2 grid steps (exercises padding + megacore)
    x = jax.random.normal(k_x, (B, 1, 28, 28), jnp.float32)   # NCHW, EMNIST-sized
    params = init_params(k_p)
    prep = prepare_params(params)                             # one-time weight prep

    fwd = jax.jit(emnist_nn_forward)
    out = jax.block_until_ready(fwd(x, prep))
    assert out.shape == (B, 47), out.shape

    ref = jax.block_until_ready(ref_forward(x, params))
    # bf16 MXU operands -> compare against the f32 reference with a loose-but-
    # meaningful tolerance (errors of a wrong kernel would be O(0.1..1)).
    if not jnp.allclose(out, ref, atol=5e-2, rtol=5e-2):
        err = float(jnp.max(jnp.abs(out - ref)))
        raise AssertionError(f"Pallas output mismatches JAX reference (max err {err})")

    print("KERNEL_OK")
</pallas_src>

<mosaic_0001>
module attributes {stable_mosaic.version = 11 : i64} {
  func.func @_emnist_fused_kernel(%arg0: i32, %arg1: memref<28x32x28xbf16, #tpu.memory_space<vmem>>, %arg2: memref<5x28x256xbf16, #tpu.memory_space<vmem>>, %arg3: memref<1x256xf32, #tpu.memory_space<vmem>>, %arg4: memref<5x128x128xbf16, #tpu.memory_space<vmem>>, %arg5: memref<1x128xf32, #tpu.memory_space<vmem>>, %arg6: memref<512x128xbf16, #tpu.memory_space<vmem>>, %arg7: memref<1x128xf32, #tpu.memory_space<vmem>>, %arg8: memref<128x128xbf16, #tpu.memory_space<vmem>>, %arg9: memref<1x128xf32, #tpu.memory_space<vmem>>, %arg10: memref<128x128xbf16, #tpu.memory_space<vmem>>, %arg11: memref<1x128xf32, #tpu.memory_space<vmem>>, %arg12: memref<32x128xf32, #tpu.memory_space<vmem>>) attributes {dimension_semantics = [#tpu.dimension_semantics<parallel>], iteration_bounds = array<i64: 2>, scalar_prefetch = 0 : i64, scratch_operands = 0 : i64, tpu.core_type = #tpu.core_type<tc>, window_params = [{transform_indices = @transform_0, window_bounds = array<i64: 28, 32, 28>}, {pipeline_mode = #tpu.pipeline_mode<synchronous>, transform_indices = @transform_1, window_bounds = array<i64: 5, 28, 256>}, {pipeline_mode = #tpu.pipeline_mode<synchronous>, transform_indices = @transform_2, window_bounds = array<i64: 1, 256>}, {pipeline_mode = #tpu.pipeline_mode<synchronous>, transform_indices = @transform_3, window_bounds = array<i64: 5, 128, 128>}, {pipeline_mode = #tpu.pipeline_mode<synchronous>, transform_indices = @transform_4, window_bounds = array<i64: 1, 128>}, {pipeline_mode = #tpu.pipeline_mode<synchronous>, transform_indices = @transform_5, window_bounds = array<i64: 512, 128>}, {pipeline_mode = #tpu.pipeline_mode<synchronous>, transform_indices = @transform_6, window_bounds = array<i64: 1, 128>}, {pipeline_mode = #tpu.pipeline_mode<synchronous>, transform_indices = @transform_7, window_bounds = array<i64: 128, 128>}, {pipeline_mode = #tpu.pipeline_mode<synchronous>, transform_indices = @transform_8, window_bounds = array<i64: 1, 128>}, {pipeline_mode = #tpu.pipeline_mode<synchronous>, transform_indices = @transform_9, window_bounds = array<i64: 128, 128>}, {pipeline_mode = #tpu.pipeline_mode<synchronous>, transform_indices = @transform_10, window_bounds = array<i64: 1, 128>}, {transform_indices = @transform_11, window_bounds = array<i64: 32, 128>}]} {
    %c0 = arith.constant 0 : index
    %c0_0 = arith.constant 0 : index
    %c0_1 = arith.constant 0 : index
    %0 = vector.load %arg1[%c0, %c0_0, %c0_1] : memref<28x32x28xbf16, #tpu.memory_space<vmem>>, vector<24x32x28xbf16>
    %1 = vector.shape_cast %0 : vector<24x32x28xbf16> to vector<768x28xbf16>
    %c0_2 = arith.constant 0 : index
    %c0_3 = arith.constant 0 : index
    %c0_4 = arith.constant 0 : index
    %2 = vector.load %arg2[%c0_2, %c0_3, %c0_4] : memref<5x28x256xbf16, #tpu.memory_space<vmem>>, vector<1x28x256xbf16>
    %3 = vector.shape_cast %2 : vector<1x28x256xbf16> to vector<28x256xbf16>
    %cst = arith.constant dense<0.000000e+00> : vector<768x256xf32>
    %4 = tpu.matmul %1, %3, %cst {dimension_numbers = #tpu.dot_dimension_numbers<[1], [0], [0], [1], [0, 0, 1, 1], [], []>} : vector<768x28xbf16>, vector<28x256xbf16>, vector<768x256xf32> -> vector<768x256xf32>
    %c0_5 = arith.constant 0 : index
    %c0_6 = arith.constant 0 : index
    %5 = vector.load %arg3[%c0_5, %c0_6] : memref<1x256xf32, #tpu.memory_space<vmem>>, vector<1x256xf32>
    %6 = vector.broadcast %5 : vector<1x256xf32> to vector<768x256xf32>
    %7 = arith.addf %4, %6 : vector<768x256xf32>
    %c1 = arith.constant 1 : index
    %c0_7 = arith.constant 0 : index
    %c0_8 = arith.constant 0 : index
    %8 = vector.load %arg1[%c1, %c0_7, %c0_8] : memref<28x32x28xbf16, #tpu.memory_space<vmem>>, vector<24x32x28xbf16>
    %9 = vector.shape_cast %8 : vector<24x32x28xbf16> to vector<768x28xbf16>
    %c1_9 = arith.constant 1 : index
    %c0_10 = arith.constant 0 : index
    %c0_11 = arith.constant 0 : index
    %10 = vector.load %arg2[%c1_9, %c0_10, %c0_11] : memref<5x28x256xbf16, #tpu.memory_space<vmem>>, vector<1x28x256xbf16>
    %11 = vector.shape_cast %10 : vector<1x28x256xbf16> to vector<28x256xbf16>
    %cst_12 = arith.constant dense<0.000000e+00> : vector<768x256xf32>
    %12 = tpu.matmul %9, %11, %cst_12 {dimension_numbers = #tpu.dot_dimension_numbers<[1], [0], [0], [1], [0, 0, 1, 1], [], []>} : vector<768x28xbf16>, vector<28x256xbf16>, vector<768x256xf32> -> vector<768x256xf32>
    %13 = arith.addf %7, %12 : vector<768x256xf32>
    %c2 = arith.constant 2 : index
    %c0_13 = arith.constant 0 : index
    %c0_14 = arith.constant 0 : index
    %14 = vector.load %arg1[%c2, %c0_13, %c0_14] : memref<28x32x28xbf16, #tpu.memory_space<vmem>>, vector<24x32x28xbf16>
    %15 = vector.shape_cast %14 : vector<24x32x28xbf16> to vector<768x28xbf16>
    %c2_15 = arith.constant 2 : index
    %c0_16 = arith.constant 0 : index
    %c0_17 = arith.constant 0 : index
    %16 = vector.load %arg2[%c2_15, %c0_16, %c0_17] : memref<5x28x256xbf16, #tpu.memory_space<vmem>>, vector<1x28x256xbf16>
    %17 = vector.shape_cast %16 : vector<1x28x256xbf16> to vector<28x256xbf16>
    %cst_18 = arith.constant dense<0.000000e+00> : vector<768x256xf32>
    %18 = tpu.matmul %15, %17, %cst_18 {dimension_numbers = #tpu.dot_dimension_numbers<[1], [0], [0], [1], [0, 0, 1, 1], [], []>} : vector<768x28xbf16>, vector<28x256xbf16>, vector<768x256xf32> -> vector<768x256xf32>
    %19 = arith.addf %13, %18 : vector<768x256xf32>
    %c3 = arith.constant 3 : index
    %c0_19 = arith.constant 0 : index
    %c0_20 = arith.constant 0 : index
    %20 = vector.load %arg1[%c3, %c0_19, %c0_20] : memref<28x32x28xbf16, #tpu.memory_space<vmem>>, vector<24x32x28xbf16>
    %21 = vector.shape_cast %20 : vector<24x32x28xbf16> to vector<768x28xbf16>
    %c3_21 = arith.constant 3 : index
    %c0_22 = arith.constant 0 : index
    %c0_23 = arith.constant 0 : index
    %22 = vector.load %arg2[%c3_21, %c0_22, %c0_23] : memref<5x28x256xbf16, #tpu.memory_space<vmem>>, vector<1x28x256xbf16>
    %23 = vector.shape_cast %22 : vector<1x28x256xbf16> to vector<28x256xbf16>
    %cst_24 = arith.constant dense<0.000000e+00> : vector<768x256xf32>
    %24 = tpu.matmul %21, %23, %cst_24 {dimension_numbers = #tpu.dot_dimension_numbers<[1], [0], [0], [1], [0, 0, 1, 1], [], []>} : vector<768x28xbf16>, vector<28x256xbf16>, vector<768x256xf32> -> vector<768x256xf32>
    %25 = arith.addf %19, %24 : vector<768x256xf32>
    %c4 = arith.constant 4 : index
    %c0_25 = arith.constant 0 : index
    %c0_26 = arith.constant 0 : index
    %26 = vector.load %arg1[%c4, %c0_25, %c0_26] : memref<28x32x28xbf16, #tpu.memory_space<vmem>>, vector<24x32x28xbf16>
    %27 = vector.shape_cast %26 : vector<24x32x28xbf16> to vector<768x28xbf16>
    %c4_27 = arith.constant 4 : index
    %c0_28 = arith.constant 0 : index
    %c0_29 = arith.constant 0 : index
    %28 = vector.load %arg2[%c4_27, %c0_28, %c0_29] : memref<5x28x256xbf16, #tpu.memory_space<vmem>>, vector<1x28x256xbf16>
    %29 = vector.shape_cast %28 : vector<1x28x256xbf16> to vector<28x256xbf16>
    %cst_30 = arith.constant dense<0.000000e+00> : vector<768x256xf32>
    %30 = tpu.matmul %27, %29, %cst_30 {dimension_numbers = #tpu.dot_dimension_numbers<[1], [0], [0], [1], [0, 0, 1, 1], [], []>} : vector<768x28xbf16>, vector<28x256xbf16>, vector<768x256xf32> -> vector<768x256xf32>
    %31 = arith.addf %25, %30 : vector<768x256xf32>
    %32 = vector.extract_strided_slice %31 {offsets = [0, 0], sizes = [768, 128], strides = [1, 1]} : vector<768x256xf32> to vector<768x128xf32>
    %33 = vector.extract_strided_slice %31 {offsets = [0, 128], sizes = [768, 128], strides = [1, 1]} : vector<768x256xf32> to vector<768x128xf32>
    %34 = arith.maximumf %32, %33 : vector<768x128xf32>
    %cst_31 = arith.constant 0.000000e+00 : f32
    %35 = vector.broadcast %cst_31 : f32 to vector<768x128xf32>
    %36 = arith.maximumf %34, %35 : vector<768x128xf32>
    %37 = vector.shape_cast %36 : vector<768x128xf32> to vector<12x2x32x128xf32>
    %38 = vector.extract_strided_slice %37 {offsets = [0, 0, 0, 0], sizes = [12, 1, 32, 128], strides = [1, 1, 1, 1]} : vector<12x2x32x128xf32> to vector<12x1x32x128xf32>
    %39 = vector.shape_cast %38 : vector<12x1x32x128xf32> to vector<12x32x128xf32>
    %40 = vector.extract_strided_slice %37 {offsets = [0, 1, 0, 0], sizes = [12, 1, 32, 128], strides = [1, 1, 1, 1]} : vector<12x2x32x128xf32> to vector<12x1x32x128xf32>
    %41 = vector.shape_cast %40 : vector<12x1x32x128xf32> to vector<12x32x128xf32>
    %42 = arith.maximumf %39, %41 : vector<12x32x128xf32>
    %43 = arith.truncf %42 : vector<12x32x128xf32> to vector<12x32x128xbf16>
    %44 = vector.extract_strided_slice %43 {offsets = [0, 0, 0], sizes = [8, 32, 128], strides = [1, 1, 1]} : vector<12x32x128xbf16> to vector<8x32x128xbf16>
    %45 = vector.shape_cast %44 : vector<8x32x128xbf16> to vector<256x128xbf16>
    %c0_32 = arith.constant 0 : index
    %c0_33 = arith.constant 0 : index
    %c0_34 = arith.constant 0 : index
    %46 = vector.load %arg4[%c0_32, %c0_33, %c0_34] : memref<5x128x128xbf16, #tpu.memory_space<vmem>>, vector<1x128x128xbf16>
    %47 = vector.shape_cast %46 : vector<1x128x128xbf16> to vector<128x128xbf16>
    %cst_35 = arith.constant dense<0.000000e+00> : vector<256x128xf32>
    %48 = tpu.matmul %45, %47, %cst_35 {dimension_numbers = #tpu.dot_dimension_numbers<[1], [0], [0], [1], [0, 0, 1, 1], [], []>} : vector<256x128xbf16>, vector<128x128xbf16>, vector<256x128xf32> -> vector<256x128xf32>
    %c0_36 = arith.constant 0 : index
    %c0_37 = arith.constant 0 : index
    %49 = vector.load %arg5[%c0_36, %c0_37] : memref<1x128xf32, #tpu.memory_space<vmem>>, vector<1x128xf32>
    %50 = vector.broadcast %49 : vector<1x128xf32> to vector<256x128xf32>
    %51 = arith.addf %48, %50 : vector<256x128xf32>
    %52 = vector.extract_strided_slice %43 {offsets = [1, 0, 0], sizes = [8, 32, 128], strides = [1, 1, 1]} : vector<12x32x128xbf16> to vector<8x32x128xbf16>
    %53 = vector.shape_cast %52 : vector<8x32x128xbf16> to vector<256x128xbf16>
    %c1_38 = arith.constant 1 : index
    %c0_39 = arith.constant 0 : index
    %c0_40 = arith.constant 0 : index
    %54 = vector.load %arg4[%c1_38, %c0_39, %c0_40] : memref<5x128x128xbf16, #tpu.memory_space<vmem>>, vector<1x128x128xbf16>
    %55 = vector.shape_cast %54 : vector<1x128x128xbf16> to vector<128x128xbf16>
    %cst_41 = arith.constant dense<0.000000e+00> : vector<256x128xf32>
    %56 = tpu.matmul %53, %55, %cst_41 {dimension_numbers = #tpu.dot_dimension_numbers<[1], [0], [0], [1], [0, 0, 1, 1], [], []>} : vector<256x128xbf16>, vector<128x128xbf16>, vector<256x128xf32> -> vector<256x128xf32>
    %57 = arith.addf %51, %56 : vector<256x128xf32>
    %58 = vector.extract_strided_slice %43 {offsets = [2, 0, 0], sizes = [8, 32, 128], strides = [1, 1, 1]} : vector<12x32x128xbf16> to vector<8x32x128xbf16>
    %59 = vector.shape_cast %58 : vector<8x32x128xbf16> to vector<256x128xbf16>
    %c2_42 = arith.constant 2 : index
    %c0_43 = arith.constant 0 : index
    %c0_44 = arith.constant 0 : index
    %60 = vector.load %arg4[%c2_42, %c0_43, %c0_44] : memref<5x128x128xbf16, #tpu.memory_space<vmem>>, vector<1x128x128xbf16>
    %61 = vector.shape_cast %60 : vector<1x128x128xbf16> to vector<128x128xbf16>
    %cst_45 = arith.constant dense<0.000000e+00> : vector<256x128xf32>
    %62 = tpu.matmul %59, %61, %cst_45 {dimension_numbers = #tpu.dot_dimension_numbers<[1], [0], [0], [1], [0, 0, 1, 1], [], []>} : vector<256x128xbf16>, vector<128x128xbf16>, vector<256x128xf32> -> vector<256x128xf32>
    %63 = arith.addf %57, %62 : vector<256x128xf32>
    %64 = vector.extract_strided_slice %43 {offsets = [3, 0, 0], sizes = [8, 32, 128], strides = [1, 1, 1]} : vector<12x32x128xbf16> to vector<8x32x128xbf16>
    %65 = vector.shape_cast %64 : vector<8x32x128xbf16> to vector<256x128xbf16>
    %c3_46 = arith.constant 3 : index
    %c0_47 = arith.constant 0 : index
    %c0_48 = arith.constant 0 : index
    %66 = vector.load %arg4[%c3_46, %c0_47, %c0_48] : memref<5x128x128xbf16, #tpu.memory_space<vmem>>, vector<1x128x128xbf16>
    %67 = vector.shape_cast %66 : vector<1x128x128xbf16> to vector<128x128xbf16>
    %cst_49 = arith.constant dense<0.000000e+00> : vector<256x128xf32>
    %68 = tpu.matmul %65, %67, %cst_49 {dimension_numbers = #tpu.dot_dimension_numbers<[1], [0], [0], [1], [0, 0, 1, 1], [], []>} : vector<256x128xbf16>, vector<128x128xbf16>, vector<256x128xf32> -> vector<256x128xf32>
    %69 = arith.addf %63, %68 : vector<256x128xf32>
    %70 = vector.extract_strided_slice %43 {offsets = [4, 0, 0], sizes = [8, 32, 128], strides = [1, 1, 1]} : vector<12x32x128xbf16> to vector<8x32x128xbf16>
    %71 = vector.shape_cast %70 : vector<8x32x128xbf16> to vector<256x128xbf16>
    %c4_50 = arith.constant 4 : index
    %c0_51 = arith.constant 0 : index
    %c0_52 = arith.constant 0 : index
    %72 = vector.load %arg4[%c4_50, %c0_51, %c0_52] : memref<5x128x128xbf16, #tpu.memory_space<vmem>>, vector<1x128x128xbf16>
    %73 = vector.shape_cast %72 : vector<1x128x128xbf16> to vector<128x128xbf16>
    %cst_53 = arith.constant dense<0.000000e+00> : vector<256x128xf32>
    %74 = tpu.matmul %71, %73, %cst_53 {dimension_numbers = #tpu.dot_dimension_numbers<[1], [0], [0], [1], [0, 0, 1, 1], [], []>} : vector<256x128xbf16>, vector<128x128xbf16>, vector<256x128xf32> -> vector<256x128xf32>
    %75 = arith.addf %69, %74 : vector<256x128xf32>
    %c64_i32 = arith.constant 64 : i32
    %76 = tpu.dynamic_rotate %75 by %c64_i32 dim 1 : vector<256x128xf32>, i32 -> vector<256x128xf32>
    %77 = arith.maximumf %75, %76 : vector<256x128xf32>
    %cst_54 = arith.constant 0.000000e+00 : f32
    %78 = vector.broadcast %cst_54 : f32 to vector<256x128xf32>
    %79 = arith.maximumf %77, %78 : vector<256x128xf32>
    %80 = vector.shape_cast %79 : vector<256x128xf32> to vector<4x2x32x128xf32>
    %81 = vector.extract_strided_slice %80 {offsets = [0, 0, 0, 0], sizes = [4, 1, 32, 128], strides = [1, 1, 1, 1]} : vector<4x2x32x128xf32> to vector<4x1x32x128xf32>
    %82 = vector.shape_cast %81 : vector<4x1x32x128xf32> to vector<4x32x128xf32>
    %83 = vector.extract_strided_slice %80 {offsets = [0, 1, 0, 0], sizes = [4, 1, 32, 128], strides = [1, 1, 1, 1]} : vector<4x2x32x128xf32> to vector<4x1x32x128xf32>
    %84 = vector.shape_cast %83 : vector<4x1x32x128xf32> to vector<4x32x128xf32>
    %85 = arith.maximumf %82, %84 : vector<4x32x128xf32>
    %86 = arith.truncf %85 : vector<4x32x128xf32> to vector<4x32x128xbf16>
    %87 = vector.extract_strided_slice %86 {offsets = [0, 0, 0], sizes = [1, 32, 128], strides = [1, 1, 1]} : vector<4x32x128xbf16> to vector<1x32x128xbf16>
    %88 = vector.shape_cast %87 : vector<1x32x128xbf16> to vector<32x128xbf16>
    %89 = vector.extract_strided_slice %86 {offsets = [1, 0, 0], sizes = [1, 32, 128], strides = [1, 1, 1]} : vector<4x32x128xbf16> to vector<1x32x128xbf16>
    %90 = vector.shape_cast %89 : vector<1x32x128xbf16> to vector<32x128xbf16>
    %91 = vector.extract_strided_slice %86 {offsets = [2, 0, 0], sizes = [1, 32, 128], strides = [1, 1, 1]} : vector<4x32x128xbf16> to vector<1x32x128xbf16>
    %92 = vector.shape_cast %91 : vector<1x32x128xbf16> to vector<32x128xbf16>
    %93 = vector.extract_strided_slice %86 {offsets = [3, 0, 0], sizes = [1, 32, 128], strides = [1, 1, 1]} : vector<4x32x128xbf16> to vector<1x32x128xbf16>
    %94 = vector.shape_cast %93 : vector<1x32x128xbf16> to vector<32x128xbf16>
    %95 = tpu.concatenate %88, %90, %92, %94 in 1 : vector<32x128xbf16>, vector<32x128xbf16>, vector<32x128xbf16>, vector<32x128xbf16> -> vector<32x512xbf16>
    %c0_55 = arith.constant 0 : index
    %c0_56 = arith.constant 0 : index
    %96 = vector.load %arg6[%c0_55, %c0_56] : memref<512x128xbf16, #tpu.memory_space<vmem>>, vector<512x128xbf16>
    %cst_57 = arith.constant dense<0.000000e+00> : vector<32x128xf32>
    %97 = tpu.matmul %95, %96, %cst_57 {dimension_numbers = #tpu.dot_dimension_numbers<[1], [0], [0], [1], [0, 0, 1, 1], [], []>} : vector<32x512xbf16>, vector<512x128xbf16>, vector<32x128xf32> -> vector<32x128xf32>
    %c0_58 = arith.constant 0 : index
    %c0_59 = arith.constant 0 : index
    %98 = vector.load %arg7[%c0_58, %c0_59] : memref<1x128xf32, #tpu.memory_space<vmem>>, vector<1x128xf32>
    %99 = vector.broadcast %98 : vector<1x128xf32> to vector<32x128xf32>
    %100 = arith.addf %97, %99 : vector<32x128xf32>
    %cst_60 = arith.constant 0.000000e+00 : f32
    %101 = vector.broadcast %cst_60 : f32 to vector<32x128xf32>
    %102 = arith.maximumf %100, %101 : vector<32x128xf32>
    %103 = arith.truncf %102 : vector<32x128xf32> to vector<32x128xbf16>
    %c0_61 = arith.constant 0 : index
    %c0_62 = arith.constant 0 : index
    %104 = vector.load %arg8[%c0_61, %c0_62] : memref<128x128xbf16, #tpu.memory_space<vmem>>, vector<128x128xbf16>
    %cst_63 = arith.constant dense<0.000000e+00> : vector<32x128xf32>
    %105 = tpu.matmul %103, %104, %cst_63 {dimension_numbers = #tpu.dot_dimension_numbers<[1], [0], [0], [1], [0, 0, 1, 1], [], []>} : vector<32x128xbf16>, vector<128x128xbf16>, vector<32x128xf32> -> vector<32x128xf32>
    %c0_64 = arith.constant 0 : index
    %c0_65 = arith.constant 0 : index
    %106 = vector.load %arg9[%c0_64, %c0_65] : memref<1x128xf32, #tpu.memory_space<vmem>>, vector<1x128xf32>
    %107 = vector.broadcast %106 : vector<1x128xf32> to vector<32x128xf32>
    %108 = arith.addf %105, %107 : vector<32x128xf32>
    %cst_66 = arith.constant 0.000000e+00 : f32
    %109 = vector.broadcast %cst_66 : f32 to vector<32x128xf32>
    %110 = arith.maximumf %108, %109 : vector<32x128xf32>
    %111 = arith.truncf %110 : vector<32x128xf32> to vector<32x128xbf16>
    %c0_67 = arith.constant 0 : index
    %c0_68 = arith.constant 0 : index
    %112 = vector.load %arg10[%c0_67, %c0_68] : memref<128x128xbf16, #tpu.memory_space<vmem>>, vector<128x128xbf16>
    %cst_69 = arith.constant dense<0.000000e+00> : vector<32x128xf32>
    %113 = tpu.matmul %111, %112, %cst_69 {dimension_numbers = #tpu.dot_dimension_numbers<[1], [0], [0], [1], [0, 0, 1, 1], [], []>} : vector<32x128xbf16>, vector<128x128xbf16>, vector<32x128xf32> -> vector<32x128xf32>
    %c0_70 = arith.constant 0 : index
    %c0_71 = arith.constant 0 : index
    %114 = vector.load %arg11[%c0_70, %c0_71] : memref<1x128xf32, #tpu.memory_space<vmem>>, vector<1x128xf32>
    %115 = vector.broadcast %114 : vector<1x128xf32> to vector<32x128xf32>
    %116 = arith.addf %113, %115 : vector<32x128xf32>
    %c0_72 = arith.constant 0 : index
    %c0_73 = arith.constant 0 : index
    %117 = vector.load %arg12[%c0_72, %c0_73] : memref<32x128xf32, #tpu.memory_space<vmem>>, vector<32x128xf32>
    tpu.vector_store %arg12[%c0_72, %c0_73], %116 {strides = array<i32>} : memref<32x128xf32, #tpu.memory_space<vmem>>, vector<32x128xf32>,
    return
  }
  func.func @transform_0(%arg0: i32) -> (i32, i32, i32) {
    %c0_i32 = arith.constant 0 : i32
    %c0_i32_0 = arith.constant 0 : i32
    %c0_i32_1 = arith.constant 0 : i32
    return %c0_i32, %arg0, %c0_i32_0 : i32, i32, i32
  }
  func.func @transform_1(%arg0: i32) -> (i32, i32, i32) {
    %c0_i32 = arith.constant 0 : i32
    %c0_i32_0 = arith.constant 0 : i32
    %c0_i32_1 = arith.constant 0 : i32
    %c0_i32_2 = arith.constant 0 : i32
    return %c0_i32, %c0_i32_0, %c0_i32_1 : i32, i32, i32
  }
  func.func @transform_2(%arg0: i32) -> (i32, i32) {
    %c0_i32 = arith.constant 0 : i32
    %c0_i32_0 = arith.constant 0 : i32
    %c0_i32_1 = arith.constant 0 : i32
    return %c0_i32, %c0_i32_0 : i32, i32
  }
  func.func @transform_3(%arg0: i32) -> (i32, i32, i32) {
    %c0_i32 = arith.constant 0 : i32
    %c0_i32_0 = arith.constant 0 : i32
    %c0_i32_1 = arith.constant 0 : i32
    %c0_i32_2 = arith.constant 0 : i32
    return %c0_i32, %c0_i32_0, %c0_i32_1 : i32, i32, i32
  }
  func.func @transform_4(%arg0: i32) -> (i32, i32) {
    %c0_i32 = arith.constant 0 : i32
    %c0_i32_0 = arith.constant 0 : i32
    %c0_i32_1 = arith.constant 0 : i32
    return %c0_i32, %c0_i32_0 : i32, i32
  }
  func.func @transform_5(%arg0: i32) -> (i32, i32) {
    %c0_i32 = arith.constant 0 : i32
    %c0_i32_0 = arith.constant 0 : i32
    %c0_i32_1 = arith.constant 0 : i32
    return %c0_i32, %c0_i32_0 : i32, i32
  }
  func.func @transform_6(%arg0: i32) -> (i32, i32) {
    %c0_i32 = arith.constant 0 : i32
    %c0_i32_0 = arith.constant 0 : i32
    %c0_i32_1 = arith.constant 0 : i32
    return %c0_i32, %c0_i32_0 : i32, i32
  }
  func.func @transform_7(%arg0: i32) -> (i32, i32) {
    %c0_i32 = arith.constant 0 : i32
    %c0_i32_0 = arith.constant 0 : i32
    %c0_i32_1 = arith.constant 0 : i32
    return %c0_i32, %c0_i32_0 : i32, i32
  }
  func.func @transform_8(%arg0: i32) -> (i32, i32) {
    %c0_i32 = arith.constant 0 : i32
    %c0_i32_0 = arith.constant 0 : i32
    %c0_i32_1 = arith.constant 0 : i32
    return %c0_i32, %c0_i32_0 : i32, i32
  }
  func.func @transform_9(%arg0: i32) -> (i32, i32) {
    %c0_i32 = arith.constant 0 : i32
    %c0_i32_0 = arith.constant 0 : i32
    %c0_i32_1 = arith.constant 0 : i32
    return %c0_i32, %c0_i32_0 : i32, i32
  }
  func.func @transform_10(%arg0: i32) -> (i32, i32) {
    %c0_i32 = arith.constant 0 : i32
    %c0_i32_0 = arith.constant 0 : i32
    %c0_i32_1 = arith.constant 0 : i32
    return %c0_i32, %c0_i32_0 : i32, i32
  }
  func.func @transform_11(%arg0: i32) -> (i32, i32) {
    %c0_i32 = arith.constant 0 : i32
    %c0_i32_0 = arith.constant 0 : i32
    return %arg0, %c0_i32 : i32, i32
  }
}

</mosaic_0001>

<bundles_post_ra>
// kernel: emnist_nn_forward.1
= control target key start
LH: loop header
LB: loop body
LE: loop exit
PB: predicated region body
PF: predicated region fallthrough
CT: control target
= control target key end

     0   :  { %s12355_s17 = smov 0   ;;  %s12357_s18 = smov 0   ;;  %s14685_s0 = inlined_call_operand.vmem [shape: bf16[28,64,28], index: 0, kind: input, shape index: {}]   ;;  %s14686_s1 = inlined_call_operand.vmem [shape: bf16[5,28,256], index: 1, kind: input, shape index: {}]   ;;  %s14687_s2 = inlined_call_operand.vmem [shape: f32[1,256], index: 2, kind: input, shape index: {}]   ;;  %s14688_s3 = inlined_call_operand.vmem [shape: bf16[5,128,128], index: 3, kind: input, shape index: {}]   ;;  %s14689_s4 = inlined_call_operand.vmem [shape: f32[1,128], index: 4, kind: input, shape index: {}]   ;;  %s14690_s5 = inlined_call_operand.vmem [shape: bf16[512,128], index: 5, kind: input, shape index: {}]   ;;  %s14691_s6 = inlined_call_operand.vmem [shape: f32[1,128], index: 6, kind: input, shape index: {}]   ;;  %s14692_s7 = inlined_call_operand.vmem [shape: bf16[128,128], index: 7, kind: input, shape index: {}]   ;;  %s14693_s8 = inlined_call_operand.vmem [shape: f32[1,128], index: 8, kind: input, shape index: {}]   ;;  %s14694_s9 = inlined_call_operand.vmem [shape: bf16[128,128], index: 9, kind: input, shape index: {}]   ;;  %s14695_s10 = inlined_call_operand.vmem [shape: f32[1,128], index: 10, kind: input, shape index: {}]   ;;  %s14696_s11 = inlined_call_operand.vmem [shape: f32[64,128], index: 11, kind: output, shape index: {}]  }
   0x1   :  { %s12359_s19 = smov 0  }
   0x2 LB: > { %s9130_s20 = sadd.s32 4294967295, %s12291_s19   ;;  %s12372_s21 = sadd.s32 1, %s12291_s19   ;;  %s12291_s19 = sphi %s12359_s19, %s14990_s19   ;;  %s12287_s18 = sphi %s12357_s18, %s14989_s18   ;;  %s12283_s17 = sphi %s12355_s17, %s14988_s17  }
   0x3   : > { %s25_s22 = ssub.s32 %s12291_s19, %s12372_s21  ;;  %s28_s23 = sadd.s32 1, %s12287_s18 }
   0x4   : > { %p26_p0 = scmp.eq.s32.totalorder %s25_s22, 0  ;;  %p35_p1 = scmp.ne.s32.totalorder %s12287_s18, %s12283_s17 }
   0x5   : > { %p36_p2 = scmp.eq.s32.totalorder %s12291_s19, 0  ;;  %p9133_p4 = scmp.ge.s32.totalorder %s12291_s19, 2 }
   0x6   : > { %s12381_s24 = scalar_select %p26_p0, %s12287_s18, %s28_s23  }
   0x7   : > { %p37_p3 = por %p36_p2, %p35_p1  ;;  %327 = sbr.rel (%p9133_p4) target bundleno = 46 (0x2e), region = 56 }
   0xe   : > { %330 = sbr.rel (!%p37_p3) target bundleno = 46 (0x2e), region = 60  ;;  %s332_s25 = sand.u32 (%p37_p3), 1, %s12287_s18  }
   0xf   : > { %s10202_s26 = sshll.u32 (%p37_p3), %s12291_s19, 4  ;;  %s11803_s27 = smul.u32 (%p37_p3), 448, %s332_s25 }
  0x10   : > { %s12389_s30 = scalar_lea.vmem (%p37_p3), %s14685_s0, %s10202_s26 }
  0x11   : > { %v353_v0 = vld [vmem:[%s12389_s30] sm:$0xff] (%p37_p3)   ;;  %v357_v1 = vld [vmem:[%s12389_s30 + $0x8] sm:$0xff] (%p37_p3)   ;;  %s12397_s12 = scalar_lea.vmem (%p37_p3), [#allocation2], %s11803_s27 }
  0x12   : > { %v361_v2 = vld [vmem:[%s12389_s30 + $0x20] sm:$0xff] (%p37_p3)   ;;  %v365_v3 = vld [vmem:[%s12389_s30 + $0x28] sm:$0xff] (%p37_p3)   ;;  %354 = vst [vmem:[%s12397_s12] sm:$0xff] (%p37_p3), %v353_v0   ;;  %358 = vst [vmem:[%s12397_s12 + $0x8] sm:$0xff] (%p37_p3), %v357_v1  }
  0x13   : > { %v369_v4 = vld [vmem:[%s12389_s30 + $0x40] sm:$0xff] (%p37_p3)   ;;  %v373_v5 = vld [vmem:[%s12389_s30 + $0x48] sm:$0xff] (%p37_p3)   ;;  %362 = vst [vmem:[%s12397_s12 + $0x10] sm:$0xff] (%p37_p3), %v361_v2   ;;  %366 = vst [vmem:[%s12397_s12 + $0x18] sm:$0xff] (%p37_p3), %v365_v3  }
  0x14   : > { %370 = vst [vmem:[%s12397_s12 + $0x20] sm:$0xff] (%p37_p3), %v369_v4   ;;  %374 = vst [vmem:[%s12397_s12 + $0x28] sm:$0xff] (%p37_p3), %v373_v5   ;;  %v377_v6 = vld [vmem:[%s12389_s30 + $0x60] sm:$0xff] (%p37_p3)   ;;  %v381_v7 = vld [vmem:[%s12389_s30 + $0x68] sm:$0xff] (%p37_p3)  }
  0x15   : > { %v385_v8 = vld [vmem:[%s12389_s30 + $0x80] sm:$0xff]   ;;  %378 = vst [vmem:[%s12397_s12 + $0x30] sm:$0xff] %v377_v6   ;;  %382 = vst [vmem:[%s12397_s12 + $0x38] sm:$0xff] %v381_v7   ;;  %v389_v9 = vld [vmem:[%s12389_s30 + $0x88] sm:$0xff]  }
  0x16   : > { %386 = vst [vmem:[%s12397_s12 + $0x40] sm:$0xff] %v385_v8   ;;  %v393_v10 = vld [vmem:[%s12389_s30 + $0xa0] sm:$0xff]   ;;  %v397_v11 = vld [vmem:[%s12389_s30 + $0xa8] sm:$0xff]   ;;  %390 = vst [vmem:[%s12397_s12 + $0x48] sm:$0xff] %v389_v9  }
  0x17   : > { %394 = vst [vmem:[%s12397_s12 + $0x50] sm:$0xff] %v393_v10   ;;  %398 = vst [vmem:[%s12397_s12 + $0x58] sm:$0xff] %v397_v11   ;;  %v401_v12 = vld [vmem:[%s12389_s30 + $0xc0] sm:$0xff]   ;;  %v405_v13 = vld [vmem:[%s12389_s30 + $0xc8] sm:$0xff]  }
  0x18   : > { %v409_v14 = vld [vmem:[%s12389_s30 + $0xe0] sm:$0xff]   ;;  %402 = vst [vmem:[%s12397_s12 + $0x60] sm:$0xff] %v401_v12   ;;  %406 = vst [vmem:[%s12397_s12 + $0x68] sm:$0xff] %v405_v13   ;;  %v413_v15 = vld [vmem:[%s12389_s30 + $0xe8] sm:$0xff]  }
  0x19   : > { %410 = vst [vmem:[%s12397_s12 + $0x70] sm:$0xff] %v409_v14   ;;  %v417_v16 = vld [vmem:[%s12389_s30 + $0x100] sm:$0xff]   ;;  %v421_v17 = vld [vmem:[%s12389_s30 + $0x108] sm:$0xff]   ;;  %414 = vst [vmem:[%s12397_s12 + $0x78] sm:$0xff] %v413_v15  }
  0x1a   : > { %418 = vst [vmem:[%s12397_s12 + $0x80] sm:$0xff] %v417_v16   ;;  %422 = vst [vmem:[%s12397_s12 + $0x88] sm:$0xff] %v421_v17   ;;  %v425_v18 = vld [vmem:[%s12389_s30 + $0x120] sm:$0xff]   ;;  %v429_v19 = vld [vmem:[%s12389_s30 + $0x128] sm:$0xff]  }
  0x1b   : > { %v433_v20 = vld [vmem:[%s12389_s30 + $0x140] sm:$0xff]   ;;  %426 = vst [vmem:[%s12397_s12 + $0x90] sm:$0xff] %v425_v18   ;;  %430 = vst [vmem:[%s12397_s12 + $0x98] sm:$0xff] %v429_v19   ;;  %v437_v21 = vld [vmem:[%s12389_s30 + $0x148] sm:$0xff]  }
  0x1c   : > { %434 = vst [vmem:[%s12397_s12 + $0xa0] sm:$0xff] %v433_v20   ;;  %v441_v22 = vld [vmem:[%s12389_s30 + $0x160] sm:$0xff]   ;;  %v445_v23 = vld [vmem:[%s12389_s30 + $0x168] sm:$0xff]   ;;  %438 = vst [vmem:[%s12397_s12 + $0xa8] sm:$0xff] %v437_v21  }
  0x1d   : > { %442 = vst [vmem:[%s12397_s12 + $0xb0] sm:$0xff] %v441_v22   ;;  %446 = vst [vmem:[%s12397_s12 + $0xb8] sm:$0xff] %v445_v23   ;;  %v449_v24 = vld [vmem:[%s12389_s30 + $0x180] sm:$0xff]   ;;  %v453_v25 = vld [vmem:[%s12389_s30 + $0x188] sm:$0xff]  }
  0x1e   : > { %v457_v26 = vld [vmem:[%s12389_s30 + $0x1a0] sm:$0xff]   ;;  %450 = vst [vmem:[%s12397_s12 + $0xc0] sm:$0xff] %v449_v24   ;;  %454 = vst [vmem:[%s12397_s12 + $0xc8] sm:$0xff] %v453_v25   ;;  %v461_v27 = vld [vmem:[%s12389_s30 + $0x1a8] sm:$0xff]  }
  0x1f   : > { %458 = vst [vmem:[%s12397_s12 + $0xd0] sm:$0xff] %v457_v26   ;;  %v465_v28 = vld [vmem:[%s12389_s30 + $0x1c0] sm:$0xff]   ;;  %v469_v29 = vld [vmem:[%s12389_s30 + $0x1c8] sm:$0xff]   ;;  %462 = vst [vmem:[%s12397_s12 + $0xd8] sm:$0xff] %v461_v27  }
  0x20   : > { %466 = vst [vmem:[%s12397_s12 + $0xe0] sm:$0xff] %v465_v28   ;;  %470 = vst [vmem:[%s12397_s12 + $0xe8] sm:$0xff] %v469_v29   ;;  %v473_v30 = vld [vmem:[%s12389_s30 + $0x1e0] sm:$0xff]   ;;  %v477_v31 = vld [vmem:[%s12389_s30 + $0x1e8] sm:$0xff]  }
  0x21   : > { %v481_v32 = vld [vmem:[%s12389_s30 + $0x200] sm:$0xff]   ;;  %474 = vst [vmem:[%s12397_s12 + $0xf0] sm:$0xff] %v473_v30   ;;  %478 = vst [vmem:[%s12397_s12 + $0xf8] sm:$0xff] %v477_v31   ;;  %v485_v33 = vld [vmem:[%s12389_s30 + $0x208] sm:$0xff]  }
  0x22   : > { %482 = vst [vmem:[%s12397_s12 + $0x100] sm:$0xff] %v481_v32   ;;  %v489_v34 = vld [vmem:[%s12389_s30 + $0x220] sm:$0xff]   ;;  %v493_v35 = vld [vmem:[%s12389_s30 + $0x228] sm:$0xff]   ;;  %486 = vst [vmem:[%s12397_s12 + $0x108] sm:$0xff] %v485_v33  }
  0x23   : > { %490 = vst [vmem:[%s12397_s12 + $0x110] sm:$0xff] %v489_v34   ;;  %494 = vst [vmem:[%s12397_s12 + $0x118] sm:$0xff] %v493_v35   ;;  %v497_v36 = vld [vmem:[%s12389_s30 + $0x240] sm:$0xff]   ;;  %v501_v37 = vld [vmem:[%s12389_s30 + $0x248] sm:$0xff]  }
  0x24   : > { %v505_v38 = vld [vmem:[%s12389_s30 + $0x260] sm:$0xff]   ;;  %498 = vst [vmem:[%s12397_s12 + $0x120] sm:$0xff] %v497_v36   ;;  %502 = vst [vmem:[%s12397_s12 + $0x128] sm:$0xff] %v501_v37   ;;  %v509_v39 = vld [vmem:[%s12389_s30 + $0x268] sm:$0xff]  }
  0x25   : > { %506 = vst [vmem:[%s12397_s12 + $0x130] sm:$0xff] %v505_v38   ;;  %v513_v40 = vld [vmem:[%s12389_s30 + $0x280] sm:$0xff]   ;;  %v517_v41 = vld [vmem:[%s12389_s30 + $0x288] sm:$0xff]   ;;  %510 = vst [vmem:[%s12397_s12 + $0x138] sm:$0xff] %v509_v39  }
  0x26   : > { %514 = vst [vmem:[%s12397_s12 + $0x140] sm:$0xff] %v513_v40   ;;  %518 = vst [vmem:[%s12397_s12 + $0x148] sm:$0xff] %v517_v41   ;;  %v521_v42 = vld [vmem:[%s12389_s30 + $0x2a0] sm:$0xff]   ;;  %v525_v43 = vld [vmem:[%s12389_s30 + $0x2a8] sm:$0xff]  }
  0x27   : > { %v529_v44 = vld [vmem:[%s12389_s30 + $0x2c0] sm:$0xff]   ;;  %522 = vst [vmem:[%s12397_s12 + $0x150] sm:$0xff] %v521_v42   ;;  %526 = vst [vmem:[%s12397_s12 + $0x158] sm:$0xff] %v525_v43   ;;  %v533_v45 = vld [vmem:[%s12389_s30 + $0x2c8] sm:$0xff]  }
  0x28   : > { %530 = vst [vmem:[%s12397_s12 + $0x160] sm:$0xff] %v529_v44   ;;  %v537_v46 = vld [vmem:[%s12389_s30 + $0x2e0] sm:$0xff]   ;;  %v541_v47 = vld [vmem:[%s12389_s30 + $0x2e8] sm:$0xff]   ;;  %534 = vst [vmem:[%s12397_s12 + $0x168] sm:$0xff] %v533_v45  }
  0x29   : > { %538 = vst [vmem:[%s12397_s12 + $0x170] sm:$0xff] %v537_v46   ;;  %542 = vst [vmem:[%s12397_s12 + $0x178] sm:$0xff] %v541_v47   ;;  %v545_v48 = vld [vmem:[%s12389_s30 + $0x300] sm:$0xff]   ;;  %v549_v49 = vld [vmem:[%s12389_s30 + $0x308] sm:$0xff]  }
  0x2a   : > { %v553_v50 = vld [vmem:[%s12389_s30 + $0x320] sm:$0xff]   ;;  %546 = vst [vmem:[%s12397_s12 + $0x180] sm:$0xff] %v545_v48   ;;  %550 = vst [vmem:[%s12397_s12 + $0x188] sm:$0xff] %v549_v49   ;;  %v557_v51 = vld [vmem:[%s12389_s30 + $0x328] sm:$0xff]  }
  0x2b   : > { %554 = vst [vmem:[%s12397_s12 + $0x190] sm:$0xff] %v553_v50   ;;  %v561_v52 = vld [vmem:[%s12389_s30 + $0x340] sm:$0xff]   ;;  %v565_v53 = vld [vmem:[%s12389_s30 + $0x348] sm:$0xff]   ;;  %558 = vst [vmem:[%s12397_s12 + $0x198] sm:$0xff] %v557_v51  }
  0x2c   : > { %562 = vst [vmem:[%s12397_s12 + $0x1a0] sm:$0xff] %v561_v52   ;;  %566 = vst [vmem:[%s12397_s12 + $0x1a8] sm:$0xff] %v565_v53   ;;  %v569_v54 = vld [vmem:[%s12389_s30 + $0x360] sm:$0xff]   ;;  %v573_v55 = vld [vmem:[%s12389_s30 + $0x368] sm:$0xff]  }
  0x2d   : > { %570 = vst [vmem:[%s12397_s12 + $0x1b0] sm:$0xff] %v569_v54   ;;  %574 = vst [vmem:[%s12397_s12 + $0x1b8] sm:$0xff] %v573_v55  }
  0x2e PF: > { %p9136_p5 = scmp.ge.s32.totalorder %s12291_s19, 1  ;;  %p822_p6 = scmp.lt.s32.totalorder %s12291_s19, 3 }
  0x30   : > { %p823_p7 = pnand %p9136_p5, %p822_p6 }
  0x32   : > { %826 = sbr.rel (%p823_p7) target bundleno = 2608 (0xa30), region = 101 }
  0x39   : > { %v11911_v56 = vld [vmem:[%s14686_s1 + $0x24] ss:$8 sps:$4 sm:$0xff]   ;;  %vm1391_vm0 = vcmask 1045504   ;;  %v11913_v57 = vld [vmem:[%s14686_s1 + $0x20] ss:$8 sps:$4 sm:$0xff]   ;;  %v14697_v58 = vmov 0  }
  0x3a   : > { %2453 = vmatprep.mubr.bf16.mxu0 %v14697_v58  ;;  %s829_s22 = sand.u32 1, %s12283_s17   ;;  %1430 = vmatprep.mubr.bf16.mxu1 %v14697_v58  ;;  %v11914_v59 = vld [vmem:[%s14686_s1 + $0x34] ss:$8 sps:$4 sm:$0x3f]   ;;  %v11920_v62 = vld [vmem:[%s14686_s1 + $0x44] ss:$8 sps:$4 sm:$0xff]  }
  0x3b   : > { %2421 = vmatprep.subr.bf16.mxu0 %v11911_v56  ;;  %v11916_v60 = vld [vmem:[%s14686_s1 + $0x30] ss:$8 sps:$4 sm:$0x3f]   ;;  %s11804_s28 = smul.u32 448, %s829_s22  ;;  %vm1246_vm1 = vcmask 228352   ;;  %s9137_s27 = sshll.u32 %s9130_s20, 2 }
  0x3c   : > { %2422 = vmatpush1.bf16.msra.mxu0 %v11913_v57  ;;  %v2416_v61 = vsel %vm1391_vm0, %v11916_v60, 0  ;;  %v11922_v0 = vld [vmem:[%s14686_s1 + $0x54] ss:$8 sps:$4 sm:$0x3f]   ;;  %v11918_v1 = vld [vmem:[%s14686_s1 + $0x40] ss:$8 sps:$4 sm:$0xff]  }
  0x3d   : > { %9392 = vmatprep.subr.msk.bf16.mxu0 %vm1391_vm0, %v11914_v59  ;;  %s12527_s17 = scalar_lea.vmem [#allocation2], %s11804_s28  ;;  %v11924_v2 = vld [vmem:[%s14686_s1 + $0x50] ss:$8 sps:$4 sm:$0x3f]   ;;  %v11929_v4 = vld [vmem:[%s14686_s1 + $0x64] ss:$8 sps:$4 sm:$0xff]  }
  0x3e   : > { %v11917_v63 = vld [vmem:[%s12527_s17 + $0x10] sm:$0xff]   ;;  %v3631_v3 = vsel %vm1391_vm0, %v11924_v2, 0  ;;  %v11921_v5 = vld [vmem:[%s12527_s17 + $0x18] sm:$0xff]   ;;  %v11934_v6 = vld [vmem:[%s14686_s1 + $0x4] ss:$8 sps:$4 sm:$0xff]   ;;  %s12294_s28 = smov 64  }
  0x3f   : > { %v11936_v7 = vld [vmem:[%s14686_s1] ss:$8 sps:$4 sm:$0xff]   ;;  %1398 = vmatprep.subr.bf16.mxu1 %v11934_v6  ;;  %v11937_v8 = vld [vmem:[%s14686_s1 + $0x14] ss:$8 sps:$4 sm:$0x3f]   ;;  %p870_p8 = scmp.lt.s32.totalorder %s9137_s27, 7 }
  0x40   : > { %2424 = vmatpush1.bf16.msra.mxu0 %v2416_v61  ;;  %1399 = vmatpush1.bf16.msra.mxu1 %v11936_v7  ;;  %v11940_v9 = vld [vmem:[%s14686_s1 + $0x10] ss:$8 sps:$4 sm:$0x3f]   ;;  %v11941_v11 = vld [vmem:[%s12527_s17] sm:$0xff]   ;;  %v11943_v13 = vld [vmem:[%s12527_s17 + $0x8] sm:$0xff]  }
  0x41   : > { %3636 = vmatprep.subr.bf16.mxu0 %v11920_v62  ;;  %9191 = vmatprep.subr.msk.bf16.mxu1 %vm1391_vm0, %v11937_v8  ;;  %v1393_v10 = vsel %vm1391_vm0, %v11940_v9, 0  ;;  %v11925_v12 = vld [vmem:[%s12527_s17 + $0x20] sm:$0xff]   ;;  %v11945_v16 = vld [vmem:[%s12527_s17 + $0x10] sm:$0xff]   ;;  %v11930_v17 = vld [vmem:[%s12527_s17 + $0x28] sm:$0xff]   ;;  %s14992_s27 = smov (!%p870_p8, %s9137_s27), 7 }
  0x42   : > { %v11926_v14 = vld [vmem:[%s12527_s17 + $0x20] sm:$0xff]   ;;  %v11931_v18 = vld [vmem:[%s12527_s17 + $0x30] sm:$0xff]   ;;  %v11947_v19 = vld [vmem:[%s12527_s17 + $0x18] sm:$0xff]   ;;  %s9138_s29 = sshll.u32 %s14992_s27, 3 }
  0x43   : > { %9393 = vmatmul.mubr.msk.bf16.vlgmr.msra.gmra.mrb[0].mxu0 %vm1246_vm1, %v11917_v63  ;;  %v11927_v15 = vld [vmem:[%s14686_s1 + $0x60] ss:$8 sps:$4 sm:$0xff]   ;;  %v11932_v21 = vld [vmem:[%s12527_s17 + $0x38] sm:$0xff]   ;;  %v11953_v24 = vld [vmem:[%s12527_s17 + $0x30] sm:$0xff]   ;;  %s873_s13 = scalar_lea.vmem %s14696_s11, %s9138_s29 }
  0x44   : > { %3637 = vmatpush1.bf16.msra.mxu0 %v11918_v1  ;;  %2463 = vmatprep.mubr.bf16.mxu0 %v14697_v58  ;;  %v11949_v20 = vld [vmem:[%s12527_s17 + $0x20] sm:$0xff]   ;;  %v11951_v22 = vld [vmem:[%s12527_s17 + $0x28] sm:$0xff]   ;;  %v11955_v26 = vld [vmem:[%s12527_s17 + $0x38] sm:$0xff]  }
  0x45   : > { %9593 = vmatprep.subr.msk.bf16.mxu0 %vm1391_vm0, %v11922_v0  ;;  %1401 = vmatpush1.bf16.msra.mxu1 %v1393_v10  ;;  %v11933_v23 = vld [vmem:[%s12527_s17 + $0x40] sm:$0xff]   ;;  %v11939_v25 = vld [vmem:[%s12527_s17 + $0x48] sm:$0xff]   ;;  %v11942_v27 = vld [vmem:[%s12527_s17 + $0x50] sm:$0xff]  }
  0x46   : > { %10679 = vmatprep.subr.bf16.mxu1 %v11911_v56  ;;  %v11957_v28 = vld [vmem:[%s12527_s17 + $0x40] sm:$0xff]   ;;  %v11944_v29 = vld [vmem:[%s12527_s17 + $0x58] sm:$0xff]   ;;  %v11959_v30 = vld [vmem:[%s12527_s17 + $0x48] sm:$0xff]  }
  0x47   : > { %v11946_v31 = vld [vmem:[%s12527_s17 + $0x60] sm:$0xff]   ;;  %v11979_v32 = vld [vmem:[%s14686_s1 + $0x74] ss:$8 sps:$4 sm:$0x3f]   ;;  %v11948_v35 = vld [vmem:[%s12527_s17 + $0x68] sm:$0xff]  }
  0x48   : > { %3639 = vmatpush1.bf16.msra.mxu0 %v3631_v3  ;;  %9192 = vmatmul.mubr.msk.bf16.vlgmr.msra.gmra.mrb[0].mxu1 %vm1246_vm1, %v11941_v11  ;;  %v11981_v33 = vld [vmem:[%s14686_s1 + $0x70] ss:$8 sps:$4 sm:$0x3f]   ;;  %v11965_v39 = vld [vmem:[%s12527_s17 + $0x60] sm:$0xff]   ;;  %v11967_v41 = vld [vmem:[%s12527_s17 + $0x68] sm:$0xff]  }
  0x49   : > { %4851 = vmatprep.subr.bf16.mxu0 %v11929_v4  ;;  %1440 = vmatprep.mubr.bf16.mxu1 %v14697_v58  ;;  %v11961_v34 = vld [vmem:[%s12527_s17 + $0x50] sm:$0xff]   ;;  %v4846_v36 = vsel %vm1391_vm0, %v11981_v33, 0  ;;  %v11963_v37 = vld [vmem:[%s12527_s17 + $0x58] sm:$0xff]   ;;  %v11954_v42 = vld [vmem:[%s12527_s17 + $0x80] sm:$0xff]  }
  0x4a   : > { %10681 = vmatpush1.bf16.msra.mxu1 %v11913_v57  ;;  %v11950_v38 = vld [vmem:[%s12527_s17 + $0x70] sm:$0xff]   ;;  %v11952_v40 = vld [vmem:[%s12527_s17 + $0x78] sm:$0xff]   ;;  %v11956_v44 = vld [vmem:[%s12527_s17 + $0x88] sm:$0xff]  }
  0x4b   : > { %9394 = vmatmul.mubr.msk.bf16.gmra.mrb[4].mxu0 %vm1246_vm1, %v11921_v5  ;;  %10680 = vmatprep.subr.msk.bf16.mxu1 %vm1391_vm0, %v11914_v59  ;;  %v11969_v43 = vld [vmem:[%s12527_s17 + $0x70] sm:$0xff]   ;;  %v11971_v45 = vld [vmem:[%s12527_s17 + $0x78] sm:$0xff]   ;;  %v11973_v47 = vld [vmem:[%s12527_s17 + $0x80] sm:$0xff]  }
  0x4c   : > { %2473 = vmatprep.mubr.bf16.mxu0 %v14697_v58  ;;  %v11958_v46 = vld [vmem:[%s12527_s17 + $0x90] sm:$0xff]   ;;  %v11960_v48 = vld [vmem:[%s12527_s17 + $0x98] sm:$0xff]   ;;  %v11975_v49 = vld [vmem:[%s12527_s17 + $0x88] sm:$0xff]  }
  0x4d   : > { %v11962_v50 = vld [vmem:[%s12527_s17 + $0xa0] sm:$0xff]   ;;  %v11977_v51 = vld [vmem:[%s12527_s17 + $0x90] sm:$0xff]   ;;  %v11964_v52 = vld [vmem:[%s12527_s17 + $0xa8] sm:$0xff]  }
  0x4e   : > { %10682 = vmatpush1.bf16.msra.mxu1 %v2416_v61  ;;  %v11982_v53 = vld [vmem:[%s12527_s17 + $0x98] sm:$0xff]   ;;  %v11966_v54 = vld [vmem:[%s12527_s17 + $0xb0] sm:$0xff]   ;;  %v11984_v55 = vld [vmem:[%s12527_s17 + $0xa0] sm:$0xff]  }
  0x4f   : > { %v11968_v56 = vld [vmem:[%s12527_s17 + $0xb8] sm:$0xff]   ;;  %v11986_v57 = vld [vmem:[%s12527_s17 + $0xa8] sm:$0xff]   ;;  %v11970_v59 = vld [vmem:[%s12527_s17 + $0xc0] sm:$0xff]  }
  0x50   : > { %9193 = vmatmul.mubr.msk.bf16.gmra.mrb[4].mxu1 %vm1246_vm1, %v11943_v13  ;;  %v11988_v60 = vld [vmem:[%s12527_s17 + $0xb0] sm:$0xff]   ;;  %v11972_v61 = vld [vmem:[%s12527_s17 + $0xc8] sm:$0xff]   ;;  %v11990_v62 = vld [vmem:[%s12527_s17 + $0xb8] sm:$0xff]  }
  0x51   : > { %1450 = vmatprep.mubr.bf16.mxu1 %v14697_v58  ;;  %v11974_v63 = vld [vmem:[%s12527_s17 + $0xd0] sm:$0xff]   ;;  %v11992_v0 = vld [vmem:[%s12527_s17 + $0xc0] sm:$0xff]   ;;  %v11976_v1 = vld [vmem:[%s12527_s17 + $0xd8] sm:$0xff]  }
  0x52   : > { %v11994_v2 = vld [vmem:[%s12527_s17 + $0xc8] sm:$0xff]   ;;  %v11978_v3 = vld [vmem:[%s12527_s17 + $0xe0] sm:$0xff]   ;;  %v11996_v4 = vld [vmem:[%s12527_s17 + $0xd0] sm:$0xff]  }
  0x53   : > { %9395 = vmatmul.mubr.msk.bf16.gmra.mrb[8].mxu0 %vm1246_vm1, %v11925_v12  ;;  %v11983_v5 = vld [vmem:[%s12527_s17 + $0xe8] sm:$0xff]   ;;  %v11998_v6 = vld [vmem:[%s12527_s17 + $0xd8] sm:$0xff]   ;;  %v11985_v7 = vld [vmem:[%s12527_s17 + $0xf0] sm:$0xff]  }
  0x54   : > { %3668 = vmatprep.mubr.bf16.mxu0 %v14697_v58  ;;  %v12000_v8 = vld [vmem:[%s12527_s17 + $0xe0] sm:$0xff]   ;;  %v11987_v9 = vld [vmem:[%s12527_s17 + $0xf8] sm:$0xff]   ;;  %v12002_v10 = vld [vmem:[%s12527_s17 + $0xe8] sm:$0xff]  }
  0x55   : > { %v11989_v11 = vld [vmem:[%s12527_s17 + $0x100] sm:$0xff]   ;;  %v12004_v12 = vld [vmem:[%s12527_s17 + $0xf0] sm:$0xff]   ;;  %v11991_v13 = vld [vmem:[%s12527_s17 + $0x108] sm:$0xff]  }
  0x56   : > { %v12024_v33 = vld [vmem:[%s12527_s17 + $0x140] sm:$0xff]  }
  0x58   : > { %9194 = vmatmul.mubr.msk.bf16.gmra.mrb[8].mxu1 %vm1246_vm1, %v11945_v16  ;;  %v12008_v16 = vld [vmem:[%s12527_s17 + $0x100] sm:$0xff]  }
  0x59   : > { %1460 = vmatprep.mubr.bf16.mxu1 %v14697_v58 }
  0x5b   : > { %9594 = vmatmul.mubr.msk.bf16.vlgmr.msra.gmra.mrb[0].mxu0 %vm1246_vm1, %v11926_v14  ;;  %v12006_v14 = vld [vmem:[%s12527_s17 + $0xf8] sm:$0xff]  }
  0x5c   : > { %4852 = vmatpush1.bf16.msra.mxu0 %v11927_v15  ;;  %3678 = vmatprep.mubr.bf16.mxu0 %v14697_v58  ;;  %v11993_v15 = vld [vmem:[%s12527_s17 + $0x110] sm:$0xff]  }
  0x5d   : > { %9794 = vmatprep.subr.msk.bf16.mxu0 %vm1391_vm0, %v11979_v32  ;;  %v12009_v32 = vld [vmem:[%s12527_s17 + $0x150] sm:$0xff]  }
  0x60   : > { %9195 = vmatmul.mubr.msk.bf16.gmra.mrb[12].mxu1 %vm1246_vm1, %v11947_v19  ;;  %4854 = vmatpush1.bf16.msra.mxu0 %v4846_v36  ;;  %v11997_v19 = vld [vmem:[%s12527_s17 + $0x120] sm:$0xff]  }
  0x61   : > { %1470 = vmatprep.mubr.bf16.mxu1 %v14697_v58  ;;  %v12013_v36 = vld [vmem:[%s12527_s17 + $0x160] sm:$0xff]  }
  0x63   : > { %9595 = vmatmul.mubr.msk.bf16.gmra.mrb[4].mxu0 %vm1246_vm1, %v11930_v17  ;;  %v11995_v17 = vld [vmem:[%s12527_s17 + $0x118] sm:$0xff]  }
  0x64   : > { %3688 = vmatprep.mubr.bf16.mxu0 %v14697_v58 }
  0x68   : > { %9196 = vmatmul.mubr.msk.bf16.gmra.mrb[16].mxu1 %vm1246_vm1, %v11949_v20  ;;  %v12032_v20 = vld [vmem:[%s14686_s1 + $0x84] ss:$8 sps:$4 sm:$0xff]  }
  0x69   : > { %1480 = vmatprep.mubr.bf16.mxu1 %v14697_v58  ;;  %6066 = vmatprep.subr.bf16.mxu0 %v12032_v20  ;;  %v12071_v20 = vld [vmem:[%s12527_s17 + $0x98] sm:$0xff]  }
  0x6b   : > { %9596 = vmatmul.mubr.msk.bf16.gmra.mrb[8].mxu0 %vm1246_vm1, %v11931_v18  ;;  %v12010_v18 = vld [vmem:[%s12527_s17 + $0x108] sm:$0xff]  }
  0x6c   : > { %3698 = vmatprep.mubr.bf16.mxu0 %v14697_v58 }
  0x70   : > { %9197 = vmatmul.mubr.msk.bf16.gmra.mrb[20].mxu1 %vm1246_vm1, %v11951_v22  ;;  %v11999_v22 = vld [vmem:[%s12527_s17 + $0x128] sm:$0xff]  }
  0x71   : > { %1490 = vmatprep.mubr.bf16.mxu1 %v14697_v58 }
  0x73   : > { %9597 = vmatmul.mubr.msk.bf16.gmra.mrb[12].mxu0 %vm1246_vm1, %v11932_v21  ;;  %v12012_v21 = vld [vmem:[%s12527_s17 + $0x110] sm:$0xff]  }
  0x74   : > { %3708 = vmatprep.mubr.bf16.mxu0 %v14697_v58 }
  0x78   : > { %9198 = vmatmul.mubr.msk.bf16.gmra.mrb[24].mxu1 %vm1246_vm1, %v11953_v24  ;;  %v12001_v24 = vld [vmem:[%s12527_s17 + $0x130] sm:$0xff]  }
  0x79   : > { %1500 = vmatprep.mubr.bf16.mxu1 %v14697_v58 }
  0x7b   : > { %9598 = vmatmul.mubr.msk.bf16.gmra.mrb[16].mxu0 %vm1246_vm1, %v11933_v23  ;;  %v12014_v23 = vld [vmem:[%s12527_s17 + $0x118] sm:$0xff]  }
  0x7c   : > { %3718 = vmatprep.mubr.bf16.mxu0 %v14697_v58 }
  0x80   : > { %9199 = vmatmul.mubr.msk.bf16.gmra.mrb[28].mxu1 %vm1246_vm1, %v11955_v26  ;;  %v12003_v26 = vld [vmem:[%s12527_s17 + $0x138] sm:$0xff]  }
  0x81   : > { %1510 = vmatprep.mubr.bf16.mxu1 %v14697_v58 }
  0x83   : > { %9599 = vmatmul.mubr.msk.bf16.gmra.mrb[20].mxu0 %vm1246_vm1, %v11939_v25  ;;  %v12016_v25 = vld [vmem:[%s12527_s17 + $0x120] sm:$0xff]  }
  0x84   : > { %3728 = vmatprep.mubr.bf16.mxu0 %v14697_v58 }
  0x88   : > { %9200 = vmatmul.mubr.msk.bf16.gmra.mrb[32].mxu1 %vm1246_vm1, %v11957_v28  ;;  %v12005_v28 = vld [vmem:[%s12527_s17 + $0x140] sm:$0xff]  }
  0x89   : > { %1520 = vmatprep.mubr.bf16.mxu1 %v14697_v58 }
  0x8b   : > { %9600 = vmatmul.mubr.msk.bf16.gmra.mrb[24].mxu0 %vm1246_vm1, %v11942_v27  ;;  %v12018_v27 = vld [vmem:[%s12527_s17 + $0x128] sm:$0xff]  }
  0x8c   : > { %3738 = vmatprep.mubr.bf16.mxu0 %v14697_v58 }
  0x90   : > { %9201 = vmatmul.mubr.msk.bf16.gmra.mrb[36].mxu1 %vm1246_vm1, %v11959_v30  ;;  %v12007_v30 = vld [vmem:[%s12527_s17 + $0x148] sm:$0xff]  }
  0x91   : > { %1530 = vmatprep.mubr.bf16.mxu1 %v14697_v58 }
  0x93   : > { %9601 = vmatmul.mubr.msk.bf16.gmra.mrb[28].mxu0 %vm1246_vm1, %v11944_v29  ;;  %v12020_v29 = vld [vmem:[%s12527_s17 + $0x130] sm:$0xff]  }
  0x94   : > { %3748 = vmatprep.mubr.bf16.mxu0 %v14697_v58 }
  0x98   : > { %9202 = vmatmul.mubr.msk.bf16.gmra.mrb[40].mxu1 %vm1246_vm1, %v11961_v34  ;;  %v12011_v34 = vld [vmem:[%s12527_s17 + $0x158] sm:$0xff]  }
  0x99   : > { %1540 = vmatprep.mubr.bf16.mxu1 %v14697_v58 }
  0x9b   : > { %9602 = vmatmul.mubr.msk.bf16.gmra.mrb[32].mxu0 %vm1246_vm1, %v11946_v31  ;;  %v12022_v31 = vld [vmem:[%s12527_s17 + $0x138] sm:$0xff]  }
  0x9c   : > { %3758 = vmatprep.mubr.bf16.mxu0 %v14697_v58 }
  0xa0   : > { %9203 = vmatmul.mubr.msk.bf16.gmra.mrb[44].mxu1 %vm1246_vm1, %v11963_v37  ;;  %v12028_v37 = vld [vmem:[%s12527_s17 + $0x150] sm:$0xff]  }
  0xa1   : > { %1550 = vmatprep.mubr.bf16.mxu1 %v14697_v58 }
  0xa3   : > { %9603 = vmatmul.mubr.msk.bf16.gmra.mrb[36].mxu0 %vm1246_vm1, %v11948_v35  ;;  %v12026_v35 = vld [vmem:[%s12527_s17 + $0x148] sm:$0xff]  }
  0xa4   : > { %3768 = vmatprep.mubr.bf16.mxu0 %v14697_v58 }
  0xa8   : > { %9204 = vmatmul.mubr.msk.bf16.gmra.mrb[48].mxu1 %vm1246_vm1, %v11965_v39  ;;  %v12033_v39 = vld [vmem:[%s12527_s17 + $0x158] sm:$0xff]  }
  0xa9   : > { %1560 = vmatprep.mubr.bf16.mxu1 %v14697_v58 }
  0xab   : > { %9604 = vmatmul.mubr.msk.bf16.gmra.mrb[40].mxu0 %vm1246_vm1, %v11950_v38  ;;  %v12015_v38 = vld [vmem:[%s12527_s17 + $0x168] sm:$0xff]  }
  0xac   : > { %3778 = vmatprep.mubr.bf16.mxu0 %v14697_v58 }
  0xb0   : > { %9205 = vmatmul.mubr.msk.bf16.gmra.mrb[52].mxu1 %vm1246_vm1, %v11967_v41  ;;  %v12035_v41 = vld [vmem:[%s12527_s17 + $0x160] sm:$0xff]  }
  0xb1   : > { %1570 = vmatprep.mubr.bf16.mxu1 %v14697_v58 }
  0xb3   : > { %9605 = vmatmul.mubr.msk.bf16.gmra.mrb[44].mxu0 %vm1246_vm1, %v11952_v40  ;;  %v12017_v40 = vld [vmem:[%s12527_s17 + $0x170] sm:$0xff]  }
  0xb4   : > { %3788 = vmatprep.mubr.bf16.mxu0 %v14697_v58 }
  0xb8   : > { %9206 = vmatmul.mubr.msk.bf16.gmra.mrb[56].mxu1 %vm1246_vm1, %v11969_v43  ;;  %v12037_v43 = vld [vmem:[%s12527_s17 + $0x168] sm:$0xff]  }
  0xb9   : > { %1580 = vmatprep.mubr.bf16.mxu1 %v14697_v58 }
  0xbb   : > { %9606 = vmatmul.mubr.msk.bf16.gmra.mrb[48].mxu0 %vm1246_vm1, %v11954_v42  ;;  %v12019_v42 = vld [vmem:[%s12527_s17 + $0x178] sm:$0xff]  }
  0xbc   : > { %3798 = vmatprep.mubr.bf16.mxu0 %v14697_v58 }
  0xc0   : > { %9207 = vmatmul.mubr.msk.bf16.gmra.mrb[60].mxu1 %vm1246_vm1, %v11971_v45  ;;  %v12039_v45 = vld [vmem:[%s12527_s17 + $0x170] sm:$0xff]  }
  0xc1   : > { %1590 = vmatprep.mubr.bf16.mxu1 %v14697_v58 }
  0xc3   : > { %9607 = vmatmul.mubr.msk.bf16.gmra.mrb[52].mxu0 %vm1246_vm1, %v11956_v44  ;;  %v12021_v44 = vld [vmem:[%s12527_s17 + $0x180] sm:$0xff]  }
  0xc4   : > { %3808 = vmatprep.mubr.bf16.mxu0 %v14697_v58 }
  0xc8   : > { %9208 = vmatmul.mubr.msk.bf16.gmra.mrb[64].mxu1 %vm1246_vm1, %v11973_v47  ;;  %v12041_v47 = vld [vmem:[%s12527_s17 + $0x178] sm:$0xff]  }
  0xc9   : > { %1600 = vmatprep.mubr.bf16.mxu1 %v14697_v58 }
  0xcb   : > { %9608 = vmatmul.mubr.msk.bf16.gmra.mrb[56].mxu0 %vm1246_vm1, %v11958_v46  ;;  %v12023_v46 = vld [vmem:[%s12527_s17 + $0x188] sm:$0xff]  }
  0xcc   : > { %3818 = vmatprep.mubr.bf16.mxu0 %v14697_v58 }
  0xd0   : > { %9209 = vmatmul.mubr.msk.bf16.gmra.mrb[68].mxu1 %vm1246_vm1, %v11975_v49  ;;  %v12043_v49 = vld [vmem:[%s12527_s17 + $0x28] sm:$0xff]  }
  0xd1   : > { %1610 = vmatprep.mubr.bf16.mxu1 %v14697_v58 }
  0xd3   : > { %9609 = vmatmul.mubr.msk.bf16.gmra.mrb[60].mxu0 %vm1246_vm1, %v11960_v48  ;;  %v12025_v48 = vld [vmem:[%s12527_s17 + $0x190] sm:$0xff]  }
  0xd4   : > { %3828 = vmatprep.mubr.bf16.mxu0 %v14697_v58 }
  0xd8   : > { %9210 = vmatmul.mubr.msk.bf16.gmra.mrb[72].mxu1 %vm1246_vm1, %v11977_v51  ;;  %v12045_v51 = vld [vmem:[%s12527_s17 + $0x30] sm:$0xff]  }
  0xd9   : > { %1620 = vmatprep.mubr.bf16.mxu1 %v14697_v58 }
  0xdb   : > { %9610 = vmatmul.mubr.msk.bf16.gmra.mrb[64].mxu0 %vm1246_vm1, %v11962_v50  ;;  %v12027_v50 = vld [vmem:[%s12527_s17 + $0x198] sm:$0xff]  }
  0xdc   : > { %3838 = vmatprep.mubr.bf16.mxu0 %v14697_v58 }
  0xe0   : > { %9211 = vmatmul.mubr.msk.bf16.gmra.mrb[76].mxu1 %vm1246_vm1, %v11982_v53  ;;  %v12030_v53 = vld [vmem:[%s14686_s1 + $0x80] ss:$8 sps:$4 sm:$0xff]  }
  0xe1   : > { %1630 = vmatprep.mubr.bf16.mxu1 %v14697_v58 }
  0xe3   : > { %9611 = vmatmul.mubr.msk.bf16.gmra.mrb[68].mxu0 %vm1246_vm1, %v11964_v52  ;;  %v12029_v52 = vld [vmem:[%s12527_s17 + $0x30] sm:$0xff]  }
  0xe4   : > { %3848 = vmatprep.mubr.bf16.mxu0 %v14697_v58 }
  0xe8   : > { %9212 = vmatmul.mubr.msk.bf16.gmra.mrb[80].mxu1 %vm1246_vm1, %v11984_v55  ;;  %v12034_v55 = vld [vmem:[%s12527_s17 + $0x38] sm:$0xff]  }
  0xe9   : > { %1640 = vmatprep.mubr.bf16.mxu1 %v14697_v58 }
  0xeb   : > { %9612 = vmatmul.mubr.msk.bf16.gmra.mrb[72].mxu0 %vm1246_vm1, %v11966_v54  ;;  %v12047_v54 = vld [vmem:[%s12527_s17 + $0x38] sm:$0xff]  }
  0xec   : > { %3858 = vmatprep.mubr.bf16.mxu0 %v14697_v58 }
  0xf0   : > { %9213 = vmatmul.mubr.msk.bf16.gmra.mrb[84].mxu1 %vm1246_vm1, %v11986_v57  ;;  %v12036_v57 = vld [vmem:[%s12527_s17 + $0x40] sm:$0xff]  }
  0xf1   : > { %1650 = vmatprep.mubr.bf16.mxu1 %v14697_v58 }
  0xf3   : > { %9613 = vmatmul.mubr.msk.bf16.gmra.mrb[76].mxu0 %vm1246_vm1, %v11968_v56  ;;  %v12049_v56 = vld [vmem:[%s12527_s17 + $0x40] sm:$0xff]  }
  0xf4   : > { %3868 = vmatprep.mubr.bf16.mxu0 %v14697_v58 }
  0xf8   : > { %9214 = vmatmul.mubr.msk.bf16.gmra.mrb[88].mxu1 %vm1246_vm1, %v11988_v60  ;;  %v12038_v60 = vld [vmem:[%s12527_s17 + $0x48] sm:$0xff]  }
  0xf9   : > { %1660 = vmatprep.mubr.bf16.mxu1 %v14697_v58 }
  0xfb   : > { %9614 = vmatmul.mubr.msk.bf16.gmra.mrb[80].mxu0 %vm1246_vm1, %v11970_v59  ;;  %v12051_v59 = vld [vmem:[%s12527_s17 + $0x48] sm:$0xff]  }
  0xfc   : > { %3878 = vmatprep.mubr.bf16.mxu0 %v14697_v58 }
 0x100   : > { %9215 = vmatmul.mubr.msk.bf16.gmra.mrb[92].mxu1 %vm1246_vm1, %v11990_v62  ;;  %v12040_v62 = vld [vmem:[%s12527_s17 + $0x50] sm:$0xff]  }
 0x101   : > { %1670 = vmatprep.mubr.bf16.mxu1 %v14697_v58 }
 0x103   : > { %9615 = vmatmul.mubr.msk.bf16.gmra.mrb[84].mxu0 %vm1246_vm1, %v11972_v61  ;;  %v12053_v61 = vld [vmem:[%s12527_s17 + $0x50] sm:$0xff]  }
 0x104   : > { %3888 = vmatprep.mubr.bf16.mxu0 %v14697_v58 }
 0x108   : > { %9216 = vmatmul.mubr.msk.bf16.gmra.mrb[96].mxu1 %vm1246_vm1, %v11992_v0  ;;  %v12042_v0 = vld [vmem:[%s12527_s17 + $0x58] sm:$0xff]  }
 0x109   : > { %1680 = vmatprep.mubr.bf16.mxu1 %v14697_v58 }
 0x10b   : > { %9616 = vmatmul.mubr.msk.bf16.gmra.mrb[88].mxu0 %vm1246_vm1, %v11974_v63  ;;  %v12055_v63 = vld [vmem:[%s12527_s17 + $0x58] sm:$0xff]  }
 0x10c   : > { %3898 = vmatprep.mubr.bf16.mxu0 %v14697_v58 }
 0x110   : > { %9217 = vmatmul.mubr.msk.bf16.gmra.mrb[100].mxu1 %vm1246_vm1, %v11994_v2  ;;  %v12044_v2 = vld [vmem:[%s12527_s17 + $0x60] sm:$0xff]  }
 0x111   : > { %1690 = vmatprep.mubr.bf16.mxu1 %v14697_v58 }
 0x113   : > { %9617 = vmatmul.mubr.msk.bf16.gmra.mrb[92].mxu0 %vm1246_vm1, %v11976_v1  ;;  %v12057_v1 = vld [vmem:[%s12527_s17 + $0x60] sm:$0xff]  }
 0x114   : > { %3908 = vmatprep.mubr.bf16.mxu0 %v14697_v58 }
 0x118   : > { %9218 = vmatmul.mubr.msk.bf16.gmra.mrb[104].mxu1 %vm1246_vm1, %v11996_v4  ;;  %v12046_v4 = vld [vmem:[%s12527_s17 + $0x68] sm:$0xff]  }
 0x119   : > { %1700 = vmatprep.mubr.bf16.mxu1 %v14697_v58 }
 0x11b   : > { %9618 = vmatmul.mubr.msk.bf16.gmra.mrb[96].mxu0 %vm1246_vm1, %v11978_v3  ;;  %v12059_v3 = vld [vmem:[%s12527_s17 + $0x68] sm:$0xff]  }
 0x11c   : > { %3918 = vmatprep.mubr.bf16.mxu0 %v14697_v58 }
 0x120   : > { %9219 = vmatmul.mubr.msk.bf16.gmra.mrb[108].mxu1 %vm1246_vm1, %v11998_v6  ;;  %v12048_v6 = vld [vmem:[%s12527_s17 + $0x70] sm:$0xff]  }
 0x121   : > { %1710 = vmatprep.mubr.bf16.mxu1 %v14697_v58 }
 0x123   : > { %9619 = vmatmul.mubr.msk.bf16.gmra.mrb[100].mxu0 %vm1246_vm1, %v11983_v5  ;;  %v12061_v5 = vld [vmem:[%s12527_s17 + $0x70] sm:$0xff]  }
 0x124   : > { %3928 = vmatprep.mubr.bf16.mxu0 %v14697_v58 }
 0x128   : > { %9220 = vmatmul.mubr.msk.bf16.gmra.mrb[112].mxu1 %vm1246_vm1, %v12000_v8  ;;  %v12083_v8 = vld [vmem:[%s14686_s1 + $0x90] ss:$8 sps:$4 sm:$0x3f]  }
 0x129   : > { %1720 = vmatprep.mubr.bf16.mxu1 %v14697_v58 }
 0x12b   : > { %9620 = vmatmul.mubr.msk.bf16.gmra.mrb[104].mxu0 %vm1246_vm1, %v11985_v7  ;;  %v12081_v7 = vld [vmem:[%s14686_s1 + $0x94] ss:$8 sps:$4 sm:$0x3f]  }
 0x12c   : > { %3938 = vmatprep.mubr.bf16.mxu0 %v14697_v58 }
 0x130   : > { %9221 = vmatmul.mubr.msk.bf16.gmra.mrb[116].mxu1 %vm1246_vm1, %v12002_v10  ;;  %v12063_v10 = vld [vmem:[%s12527_s17 + $0x78] sm:$0xff]  }
 0x131   : > { %1730 = vmatprep.mubr.bf16.mxu1 %v14697_v58 }
 0x133   : > { %9621 = vmatmul.mubr.msk.bf16.gmra.mrb[108].mxu0 %vm1246_vm1, %v11987_v9  ;;  %v6061_v9 = vsel %vm1391_vm0, %v12083_v8, 0  ;;  %v12091_v8 = vld [vmem:[%s12527_s17 + $0x110] sm:$0xff]  }
 0x134   : > { %3948 = vmatprep.mubr.bf16.mxu0 %v14697_v58 }
 0x138   : > { %9222 = vmatmul.mubr.msk.bf16.gmra.mrb[120].mxu1 %vm1246_vm1, %v12004_v12  ;;  %v12065_v12 = vld [vmem:[%s12527_s17 + $0x80] sm:$0xff]  }
 0x139   : > { %1740 = vmatprep.mubr.bf16.mxu1 %v14697_v58 }
 0x13b   : > { %9622 = vmatmul.mubr.msk.bf16.gmra.mrb[112].mxu0 %vm1246_vm1, %v11989_v11  ;;  %v12050_v11 = vld [vmem:[%s12527_s17 + $0x78] sm:$0xff]  }
 0x13c   : > { %3958 = vmatprep.mubr.bf16.mxu0 %v14697_v58 }
 0x140   : > { %9223 = vmatmul.mubr.msk.bf16.gmra.mrb[124].mxu1 %vm1246_vm1, %v12006_v14  ;;  %v12067_v14 = vld [vmem:[%s12527_s17 + $0x88] sm:$0xff]  }
 0x141   : > { %1750 = vmatprep.mubr.bf16.mxu1 %v14697_v58 }
 0x143   : > { %9623 = vmatmul.mubr.msk.bf16.gmra.mrb[116].mxu0 %vm1246_vm1, %v11991_v13  ;;  %v12052_v13 = vld [vmem:[%s12527_s17 + $0x80] sm:$0xff]  }
 0x144   : > { %3968 = vmatprep.mubr.bf16.mxu0 %v14697_v58 }
 0x148   : > { %9224 = vmatmul.mubr.msk.bf16.gmra.mrb[128].mxu1 %vm1246_vm1, %v12008_v16  ;;  %v12069_v16 = vld [vmem:[%s12527_s17 + $0x90] sm:$0xff]  }
 0x149   : > { %1760 = vmatprep.mubr.bf16.mxu1 %v14697_v58 }
 0x14b   : > { %9624 = vmatmul.mubr.msk.bf16.gmra.mrb[120].mxu0 %vm1246_vm1, %v11993_v15  ;;  %v12054_v15 = vld [vmem:[%s12527_s17 + $0x88] sm:$0xff]  }
 0x14c   : > { %3978 = vmatprep.mubr.bf16.mxu0 %v14697_v58 }
 0x150   : > { %9225 = vmatmul.mubr.msk.bf16.gmra.mrb[132].mxu1 %vm1246_vm1, %v12010_v18  ;;  %v12960_v18 = vpop.f32.mrb[0].mxu1 }
 0x151   : > { %1770 = vmatprep.mubr.bf16.mxu1 %v14697_v58 }
 0x153   : > { %9625 = vmatmul.mubr.msk.bf16.gmra.mrb[124].mxu0 %vm1246_vm1, %v11995_v17  ;;  %v12056_v17 = vld [vmem:[%s12527_s17 + $0x90] sm:$0xff]  }
 0x154   : > { %3988 = vmatprep.mubr.bf16.mxu0 %v14697_v58 }
 0x158   : > { %9226 = vmatmul.mubr.msk.bf16.gmra.mrb[136].mxu1 %vm1246_vm1, %v12012_v21  ;;  %v12058_v21 = vld [vmem:[%s12527_s17 + $0x98] sm:$0xff]  }
 0x159   : > { %1780 = vmatprep.mubr.bf16.mxu1 %v14697_v58 }
 0x15b   : > { %9626 = vmatmul.mubr.msk.bf16.gmra.mrb[128].mxu0 %vm1246_vm1, %v11997_v19  ;;  %v12963_v19 = vpop.f32.mrb[1].mxu1 }
 0x15c   : > { %3998 = vmatprep.mubr.bf16.mxu0 %v14697_v58 }
 0x160   : > { %9227 = vmatmul.mubr.msk.bf16.gmra.mrb[140].mxu1 %vm1246_vm1, %v12014_v23 }
 0x161   : > { %1790 = vmatprep.mubr.bf16.mxu1 %v14697_v58 }
 0x163   : > { %9627 = vmatmul.mubr.msk.bf16.gmra.mrb[132].mxu0 %vm1246_vm1, %v11999_v22  ;;  %v12970_v22 = vpop.f32.mrb[2].mxu1 }
 0x164   : > { %4008 = vmatprep.mubr.bf16.mxu0 %v14697_v58  ;;  %v12973_v23 = vpop.f32.mrb[3].mxu1 }
 0x168   : > { %9228 = vmatmul.mubr.msk.bf16.gmra.mrb[144].mxu1 %vm1246_vm1, %v12016_v25  ;;  %v12073_v25 = vld [vmem:[%s12527_s17 + $0xa0] sm:$0xff]  }
 0x169   : > { %1800 = vmatprep.mubr.bf16.mxu1 %v14697_v58 }
 0x16b   : > { %9628 = vmatmul.mubr.msk.bf16.gmra.mrb[136].mxu0 %vm1246_vm1, %v12001_v24  ;;  %v12975_v24 = vpop.f32.mrb[4].mxu1 }
 0x16c   : > { %4018 = vmatprep.mubr.bf16.mxu0 %v14697_v58 }
 0x170   : > { %9229 = vmatmul.mubr.msk.bf16.gmra.mrb[148].mxu1 %vm1246_vm1, %v12018_v27  ;;  %v12060_v27 = vld [vmem:[%s12527_s17 + $0xa0] sm:$0xff]  }
 0x171   : > { %1810 = vmatprep.mubr.bf16.mxu1 %v14697_v58 }
 0x173   : > { %9629 = vmatmul.mubr.msk.bf16.gmra.mrb[140].mxu0 %vm1246_vm1, %v12003_v26  ;;  %v12978_v26 = vpop.f32.mrb[5].mxu1 }
 0x174   : > { %4028 = vmatprep.mubr.bf16.mxu0 %v14697_v58 }
 0x178   : > { %9230 = vmatmul.mubr.msk.bf16.gmra.mrb[152].mxu1 %vm1246_vm1, %v12020_v29 }
 0x179   : > { %1820 = vmatprep.mubr.bf16.mxu1 %v14697_v58 }
 0x17b   : > { %9630 = vmatmul.mubr.msk.bf16.gmra.mrb[144].mxu0 %vm1246_vm1, %v12005_v28  ;;  %v12984_v28 = vpop.f32.mrb[6].mxu1 }
 0x17c   : > { %4038 = vmatprep.mubr.bf16.mxu0 %v14697_v58  ;;  %v12987_v29 = vpop.f32.mrb[7].mxu1 }
 0x180   : > { %9231 = vmatmul.mubr.msk.bf16.gmra.mrb[156].mxu1 %vm1246_vm1, %v12022_v31  ;;  %v12075_v31 = vld [vmem:[%s12527_s17 + $0xa8] sm:$0xff]  }
 0x181   : > { %1830 = vmatprep.mubr.bf16.mxu1 %v14697_v58 }
 0x183   : > { %9631 = vmatmul.mubr.msk.bf16.gmra.mrb[148].mxu0 %vm1246_vm1, %v12007_v30  ;;  %v12989_v30 = vpop.f32.mrb[8].mxu1 }
 0x184   : > { %4048 = vmatprep.mubr.bf16.mxu0 %v14697_v58 }
 0x188   : > { %9232 = vmatmul.mubr.msk.bf16.gmra.mrb[160].mxu1 %vm1246_vm1, %v12024_v33  ;;  %v12062_v33 = vld [vmem:[%s12527_s17 + $0xa8] sm:$0xff]  }
 0x189   : > { %1840 = vmatprep.mubr.bf16.mxu1 %v14697_v58 }
 0x18b   : > { %9632 = vmatmul.mubr.msk.bf16.gmra.mrb[152].mxu0 %vm1246_vm1, %v12009_v32  ;;  %v12992_v32 = vpop.f32.mrb[9].mxu1 }
 0x18c   : > { %4058 = vmatprep.mubr.bf16.mxu0 %v14697_v58 }
 0x190   : > { %9233 = vmatmul.mubr.msk.bf16.gmra.mrb[164].mxu1 %vm1246_vm1, %v12026_v35 }
 0x191   : > { %1850 = vmatprep.mubr.bf16.mxu1 %v14697_v58 }
 0x193   : > { %9633 = vmatmul.mubr.msk.bf16.gmra.mrb[156].mxu0 %vm1246_vm1, %v12011_v34  ;;  %v12998_v34 = vpop.f32.mrb[10].mxu1 }
 0x194   : > { %4068 = vmatprep.mubr.bf16.mxu0 %v14697_v58  ;;  %v13001_v35 = vpop.f32.mrb[11].mxu1 }
 0x198   : > { %9234 = vmatmul.mubr.msk.bf16.gmra.mrb[168].mxu1 %vm1246_vm1, %v12028_v37  ;;  %v12064_v37 = vld [vmem:[%s12527_s17 + $0xb0] sm:$0xff]  }
 0x199   : > { %1860 = vmatprep.mubr.bf16.mxu1 %v14697_v58 }
 0x19b   : > { %9634 = vmatmul.mubr.msk.bf16.gmra.mrb[160].mxu0 %vm1246_vm1, %v12013_v36  ;;  %v12077_v36 = vld [vmem:[%s12527_s17 + $0xb0] sm:$0xff]  }
 0x19c   : > { %4078 = vmatprep.mubr.bf16.mxu0 %v14697_v58 }
 0x1a0   : > { %9235 = vmatmul.mubr.msk.bf16.gmra.mrb[172].mxu1 %vm1246_vm1, %v12033_v39  ;;  %v12066_v39 = vld [vmem:[%s12527_s17 + $0xb8] sm:$0xff]  }
 0x1a1   : > { %1870 = vmatprep.mubr.bf16.mxu1 %v14697_v58 }
 0x1a3   : > { %9635 = vmatmul.mubr.msk.bf16.gmra.mrb[164].mxu0 %vm1246_vm1, %v12015_v38  ;;  %v12079_v38 = vld [vmem:[%s12527_s17 + $0xb8] sm:$0xff]  }
 0x1a4   : > { %4088 = vmatprep.mubr.bf16.mxu0 %v14697_v58 }
 0x1a8   : > { %9236 = vmatmul.mubr.msk.bf16.gmra.mrb[176].mxu1 %vm1246_vm1, %v12035_v41  ;;  %v12068_v41 = vld [vmem:[%s12527_s17 + $0xc0] sm:$0xff]  }
 0x1a9   : > { %1880 = vmatprep.mubr.bf16.mxu1 %v14697_v58 }
 0x1ab   : > { %9636 = vmatmul.mubr.msk.bf16.gmra.mrb[168].mxu0 %vm1246_vm1, %v12017_v40  ;;  %v12084_v40 = vld [vmem:[%s12527_s17 + $0xc0] sm:$0xff]  }
 0x1ac   : > { %4098 = vmatprep.mubr.bf16.mxu0 %v14697_v58 }
 0x1b0   : > { %9237 = vmatmul.mubr.msk.bf16.gmra.mrb[180].mxu1 %vm1246_vm1, %v12037_v43  ;;  %v12070_v43 = vld [vmem:[%s12527_s17 + $0xc8] sm:$0xff]  }
 0x1b1   : > { %1890 = vmatprep.mubr.bf16.mxu1 %v14697_v58 }
 0x1b3   : > { %9637 = vmatmul.mubr.msk.bf16.gmra.mrb[172].mxu0 %vm1246_vm1, %v12019_v42  ;;  %v12086_v42 = vld [vmem:[%s12527_s17 + $0xc8] sm:$0xff]  }
 0x1b4   : > { %4108 = vmatprep.mubr.bf16.mxu0 %v14697_v58 }
 0x1b8   : > { %9238 = vmatmul.mubr.msk.bf16.gmra.mrb[184].mxu1 %vm1246_vm1, %v12039_v45  ;;  %v12072_v45 = vld [vmem:[%s12527_s17 + $0xd0] sm:$0xff]  }
 0x1b9   : > { %1900 = vmatprep.mubr.bf16.mxu1 %v14697_v58 }
 0x1bb   : > { %9638 = vmatmul.mubr.msk.bf16.gmra.mrb[176].mxu0 %vm1246_vm1, %v12021_v44  ;;  %v12088_v44 = vld [vmem:[%s12527_s17 + $0xd0] sm:$0xff]  }
 0x1bc   : > { %4118 = vmatprep.mubr.bf16.mxu0 %v14697_v58 }
 0x1c0   : > { %9239 = vmatmul.mubr.msk.bf16.gmra.mrb[188].mxu1 %vm1246_vm1, %v12041_v47  ;;  %v12074_v47 = vld [vmem:[%s12527_s17 + $0xd8] sm:$0xff]  }
 0x1c1   : > { %2483 = vmatprep.mubr.bf16.mxu1 %v14697_v58 }
 0x1c3   : > { %9639 = vmatmul.mubr.msk.bf16.gmra.mrb[180].mxu0 %vm1246_vm1, %v12023_v46  ;;  %v12090_v46 = vld [vmem:[%s12527_s17 + $0xd8] sm:$0xff]  }
 0x1c4   : > { %4128 = vmatprep.mubr.bf16.mxu0 %v14697_v58 }
 0x1c8   : > { %9396 = vmatmul.mubr.msk.bf16.vlgmr.msra.gmra.mrb[12].mxu1 %vm1246_vm1, %v12043_v49  ;;  %v12076_v49 = vld [vmem:[%s12527_s17 + $0xe0] sm:$0xff]  }
 0x1c9   : > { %2493 = vmatprep.mubr.bf16.mxu1 %v14697_v58 }
 0x1cb   : > { %9640 = vmatmul.mubr.msk.bf16.gmra.mrb[184].mxu0 %vm1246_vm1, %v12025_v48  ;;  %v12092_v48 = vld [vmem:[%s12527_s17 + $0xe0] sm:$0xff]  }
 0x1cc   : > { %4138 = vmatprep.mubr.bf16.mxu0 %v14697_v58 }
 0x1d0   : > { %9397 = vmatmul.mubr.msk.bf16.gmra.mrb[16].mxu1 %vm1246_vm1, %v12045_v51  ;;  %v12078_v51 = vld [vmem:[%s12527_s17 + $0xe8] sm:$0xff]  }
 0x1d1   : > { %2503 = vmatprep.mubr.bf16.mxu1 %v14697_v58 }
 0x1d3   : > { %9641 = vmatmul.mubr.msk.bf16.gmra.mrb[188].mxu0 %vm1246_vm1, %v12027_v50  ;;  %v12094_v50 = vld [vmem:[%s12527_s17 + $0xe8] sm:$0xff]  }
 0x1d4   : > { %4883 = vmatprep.mubr.bf16.mxu0 %v14697_v58 }
 0x1d8   : > { %9398 = vmatmul.mubr.msk.bf16.gmra.mrb[20].mxu1 %vm1246_vm1, %v12047_v54  ;;  %v12098_v54 = vld [vmem:[%s12527_s17 + $0xf8] sm:$0xff]  }
 0x1d9   : > { %2513 = vmatprep.mubr.bf16.mxu1 %v14697_v58 }
 0x1db   : > { %9795 = vmatmul.mubr.msk.bf16.vlgmr.msra.gmra.mrb[0].mxu0 %vm1246_vm1, %v12029_v52  ;;  %v12096_v52 = vld [vmem:[%s12527_s17 + $0xf0] sm:$0xff]  }
 0x1dc   : > { %6067 = vmatpush1.bf16.msra.mxu0 %v12030_v53  ;;  %4893 = vmatprep.mubr.bf16.mxu0 %v14697_v58  ;;  %v12080_v53 = vld [vmem:[%s12527_s17 + $0xf0] sm:$0xff]  }
 0x1dd   : > { %9995 = vmatprep.subr.msk.bf16.mxu0 %vm1391_vm0, %v12081_v7  ;;  %v12104_v7 = vld [vmem:[%s12527_s17 + $0x110] sm:$0xff]  }
 0x1e0   : > { %9399 = vmatmul.mubr.msk.bf16.gmra.mrb[24].mxu1 %vm1246_vm1, %v12049_v56  ;;  %6069 = vmatpush1.bf16.msra.mxu0 %v6061_v9 }
 0x1e1   : > { %2523 = vmatprep.mubr.bf16.mxu1 %v14697_v58 }
 0x1e3   : > { %9796 = vmatmul.mubr.msk.bf16.gmra.mrb[4].mxu0 %vm1246_vm1, %v12034_v55  ;;  %v12085_v55 = vld [vmem:[%s12527_s17 + $0xf8] sm:$0xff]  }
 0x1e4   : > { %4903 = vmatprep.mubr.bf16.mxu0 %v14697_v58 }
 0x1e8   : > { %9400 = vmatmul.mubr.msk.bf16.gmra.mrb[28].mxu1 %vm1246_vm1, %v12051_v59  ;;  %v12100_v59 = vld [vmem:[%s12527_s17 + $0x100] sm:$0xff]  }
 0x1e9   : > { %2533 = vmatprep.mubr.bf16.mxu1 %v14697_v58 }
 0x1eb   : > { %9797 = vmatmul.mubr.msk.bf16.gmra.mrb[8].mxu0 %vm1246_vm1, %v12036_v57 }
 0x1ec   : > { %4913 = vmatprep.mubr.bf16.mxu0 %v14697_v58 }
 0x1f0   : > { %9401 = vmatmul.mubr.msk.bf16.gmra.mrb[32].mxu1 %vm1246_vm1, %v12053_v61 }
 0x1f1   : > { %2543 = vmatprep.mubr.bf16.mxu1 %v14697_v58 }
 0x1f3   : > { %9798 = vmatmul.mubr.msk.bf16.gmra.mrb[12].mxu0 %vm1246_vm1, %v12038_v60  ;;  %v12087_v60 = vld [vmem:[%s12527_s17 + $0x100] sm:$0xff]  }
 0x1f4   : > { %4923 = vmatprep.mubr.bf16.mxu0 %v14697_v58 }
 0x1f8   : > { %9402 = vmatmul.mubr.msk.bf16.gmra.mrb[36].mxu1 %vm1246_vm1, %v12055_v63 }
 0x1f9   : > { %2553 = vmatprep.mubr.bf16.mxu1 %v14697_v58 }
 0x1fb   : > { %9799 = vmatmul.mubr.msk.bf16.gmra.mrb[16].mxu0 %vm1246_vm1, %v12040_v62 }
 0x1fc   : > { %4933 = vmatprep.mubr.bf16.mxu0 %v14697_v58 }
 0x200   : > { %9403 = vmatmul.mubr.msk.bf16.gmra.mrb[40].mxu1 %vm1246_vm1, %v12057_v1  ;;  %v12102_v1 = vld [vmem:[%s12527_s17 + $0x108] sm:$0xff]  }
 0x201   : > { %2563 = vmatprep.mubr.bf16.mxu1 %v14697_v58 }
 0x203   : > { %9800 = vmatmul.mubr.msk.bf16.gmra.mrb[20].mxu0 %vm1246_vm1, %v12042_v0 }
 0x204   : > { %4943 = vmatprep.mubr.bf16.mxu0 %v14697_v58 }
 0x208   : > { %9404 = vmatmul.mubr.msk.bf16.gmra.mrb[44].mxu1 %vm1246_vm1, %v12059_v3 }
 0x209   : > { %2573 = vmatprep.mubr.bf16.mxu1 %v14697_v58 }
 0x20b   : > { %9801 = vmatmul.mubr.msk.bf16.gmra.mrb[24].mxu0 %vm1246_vm1, %v12044_v2  ;;  %v12089_v2 = vld [vmem:[%s12527_s17 + $0x108] sm:$0xff]  }
 0x20c   : > { %4953 = vmatprep.mubr.bf16.mxu0 %v14697_v58 }
 0x210   : > { %9405 = vmatmul.mubr.msk.bf16.gmra.mrb[48].mxu1 %vm1246_vm1, %v12061_v5 }
 0x211   : > { %2583 = vmatprep.mubr.bf16.mxu1 %v14697_v58 }
 0x213   : > { %9802 = vmatmul.mubr.msk.bf16.gmra.mrb[28].mxu0 %vm1246_vm1, %v12046_v4 }
 0x214   : > { %4963 = vmatprep.mubr.bf16.mxu0 %v14697_v58 }
 0x218   : > { %9406 = vmatmul.mubr.msk.bf16.gmra.mrb[52].mxu1 %vm1246_vm1, %v12063_v10 }
 0x219   : > { %2593 = vmatprep.mubr.bf16.mxu1 %v14697_v58 }
 0x21b   : > { %9803 = vmatmul.mubr.msk.bf16.gmra.mrb[32].mxu0 %vm1246_vm1, %v12048_v6 }
 0x21c   : > { %4973 = vmatprep.mubr.bf16.mxu0 %v14697_v58 }
 0x220   : > { %9407 = vmatmul.mubr.msk.bf16.gmra.mrb[56].mxu1 %vm1246_vm1, %v12065_v12 }
 0x221   : > { %2603 = vmatprep.mubr.bf16.mxu1 %v14697_v58 }
 0x223   : > { %9804 = vmatmul.mubr.msk.bf16.gmra.mrb[36].mxu0 %vm1246_vm1, %v12050_v11 }
 0x224   : > { %4983 = vmatprep.mubr.bf16.mxu0 %v14697_v58 }
 0x228   : > { %9408 = vmatmul.mubr.msk.bf16.gmra.mrb[60].mxu1 %vm1246_vm1, %v12067_v14  ;;  %v12093_v14 = vld [vmem:[%s12527_s17 + $0x118] sm:$0xff]  }
 0x229   : > { %2613 = vmatprep.mubr.bf16.mxu1 %v14697_v58 }
 0x22b   : > { %9805 = vmatmul.mubr.msk.bf16.gmra.mrb[40].mxu0 %vm1246_vm1, %v12052_v13  ;;  %v12106_v13 = vld [vmem:[%s12527_s17 + $0x118] sm:$0xff]  }
 0x22c   : > { %4993 = vmatprep.mubr.bf16.mxu0 %v14697_v58 }
 0x230   : > { %9409 = vmatmul.mubr.msk.bf16.gmra.mrb[64].mxu1 %vm1246_vm1, %v12069_v16 }
 0x231   : > { %2623 = vmatprep.mubr.bf16.mxu1 %v14697_v58 }
 0x233   : > { %9806 = vmatmul.mubr.msk.bf16.gmra.mrb[44].mxu0 %vm1246_vm1, %v12054_v15 }
 0x234   : > { %5003 = vmatprep.mubr.bf16.mxu0 %v14697_v58 }
 0x238   : > { %9410 = vmatmul.mubr.msk.bf16.gmra.mrb[68].mxu1 %vm1246_vm1, %v12071_v20 }
 0x239   : > { %2633 = vmatprep.mubr.bf16.mxu1 %v14697_v58 }
 0x23b   : > { %9807 = vmatmul.mubr.msk.bf16.gmra.mrb[48].mxu0 %vm1246_vm1, %v12056_v17 }
 0x23c   : > { %5013 = vmatprep.mubr.bf16.mxu0 %v14697_v58 }
 0x240   : > { %9411 = vmatmul.mubr.msk.bf16.gmra.mrb[72].mxu1 %vm1246_vm1, %v12073_v25  ;;  %v12095_v25 = vld [vmem:[%s12527_s17 + $0x120] sm:$0xff]  }
 0x241   : > { %2643 = vmatprep.mubr.bf16.mxu1 %v14697_v58 }
 0x243   : > { %9808 = vmatmul.mubr.msk.bf16.gmra.mrb[52].mxu0 %vm1246_vm1, %v12058_v21  ;;  %v12108_v21 = vld [vmem:[%s12527_s17 + $0x120] sm:$0xff]  }
 0x244   : > { %5023 = vmatprep.mubr.bf16.mxu0 %v14697_v58 }
 0x248   : > { %9412 = vmatmul.mubr.msk.bf16.gmra.mrb[76].mxu1 %vm1246_vm1, %v12075_v31 }
 0x249   : > { %2653 = vmatprep.mubr.bf16.mxu1 %v14697_v58 }
 0x24b   : > { %9809 = vmatmul.mubr.msk.bf16.gmra.mrb[56].mxu0 %vm1246_vm1, %v12060_v27 }
 0x24c   : > { %5033 = vmatprep.mubr.bf16.mxu0 %v14697_v58 }
 0x250   : > { %9413 = vmatmul.mubr.msk.bf16.gmra.mrb[80].mxu1 %vm1246_vm1, %v12077_v36 }
 0x251   : > { %2663 = vmatprep.mubr.bf16.mxu1 %v14697_v58 }
 0x253   : > { %9810 = vmatmul.mubr.msk.bf16.gmra.mrb[60].mxu0 %vm1246_vm1, %v12062_v33 }
 0x254   : > { %5043 = vmatprep.mubr.bf16.mxu0 %v14697_v58 }
 0x258   : > { %9414 = vmatmul.mubr.msk.bf16.gmra.mrb[84].mxu1 %vm1246_vm1, %v12079_v38  ;;  %v12097_v38 = vld [vmem:[%s12527_s17 + $0x128] sm:$0xff]  }
 0x259   : > { %2673 = vmatprep.mubr.bf16.mxu1 %v14697_v58 }
 0x25b   : > { %9811 = vmatmul.mubr.msk.bf16.gmra.mrb[64].mxu0 %vm1246_vm1, %v12064_v37  ;;  %v12110_v37 = vld [vmem:[%s12527_s17 + $0x128] sm:$0xff]  }
 0x25c   : > { %5053 = vmatprep.mubr.bf16.mxu0 %v14697_v58 }
 0x260   : > { %9415 = vmatmul.mubr.msk.bf16.gmra.mrb[88].mxu1 %vm1246_vm1, %v12084_v40 }
 0x261   : > { %2683 = vmatprep.mubr.bf16.mxu1 %v14697_v58 }
 0x263   : > { %9812 = vmatmul.mubr.msk.bf16.gmra.mrb[68].mxu0 %vm1246_vm1, %v12066_v39 }
 0x264   : > { %5063 = vmatprep.mubr.bf16.mxu0 %v14697_v58 }
 0x268   : > { %9416 = vmatmul.mubr.msk.bf16.gmra.mrb[92].mxu1 %vm1246_vm1, %v12086_v42 }
 0x269   : > { %2693 = vmatprep.mubr.bf16.mxu1 %v14697_v58 }
 0x26b   : > { %9813 = vmatmul.mubr.msk.bf16.gmra.mrb[72].mxu0 %vm1246_vm1, %v12068_v41 }
 0x26c   : > { %5073 = vmatprep.mubr.bf16.mxu0 %v14697_v58 }
 0x270   : > { %9417 = vmatmul.mubr.msk.bf16.gmra.mrb[96].mxu1 %vm1246_vm1, %v12088_v44  ;;  %v12099_v44 = vld [vmem:[%s12527_s17 + $0x130] sm:$0xff]  }
 0x271   : > { %2703 = vmatprep.mubr.bf16.mxu1 %v14697_v58 }
 0x273   : > { %9814 = vmatmul.mubr.msk.bf16.gmra.mrb[76].mxu0 %vm1246_vm1, %v12070_v43  ;;  %v12112_v43 = vld [vmem:[%s12527_s17 + $0x130] sm:$0xff]  }
 0x274   : > { %5083 = vmatprep.mubr.bf16.mxu0 %v14697_v58 }
 0x278   : > { %9418 = vmatmul.mubr.msk.bf16.gmra.mrb[100].mxu1 %vm1246_vm1, %v12090_v46 }
 0x279   : > { %2713 = vmatprep.mubr.bf16.mxu1 %v14697_v58 }
 0x27b   : > { %9815 = vmatmul.mubr.msk.bf16.gmra.mrb[80].mxu0 %vm1246_vm1, %v12072_v45 }
 0x27c   : > { %5093 = vmatprep.mubr.bf16.mxu0 %v14697_v58 }
 0x280   : > { %9419 = vmatmul.mubr.msk.bf16.gmra.mrb[104].mxu1 %vm1246_vm1, %v12092_v48 }
 0x281   : > { %2723 = vmatprep.mubr.bf16.mxu1 %v14697_v58 }
 0x283   : > { %9816 = vmatmul.mubr.msk.bf16.gmra.mrb[84].mxu0 %vm1246_vm1, %v12074_v47 }
 0x284   : > { %5103 = vmatprep.mubr.bf16.mxu0 %v14697_v58 }
 0x288   : > { %9420 = vmatmul.mubr.msk.bf16.gmra.mrb[108].mxu1 %vm1246_vm1, %v12094_v50  ;;  %v12101_v50 = vld [vmem:[%s12527_s17 + $0x138] sm:$0xff]  }
 0x289   : > { %2733 = vmatprep.mubr.bf16.mxu1 %v14697_v58 }
 0x28b   : > { %9817 = vmatmul.mubr.msk.bf16.gmra.mrb[88].mxu0 %vm1246_vm1, %v12076_v49  ;;  %v12114_v49 = vld [vmem:[%s12527_s17 + $0x138] sm:$0xff]  }
 0x28c   : > { %5113 = vmatprep.mubr.bf16.mxu0 %v14697_v58 }
 0x290   : > { %9421 = vmatmul.mubr.msk.bf16.gmra.mrb[112].mxu1 %vm1246_vm1, %v12096_v52 }
 0x291   : > { %2743 = vmatprep.mubr.bf16.mxu1 %v14697_v58 }
 0x293   : > { %9818 = vmatmul.mubr.msk.bf16.gmra.mrb[92].mxu0 %vm1246_vm1, %v12078_v51 }
 0x294   : > { %5123 = vmatprep.mubr.bf16.mxu0 %v14697_v58 }
 0x298   : > { %9422 = vmatmul.mubr.msk.bf16.gmra.mrb[116].mxu1 %vm1246_vm1, %v12098_v54 }
 0x299   : > { %2753 = vmatprep.mubr.bf16.mxu1 %v14697_v58 }
 0x29b   : > { %9819 = vmatmul.mubr.msk.bf16.gmra.mrb[96].mxu0 %vm1246_vm1, %v12080_v53  ;;  %v13063_v56 = vpop.f32.mrb[12].mxu1 }
 0x29c   : > { %5133 = vmatprep.mubr.bf16.mxu0 %v14697_v58  ;;  %v13065_v57 = vpop.f32.mrb[13].mxu1 }
 0x29d   : > { %v13069_v61 = vpop.f32.mrb[14].mxu1 }
 0x29e   : > { %v13071_v62 = vpop.f32.mrb[15].mxu1 }
 0x2a0   : > { %9423 = vmatmul.mubr.msk.bf16.gmra.mrb[120].mxu1 %vm1246_vm1, %v12100_v59  ;;  %v12103_v59 = vld [vmem:[%s12527_s17 + $0x140] sm:$0xff]  }
 0x2a1   : > { %2763 = vmatprep.mubr.bf16.mxu1 %v14697_v58 }
 0x2a3   : > { %9820 = vmatmul.mubr.msk.bf16.gmra.mrb[100].mxu0 %vm1246_vm1, %v12085_v55  ;;  %v13077_v63 = vpop.f32.mrb[16].mxu1  ;;  %v12116_v55 = vld [vmem:[%s12527_s17 + $0x140] sm:$0xff]  }
 0x2a4   : > { %5143 = vmatprep.mubr.bf16.mxu0 %v14697_v58  ;;  %v13079_v0 = vpop.f32.mrb[17].mxu1 }
 0x2a5   : > { %v13083_v3 = vpop.f32.mrb[18].mxu1 }
 0x2a6   : > { %v13085_v4 = vpop.f32.mrb[19].mxu1 }
 0x2a8   : > { %9424 = vmatmul.mubr.msk.bf16.gmra.mrb[124].mxu1 %vm1246_vm1, %v12102_v1 }
 0x2a9   : > { %2773 = vmatprep.mubr.bf16.mxu1 %v14697_v58 }
 0x2ab   : > { %9821 = vmatmul.mubr.msk.bf16.gmra.mrb[104].mxu0 %vm1246_vm1, %v12087_v60  ;;  %v13091_v5 = vpop.f32.mrb[20].mxu1 }
 0x2ac   : > { %5153 = vmatprep.mubr.bf16.mxu0 %v14697_v58  ;;  %v13093_v6 = vpop.f32.mrb[21].mxu1 }
 0x2ad   : > { %v13097_v9 = vpop.f32.mrb[22].mxu1 }
 0x2ae   : > { %v13099_v10 = vpop.f32.mrb[23].mxu1 }
 0x2b0   : > { %9425 = vmatmul.mubr.msk.bf16.gmra.mrb[128].mxu1 %vm1246_vm1, %v12104_v7 }
 0x2b1   : > { %2783 = vmatprep.mubr.bf16.mxu1 %v14697_v58 }
 0x2b3   : > { %9822 = vmatmul.mubr.msk.bf16.gmra.mrb[108].mxu0 %vm1246_vm1, %v12089_v2  ;;  %v13105_v11 = vpop.f32.mrb[24].mxu1 }
 0x2b4   : > { %5163 = vmatprep.mubr.bf16.mxu0 %v14697_v58  ;;  %v13107_v12 = vpop.f32.mrb[25].mxu1 }
 0x2b5   : > { %v13111_v15 = vpop.f32.mrb[26].mxu1 }
 0x2b6   : > { %v13113_v16 = vpop.f32.mrb[27].mxu1 }
 0x2b8   : > { %9426 = vmatmul.mubr.msk.bf16.gmra.mrb[132].mxu1 %vm1246_vm1, %v12106_v13  ;;  %v12105_v13 = vld [vmem:[%s12527_s17 + $0x148] sm:$0xff]  }
 0x2b9   : > { %2793 = vmatprep.mubr.bf16.mxu1 %v14697_v58 }
 0x2bb   : > { %9823 = vmatmul.mubr.msk.bf16.gmra.mrb[112].mxu0 %vm1246_vm1, %v12091_v8  ;;  %v13119_v17 = vpop.f32.mrb[28].mxu1  ;;  %v12118_v8 = vld [vmem:[%s12527_s17 + $0x148] sm:$0xff]  }
 0x2bc   : > { %5173 = vmatprep.mubr.bf16.mxu0 %v14697_v58  ;;  %v13121_v20 = vpop.f32.mrb[29].mxu1 }
 0x2bd   : > { %v13125_v27 = vpop.f32.mrb[30].mxu1 }
 0x2be   : > { %v13127_v31 = vpop.f32.mrb[31].mxu1 }
 0x2c0   : > { %9427 = vmatmul.mubr.msk.bf16.gmra.mrb[136].mxu1 %vm1246_vm1, %v12108_v21 }
 0x2c1   : > { %2803 = vmatprep.mubr.bf16.mxu1 %v14697_v58 }
 0x2c3   : > { %9824 = vmatmul.mubr.msk.bf16.gmra.mrb[116].mxu0 %vm1246_vm1, %v12093_v14  ;;  %v13133_v33 = vpop.f32.mrb[32].mxu1 }
 0x2c4   : > { %5183 = vmatprep.mubr.bf16.mxu0 %v14697_v58  ;;  %v13135_v36 = vpop.f32.mrb[33].mxu1 }
 0x2c5   : > { %v13139_v39 = vpop.f32.mrb[34].mxu1 }
 0x2c6   : > { %v13141_v40 = vpop.f32.mrb[35].mxu1 }
 0x2c8   : > { %9428 = vmatmul.mubr.msk.bf16.gmra.mrb[140].mxu1 %vm1246_vm1, %v12110_v37 }
 0x2c9   : > { %2813 = vmatprep.mubr.bf16.mxu1 %v14697_v58 }
 0x2cb   : > { %9825 = vmatmul.mubr.msk.bf16.gmra.mrb[120].mxu0 %vm1246_vm1, %v12095_v25  ;;  %v13147_v41 = vpop.f32.mrb[36].mxu1 }
 0x2cc   : > { %5193 = vmatprep.mubr.bf16.mxu0 %v14697_v58  ;;  %v13149_v42 = vpop.f32.mrb[37].mxu1 }
 0x2cd   : > { %v13153_v45 = vpop.f32.mrb[38].mxu1 }
 0x2ce   : > { %v13155_v46 = vpop.f32.mrb[39].mxu1 }
 0x2d0   : > { %9429 = vmatmul.mubr.msk.bf16.gmra.mrb[144].mxu1 %vm1246_vm1, %v12112_v43  ;;  %v12107_v43 = vld [vmem:[%s12527_s17 + $0x150] sm:$0xff]  }
 0x2d1   : > { %2823 = vmatprep.mubr.bf16.mxu1 %v14697_v58 }
 0x2d3   : > { %9826 = vmatmul.mubr.msk.bf16.gmra.mrb[124].mxu0 %vm1246_vm1, %v12097_v38  ;;  %v13161_v47 = vpop.f32.mrb[40].mxu1  ;;  %v12120_v38 = vld [vmem:[%s12527_s17 + $0x150] sm:$0xff]  }
 0x2d4   : > { %5203 = vmatprep.mubr.bf16.mxu0 %v14697_v58  ;;  %v13163_v48 = vpop.f32.mrb[41].mxu1 }
 0x2d5   : > { %v13167_v51 = vpop.f32.mrb[42].mxu1 }
 0x2d6   : > { %v13169_v52 = vpop.f32.mrb[43].mxu1 }
 0x2d8   : > { %9430 = vmatmul.mubr.msk.bf16.gmra.mrb[148].mxu1 %vm1246_vm1, %v12114_v49 }
 0x2d9   : > { %2833 = vmatprep.mubr.bf16.mxu1 %v14697_v58 }
 0x2db   : > { %9827 = vmatmul.mubr.msk.bf16.gmra.mrb[128].mxu0 %vm1246_vm1, %v12099_v44  ;;  %v13175_v53 = vpop.f32.mrb[44].mxu1 }
 0x2dc   : > { %5213 = vmatprep.mubr.bf16.mxu0 %v14697_v58  ;;  %v13177_v54 = vpop.f32.mrb[45].mxu1 }
 0x2dd   : > { %v13181_v60 = vpop.f32.mrb[46].mxu1 }
 0x2de   : > { %v13183_v1 = vpop.f32.mrb[47].mxu1 }
 0x2e0   : > { %9431 = vmatmul.mubr.msk.bf16.gmra.mrb[152].mxu1 %vm1246_vm1, %v12116_v55 }
 0x2e1   : > { %2843 = vmatprep.mubr.bf16.mxu1 %v14697_v58 }
 0x2e3   : > { %9828 = vmatmul.mubr.msk.bf16.gmra.mrb[132].mxu0 %vm1246_vm1, %v12101_v50  ;;  %v13189_v2 = vpop.f32.mrb[48].mxu1 }
 0x2e4   : > { %5223 = vmatprep.mubr.bf16.mxu0 %v14697_v58  ;;  %14699 = vst [vmem:[#allocation3_spill] sm:$0xff] %v13189_v2  ;;  %v13191_v7 = vpop.f32.mrb[49].mxu1  ;;  %v14843_v2 = vmov 0  }
 0x2e5   : > { %14700 = vst [vmem:[#allocation4_spill] sm:$0xff] %v13191_v7  ;;  %v13195_v14 = vpop.f32.mrb[50].mxu1 }
 0x2e6   : > { %14701 = vst [vmem:[#allocation5_spill] sm:$0xff] %v13195_v14  ;;  %v13197_v21 = vpop.f32.mrb[51].mxu1 }
 0x2e7   : > { %14702 = vst [vmem:[#allocation6_spill] sm:$0xff] %v13197_v21 }
 0x2e8   : > { %9432 = vmatmul.mubr.msk.bf16.gmra.mrb[156].mxu1 %vm1246_vm1, %v12118_v8  ;;  %v12109_v8 = vld [vmem:[%s12527_s17 + $0x158] sm:$0xff]  }
 0x2e9   : > { %2853 = vmatprep.mubr.bf16.mxu1 %v14697_v58 }
 0x2eb   : > { %9829 = vmatmul.mubr.msk.bf16.gmra.mrb[136].mxu0 %vm1246_vm1, %v12103_v59  ;;  %v13203_v25 = vpop.f32.mrb[52].mxu1  ;;  %v12122_v59 = vld [vmem:[%s12527_s17 + $0x158] sm:$0xff]  }
 0x2ec   : > { %5233 = vmatprep.mubr.bf16.mxu0 %v14697_v58  ;;  %14703 = vst [vmem:[#allocation7_spill] sm:$0xff] %v13203_v25  ;;  %v13205_v37 = vpop.f32.mrb[53].mxu1 }
 0x2ed   : > { %14704 = vst [vmem:[#allocation8_spill] sm:$0xff] %v13205_v37  ;;  %v13209_v44 = vpop.f32.mrb[54].mxu1 }
 0x2ee   : > { %14705 = vst [vmem:[#allocation9_spill] sm:$0xff] %v13209_v44  ;;  %v13211_v49 = vpop.f32.mrb[55].mxu1 }
 0x2ef   : > { %14706 = vst [vmem:[#allocation10_spill] sm:$0xff] %v13211_v49 }
 0x2f0   : > { %9433 = vmatmul.mubr.msk.bf16.gmra.mrb[160].mxu1 %vm1246_vm1, %v12120_v38 }
 0x2f1   : > { %2863 = vmatprep.mubr.bf16.mxu1 %v14697_v58 }
 0x2f3   : > { %9830 = vmatmul.mubr.msk.bf16.gmra.mrb[140].mxu0 %vm1246_vm1, %v12105_v13  ;;  %v13217_v50 = vpop.f32.mrb[56].mxu1 }
 0x2f4   : > { %5243 = vmatprep.mubr.bf16.mxu0 %v14697_v58  ;;  %14707 = vst [vmem:[#allocation11_spill] sm:$0xff] %v13217_v50  ;;  %v13219_v55 = vpop.f32.mrb[57].mxu1  ;;  %v12111_v50 = vld [vmem:[%s12527_s17 + $0x160] sm:$0xff]  }
 0x2f5   : > { %14708 = vst [vmem:[#allocation12_spill] sm:$0xff] %v13219_v55  ;;  %v13223_v13 = vpop.f32.mrb[58].mxu1  ;;  %v12124_v55 = vld [vmem:[%s12527_s17 + $0x160] sm:$0xff]  }
 0x2f6   : > { %14709 = vst [vmem:[#allocation13_spill] sm:$0xff] %v13223_v13  ;;  %v13225_v44 = vpop.f32.mrb[59].mxu1 }
 0x2f7   : > { %14710 = vst [vmem:[#allocation14_spill] sm:$0xff] %v13225_v44 }
 0x2f8   : > { %9434 = vmatmul.mubr.msk.bf16.gmra.mrb[164].mxu1 %vm1246_vm1, %v12122_v59 }
 0x2f9   : > { %2873 = vmatprep.mubr.bf16.mxu1 %v14697_v58 }
 0x2fb   : > { %9831 = vmatmul.mubr.msk.bf16.gmra.mrb[144].mxu0 %vm1246_vm1, %v12107_v43  ;;  %v13231_v38 = vpop.f32.mrb[60].mxu1 }
 0x2fc   : > { %5253 = vmatprep.mubr.bf16.mxu0 %v14697_v58  ;;  %14711 = vst [vmem:[#allocation15_spill] sm:$0xff] %v13231_v38  ;;  %v13233_v43 = vpop.f32.mrb[61].mxu1  ;;  %v12113_v38 = vld [vmem:[%s12527_s17 + $0x168] sm:$0xff]  }
 0x2fd   : > { %14712 = vst [vmem:[#allocation16_spill] sm:$0xff] %v13233_v43  ;;  %v13237_v49 = vpop.f32.mrb[62].mxu1  ;;  %v12126_v43 = vld [vmem:[%s12527_s17 + $0x168] sm:$0xff]  }
 0x2fe   : > { %14713 = vst [vmem:[#allocation17_spill] sm:$0xff] %v13237_v49  ;;  %v13239_v13 = vpop.f32.mrb[63].mxu1 }
 0x2ff   : > { %14714 = vst [vmem:[#allocation18_spill] sm:$0xff] %v13239_v13 }
 0x300   : > { %9435 = vmatmul.mubr.msk.bf16.gmra.mrb[168].mxu1 %vm1246_vm1, %v12124_v55 }
 0x301   : > { %2883 = vmatprep.mubr.bf16.mxu1 %v14697_v58 }
 0x303   : > { %9832 = vmatmul.mubr.msk.bf16.gmra.mrb[148].mxu0 %vm1246_vm1, %v12109_v8  ;;  %v13245_v59 = vpop.f32.mrb[64].mxu1 }
 0x304   : > { %5263 = vmatprep.mubr.bf16.mxu0 %v14697_v58  ;;  %14715 = vst [vmem:[#allocation19_spill] sm:$0xff] %v13245_v59  ;;  %v13247_v8 = vpop.f32.mrb[65].mxu1  ;;  %v12117_v59 = vld [vmem:[%s12527_s17 + $0x178] sm:$0xff]  }
 0x305   : > { %14716 = vst [vmem:[#allocation20_spill] sm:$0xff] %v13247_v8  ;;  %v13251_v44 = vpop.f32.mrb[66].mxu1 }
 0x306   : > { %14717 = vst [vmem:[#allocation21_spill] sm:$0xff] %v13251_v44  ;;  %v13253_v49 = vpop.f32.mrb[67].mxu1 }
 0x307   : > { %14718 = vst [vmem:[#allocation22_spill] sm:$0xff] %v13253_v49  ;;  %v12128_v49 = vld [vmem:[%s12527_s17 + $0x170] sm:$0xff]  }
 0x308   : > { %9436 = vmatmul.mubr.msk.bf16.gmra.mrb[172].mxu1 %vm1246_vm1, %v12126_v43  ;;  %v12115_v43 = vld [vmem:[%s12527_s17 + $0x170] sm:$0xff]  }
 0x309   : > { %2893 = vmatprep.mubr.bf16.mxu1 %v14697_v58 }
 0x30b   : > { %9833 = vmatmul.mubr.msk.bf16.gmra.mrb[152].mxu0 %vm1246_vm1, %v12111_v50  ;;  %v12141_v50 = vld [vmem:[%s14688_s3] sm:$0xff]   ;;  %v13262_v55 = vpop.f32.mrb[68].mxu1 }
 0x30c   : > { %5273 = vmatprep.mubr.bf16.mxu0 %v14697_v58  ;;  %14719 = vst [vmem:[#allocation23_spill] sm:$0xff] %v13262_v55  ;;  %10399 = vmatprep.subr.bf16.mxu1 %v12141_v50  ;;  %v13264_v44 = vpop.f32.mrb[69].mxu1 }
 0x30d   : > { %14720 = vst [vmem:[#allocation24_spill] sm:$0xff] %v13264_v44  ;;  %10400 = vmatpush3.bf16.msra.mxu1 %v12141_v50  ;;  %v13268_v8 = vpop.f32.mrb[70].mxu1  ;;  %v12130_v50 = vld [vmem:[%s12527_s17 + $0x178] sm:$0xff]  }
 0x30e   : > { %14721 = vst [vmem:[#allocation25_spill] sm:$0xff] %v13268_v8 }
 0x310   : > { %9437 = vmatmul.mubr.msk.bf16.gmra.mrb[176].mxu1 %vm1246_vm1, %v12128_v49 }
 0x311   : > { %2903 = vmatprep.mubr.bf16.mxu1 %v14697_v58 }
 0x313   : > { %9834 = vmatmul.mubr.msk.bf16.gmra.mrb[156].mxu0 %vm1246_vm1, %v12113_v38  ;;  %v13270_v38 = vpop.f32.mrb[71].mxu1 }
 0x314   : > { %5283 = vmatprep.mubr.bf16.mxu0 %v14697_v58  ;;  %14722 = vst [vmem:[#allocation26_spill] sm:$0xff] %v13270_v38  ;;  %v13276_v55 = vpop.f32.mrb[72].mxu1 }
 0x315   : > { %14723 = vst [vmem:[#allocation27_spill] sm:$0xff] %v13276_v55  ;;  %v13278_v44 = vpop.f32.mrb[73].mxu1  ;;  %v12119_v55 = vld [vmem:[%s12527_s17 + $0x180] sm:$0xff]  }
 0x316   : > { %14724 = vst [vmem:[#allocation28_spill] sm:$0xff] %v13278_v44  ;;  %v13282_v13 = vpop.f32.mrb[74].mxu1  ;;  %v12132_v44 = vld [vmem:[%s12527_s17 + $0x180] sm:$0xff]  }
 0x317   : > { %14725 = vst [vmem:[#allocation29_spill] sm:$0xff] %v13282_v13  ;;  %v13284_v8 = vpop.f32.mrb[75].mxu1 }
 0x318   : > { %14726 = vst [vmem:[#allocation30_spill] sm:$0xff] %v13284_v8  ;;  %9438 = vmatmul.mubr.msk.bf16.gmra.mrb[180].mxu1 %vm1246_vm1, %v12130_v50 }
 0x319   : > { %2913 = vmatprep.mubr.bf16.mxu1 %v14697_v58 }
 0x31b   : > { %9835 = vmatmul.mubr.msk.bf16.gmra.mrb[160].mxu0 %vm1246_vm1, %v12115_v43  ;;  %v13290_v49 = vpop.f32.mrb[76].mxu1 }
 0x31c   : > { %5293 = vmatprep.mubr.bf16.mxu0 %v14697_v58  ;;  %14727 = vst [vmem:[#allocation31_spill] sm:$0xff] %v13290_v49  ;;  %v13292_v43 = vpop.f32.mrb[77].mxu1  ;;  %v12121_v49 = vld [vmem:[%s12527_s17 + $0x188] sm:$0xff]  }
 0x31d   : > { %14728 = vst [vmem:[#allocation32_spill] sm:$0xff] %v13292_v43  ;;  %v13296_v38 = vpop.f32.mrb[78].mxu1  ;;  %v12134_v43 = vld [vmem:[%s12527_s17 + $0x188] sm:$0xff]  }
 0x31e   : > { %14729 = vst [vmem:[#allocation33_spill] sm:$0xff] %v13296_v38  ;;  %v13298_v13 = vpop.f32.mrb[79].mxu1 }
 0x31f   : > { %14730 = vst [vmem:[#allocation34_spill] sm:$0xff] %v13298_v13 }
 0x320   : > { %9439 = vmatmul.mubr.msk.bf16.gmra.mrb[184].mxu1 %vm1246_vm1, %v12132_v44 }
 0x321   : > { %2923 = vmatprep.mubr.bf16.mxu1 %v14697_v58 }
 0x323   : > { %9836 = vmatmul.mubr.msk.bf16.gmra.mrb[164].mxu0 %vm1246_vm1, %v12117_v59  ;;  %v13304_v59 = vpop.f32.mrb[80].mxu1 }
 0x324   : > { %5303 = vmatprep.mubr.bf16.mxu0 %v14697_v58  ;;  %14731 = vst [vmem:[#allocation35_spill] sm:$0xff] %v13304_v59  ;;  %v13306_v50 = vpop.f32.mrb[81].mxu1  ;;  %v12123_v59 = vld [vmem:[%s12527_s17 + $0x190] sm:$0xff]  }
 0x325   : > { %14732 = vst [vmem:[#allocation36_spill] sm:$0xff] %v13306_v50  ;;  %v13310_v8 = vpop.f32.mrb[82].mxu1 }
 0x326   : > { %14733 = vst [vmem:[#allocation37_spill] sm:$0xff] %v13310_v8  ;;  %v13312_v38 = vpop.f32.mrb[83].mxu1 }
 0x327   : > { %14734 = vst [vmem:[#allocation38_spill] sm:$0xff] %v13312_v38 }
 0x328   : > { %9440 = vmatmul.mubr.msk.bf16.gmra.mrb[188].mxu1 %vm1246_vm1, %v12134_v43  ;;  %v12147_v43 = vld [vmem:[%s14688_s3 + $0x8] sm:$0xff]  }
 0x329   : > { %10401 = vmatprep.subr.bf16.mxu1 %v12147_v43 }
 0x32a   : > { %10402 = vmatpush3.bf16.msra.mxu1 %v12147_v43 }
 0x32b   : > { %9837 = vmatmul.mubr.msk.bf16.gmra.mrb[168].mxu0 %vm1246_vm1, %v12119_v55  ;;  %v13317_v44 = vpop.f32.mrb[84].mxu1 }
 0x32c   : > { %5313 = vmatprep.mubr.bf16.mxu0 %v14697_v58  ;;  %14735 = vst [vmem:[#allocation39_spill] sm:$0xff] %v13317_v44  ;;  %v13319_v55 = vpop.f32.mrb[85].mxu1 }
 0x32d   : > { %14736 = vst [vmem:[#allocation40_spill] sm:$0xff] %v13319_v55  ;;  %v13322_v13 = vpop.f32.mrb[86].mxu1  ;;  %v12125_v55 = vld [vmem:[%s12527_s17 + $0x198] sm:$0xff]  }
 0x32e   : > { %14737 = vst [vmem:[#allocation41_spill] sm:$0xff] %v13322_v13  ;;  %v13324_v50 = vpop.f32.mrb[87].mxu1 }
 0x32f   : > { %14738 = vst [vmem:[#allocation42_spill] sm:$0xff] %v13324_v50 }
 0x333   : > { %9838 = vmatmul.mubr.msk.bf16.gmra.mrb[172].mxu0 %vm1246_vm1, %v12121_v49  ;;  %v13331_v49 = vpop.f32.mrb[88].mxu1 }
 0x334   : > { %5323 = vmatprep.mubr.bf16.mxu0 %v14697_v58  ;;  %14739 = vst [vmem:[#allocation43_spill] sm:$0xff] %v13331_v49  ;;  %v13333_v44 = vpop.f32.mrb[89].mxu1  ;;  %v12127_v49 = vld [vmem:[%s12527_s17 + $0x1a0] sm:$0xff]  }
 0x335   : > { %14740 = vst [vmem:[#allocation44_spill] sm:$0xff] %v13333_v44  ;;  %v13336_v13 = vpop.f32.mrb[90].mxu1 }
 0x336   : > { %14741 = vst [vmem:[#allocation45_spill] sm:$0xff] %v13336_v13  ;;  %v13338_v38 = vpop.f32.mrb[91].mxu1 }
 0x337   : > { %14742 = vst [vmem:[#allocation46_spill] sm:$0xff] %v13338_v38  ;;  %v12129_v38 = vld [vmem:[%s12527_s17 + $0x1a8] sm:$0xff]  }
 0x33b   : > { %9839 = vmatmul.mubr.msk.bf16.gmra.mrb[176].mxu0 %vm1246_vm1, %v12123_v59  ;;  %v13342_v59 = vpop.f32.mrb[92].mxu1 }
 0x33c   : > { %5333 = vmatprep.mubr.bf16.mxu0 %v14697_v58  ;;  %14743 = vst [vmem:[#allocation47_spill] sm:$0xff] %v13342_v59  ;;  %v13344_v50 = vpop.f32.mrb[93].mxu1 }
 0x33d   : > { %14744 = vst [vmem:[#allocation48_spill] sm:$0xff] %v13344_v50  ;;  %v13347_v8 = vpop.f32.mrb[94].mxu1 }
 0x33e   : > { %14745 = vst [vmem:[#allocation49_spill] sm:$0xff] %v13347_v8  ;;  %v13349_v44 = vpop.f32.mrb[95].mxu1 }
 0x33f   : > { %14746 = vst [vmem:[#allocation50_spill] sm:$0xff] %v13349_v44  ;;  %v12131_v44 = vld [vmem:[%s12527_s17 + $0x40] sm:$0xff]  }
 0x343   : > { %9840 = vmatmul.mubr.msk.bf16.gmra.mrb[180].mxu0 %vm1246_vm1, %v12125_v55  ;;  %v13353_v43 = vpop.f32.mrb[96].mxu1 }
 0x344   : > { %5343 = vmatprep.mubr.bf16.mxu0 %v14697_v58  ;;  %14747 = vst [vmem:[#allocation51_spill] sm:$0xff] %v13353_v43  ;;  %v13355_v55 = vpop.f32.mrb[97].mxu1 }
 0x345   : > { %14748 = vst [vmem:[#allocation52_spill] sm:$0xff] %v13355_v55  ;;  %v13358_v13 = vpop.f32.mrb[98].mxu1 }
 0x346   : > { %14749 = vst [vmem:[#allocation53_spill] sm:$0xff] %v13358_v13  ;;  %v13360_v59 = vpop.f32.mrb[99].mxu1 }
 0x347   : > { %14750 = vst [vmem:[#allocation54_spill] sm:$0xff] %v13360_v59 }
 0x34b   : > { %9841 = vmatmul.mubr.msk.bf16.gmra.mrb[184].mxu0 %vm1246_vm1, %v12127_v49  ;;  %v13364_v8 = vpop.f32.mrb[100].mxu1 }
 0x34c   : > { %5353 = vmatprep.mubr.bf16.mxu0 %v14697_v58  ;;  %14751 = vst [vmem:[#allocation55_spill] sm:$0xff] %v13364_v8  ;;  %v13366_v49 = vpop.f32.mrb[101].mxu1 }
 0x34d   : > { %14752 = vst [vmem:[#allocation56_spill] sm:$0xff] %v13366_v49  ;;  %v13369_v50 = vpop.f32.mrb[102].mxu1 }
 0x34e   : > { %14753 = vst [vmem:[#allocation57_spill] sm:$0xff] %v13369_v50  ;;  %v13371_v43 = vpop.f32.mrb[103].mxu1 }
 0x34f   : > { %14754 = vst [vmem:[#allocation58_spill] sm:$0xff] %v13371_v43 }
 0x353   : > { %9842 = vmatmul.mubr.msk.bf16.gmra.mrb[188].mxu0 %vm1246_vm1, %v12129_v38  ;;  %v13375_v13 = vpop.f32.mrb[104].mxu1  ;;  %v12133_v38 = vld [vmem:[%s12527_s17 + $0x48] sm:$0xff]  }
 0x354   : > { %6098 = vmatprep.mubr.bf16.mxu0 %v14697_v58  ;;  %14755 = vst [vmem:[#allocation59_spill] sm:$0xff] %v13375_v13  ;;  %v13377_v59 = vpop.f32.mrb[105].mxu1 }
 0x355   : > { %14756 = vst [vmem:[#allocation60_spill] sm:$0xff] %v13377_v59  ;;  %v13380_v55 = vpop.f32.mrb[106].mxu1 }
 0x356   : > { %14757 = vst [vmem:[#allocation61_spill] sm:$0xff] %v13380_v55  ;;  %v13382_v8 = vpop.f32.mrb[107].mxu1 }
 0x357   : > { %14758 = vst [vmem:[#allocation62_spill] sm:$0xff] %v13382_v8  ;;  %v12154_v8 = vld [vmem:[%s14688_s3 + $0x10] sm:$0xff]  }
 0x358   : > { %10403 = vmatprep.subr.bf16.mxu1 %v12154_v8 }
 0x359   : > { %10404 = vmatpush3.bf16.msra.mxu1 %v12154_v8 }
 0x35b   : > { %9996 = vmatmul.mubr.msk.bf16.vlgmr.msra.gmra.mrb[0].mxu0 %vm1246_vm1, %v12131_v44  ;;  %v13386_v50 = vpop.f32.mrb[108].mxu1  ;;  %v12135_v44 = vld [vmem:[%s12527_s17 + $0x50] sm:$0xff]  }
 0x35c   : > { %6108 = vmatprep.mubr.bf16.mxu0 %v14697_v58  ;;  %14759 = vst [vmem:[#allocation63_spill] sm:$0xff] %v13386_v50  ;;  %v13388_v43 = vpop.f32.mrb[109].mxu1 }
 0x35d   : > { %14760 = vst [vmem:[#allocation64_spill] sm:$0xff] %v13388_v43  ;;  %v13391_v49 = vpop.f32.mrb[110].mxu1  ;;  %v12136_v43 = vld [vmem:[%s12527_s17 + $0x58] sm:$0xff]  }
 0x35e   : > { %14761 = vst [vmem:[#allocation65_spill] sm:$0xff] %v13391_v49  ;;  %v13393_v13 = vpop.f32.mrb[111].mxu1 }
 0x35f   : > { %14762 = vst [vmem:[#allocation66_spill] sm:$0xff] %v13393_v13 }
 0x363   : > { %9997 = vmatmul.mubr.msk.bf16.gmra.mrb[4].mxu0 %vm1246_vm1, %v12133_v38  ;;  %v13400_v38 = vpop.f32.mrb[112].mxu1 }
 0x364   : > { %6118 = vmatprep.mubr.bf16.mxu0 %v14697_v58  ;;  %14763 = vst [vmem:[#allocation67_spill] sm:$0xff] %v13400_v38  ;;  %v13402_v50 = vpop.f32.mrb[113].mxu1  ;;  %v12137_v38 = vld [vmem:[%s12527_s17 + $0x60] sm:$0xff]  }
 0x365   : > { %14764 = vst [vmem:[#allocation68_spill] sm:$0xff] %v13402_v50  ;;  %v13405_v49 = vpop.f32.mrb[114].mxu1 }
 0x366   : > { %14765 = vst [vmem:[#allocation69_spill] sm:$0xff] %v13405_v49  ;;  %v13407_v55 = vpop.f32.mrb[115].mxu1 }
 0x367   : > { %14766 = vst [vmem:[#allocation70_spill] sm:$0xff] %v13407_v55  ;;  %v12138_v55 = vld [vmem:[%s12527_s17 + $0x68] sm:$0xff]  }
 0x36b   : > { %9998 = vmatmul.mubr.msk.bf16.gmra.mrb[8].mxu0 %vm1246_vm1, %v12135_v44  ;;  %v13411_v44 = vpop.f32.mrb[116].mxu1 }
 0x36c   : > { %6128 = vmatprep.mubr.bf16.mxu0 %v14697_v58  ;;  %14767 = vst [vmem:[#allocation71_spill] sm:$0xff] %v13411_v44  ;;  %v13413_v13 = vpop.f32.mrb[117].mxu1 }
 0x36d   : > { %14768 = vst [vmem:[#allocation72_spill] sm:$0xff] %v13413_v13  ;;  %v13416_v59 = vpop.f32.mrb[118].mxu1 }
 0x36e   : > { %14769 = vst [vmem:[#allocation73_spill] sm:$0xff] %v13416_v59  ;;  %v13418_v50 = vpop.f32.mrb[119].mxu1 }
 0x36f   : > { %14770 = vst [vmem:[#allocation74_spill] sm:$0xff] %v13418_v50  ;;  %v12139_v50 = vld [vmem:[%s12527_s17 + $0x70] sm:$0xff]  }
 0x373   : > { %9999 = vmatmul.mubr.msk.bf16.gmra.mrb[12].mxu0 %vm1246_vm1, %v12136_v43  ;;  %v13422_v8 = vpop.f32.mrb[120].mxu1 }
 0x374   : > { %6138 = vmatprep.mubr.bf16.mxu0 %v14697_v58  ;;  %14771 = vst [vmem:[#allocation75_spill] sm:$0xff] %v13422_v8  ;;  %v13424_v43 = vpop.f32.mrb[121].mxu1 }
 0x375   : > { %14772 = vst [vmem:[#allocation76_spill] sm:$0xff] %v13424_v43  ;;  %v13427_v49 = vpop.f32.mrb[122].mxu1 }
 0x376   : > { %14773 = vst [vmem:[#allocation77_spill] sm:$0xff] %v13427_v49  ;;  %v13429_v44 = vpop.f32.mrb[123].mxu1 }
 0x377   : > { %14774 = vst [vmem:[#allocation78_spill] sm:$0xff] %v13429_v44 }
 0x37b   : > { %10000 = vmatmul.mubr.msk.bf16.gmra.mrb[16].mxu0 %vm1246_vm1, %v12137_v38  ;;  %v13433_v59 = vpop.f32.mrb[124].mxu1 }
 0x37c   : > { %6148 = vmatprep.mubr.bf16.mxu0 %v14697_v58  ;;  %14775 = vst [vmem:[#allocation79_spill] sm:$0xff] %v13433_v59  ;;  %v13435_v38 = vpop.f32.mrb[125].mxu1 }
 0x37d   : > { %14776 = vst [vmem:[#allocation80_spill] sm:$0xff] %v13435_v38  ;;  %v13438_v13 = vpop.f32.mrb[126].mxu1 }
 0x37e   : > { %14777 = vst [vmem:[#allocation81_spill] sm:$0xff] %v13438_v13  ;;  %v13440_v8 = vpop.f32.mrb[127].mxu1 }
 0x37f   : > { %14778 = vst [vmem:[#allocation82_spill] sm:$0xff] %v13440_v8 }
 0x383   : > { %10001 = vmatmul.mubr.msk.bf16.gmra.mrb[20].mxu0 %vm1246_vm1, %v12138_v55  ;;  %v13444_v49 = vpop.f32.mrb[128].mxu1  ;;  %v12140_v55 = vld [vmem:[%s12527_s17 + $0x78] sm:$0xff]  }
 0x384   : > { %6158 = vmatprep.mubr.bf16.mxu0 %v14697_v58  ;;  %14779 = vst [vmem:[#allocation83_spill] sm:$0xff] %v13444_v49  ;;  %v13446_v44 = vpop.f32.mrb[129].mxu1 }
 0x385   : > { %14780 = vst [vmem:[#allocation84_spill] sm:$0xff] %v13446_v44  ;;  %v13449_v43 = vpop.f32.mrb[130].mxu1 }
 0x386   : > { %14781 = vst [vmem:[#allocation85_spill] sm:$0xff] %v13449_v43  ;;  %v13451_v59 = vpop.f32.mrb[131].mxu1 }
 0x387   : > { %14782 = vst [vmem:[#allocation86_spill] sm:$0xff] %v13451_v59  ;;  %v12161_v59 = vld [vmem:[%s14688_s3 + $0x18] sm:$0xff]  }
 0x388   : > { %10405 = vmatprep.subr.bf16.mxu1 %v12161_v59 }
 0x389   : > { %10406 = vmatpush3.bf16.msra.mxu1 %v12161_v59 }
 0x38b   : > { %10002 = vmatmul.mubr.msk.bf16.gmra.mrb[24].mxu0 %vm1246_vm1, %v12139_v50  ;;  %v13455_v13 = vpop.f32.mrb[132].mxu1  ;;  %v12142_v50 = vld [vmem:[%s12527_s17 + $0x80] sm:$0xff]  }
 0x38c   : > { %6168 = vmatprep.mubr.bf16.mxu0 %v14697_v58  ;;  %14783 = vst [vmem:[#allocation87_spill] sm:$0xff] %v13455_v13  ;;  %v13457_v8 = vpop.f32.mrb[133].mxu1 }
 0x38d   : > { %14784 = vst [vmem:[#allocation88_spill] sm:$0xff] %v13457_v8  ;;  %v13460_v38 = vpop.f32.mrb[134].mxu1  ;;  %v12143_v8 = vld [vmem:[%s12527_s17 + $0x88] sm:$0xff]  }
 0x38e   : > { %14785 = vst [vmem:[#allocation89_spill] sm:$0xff] %v13460_v38  ;;  %v13462_v49 = vpop.f32.mrb[135].mxu1 }
 0x38f   : > { %14786 = vst [vmem:[#allocation90_spill] sm:$0xff] %v13462_v49 }
 0x393   : > { %10003 = vmatmul.mubr.msk.bf16.gmra.mrb[28].mxu0 %vm1246_vm1, %v12140_v55  ;;  %v13469_v55 = vpop.f32.mrb[136].mxu1 }
 0x394   : > { %6178 = vmatprep.mubr.bf16.mxu0 %v14697_v58  ;;  %14787 = vst [vmem:[#allocation91_spill] sm:$0xff] %v13469_v55  ;;  %v13471_v13 = vpop.f32.mrb[137].mxu1  ;;  %v12144_v55 = vld [vmem:[%s12527_s17 + $0x90] sm:$0xff]  }
 0x395   : > { %14788 = vst [vmem:[#allocation92_spill] sm:$0xff] %v13471_v13  ;;  %v13474_v38 = vpop.f32.mrb[138].mxu1 }
 0x396   : > { %14789 = vst [vmem:[#allocation93_spill] sm:$0xff] %v13474_v38  ;;  %v13476_v43 = vpop.f32.mrb[139].mxu1 }
 0x397   : > { %14790 = vst [vmem:[#allocation94_spill] sm:$0xff] %v13476_v43  ;;  %v12145_v43 = vld [vmem:[%s12527_s17 + $0x98] sm:$0xff]  }
 0x39b   : > { %10004 = vmatmul.mubr.msk.bf16.gmra.mrb[32].mxu0 %vm1246_vm1, %v12142_v50  ;;  %v13480_v50 = vpop.f32.mrb[140].mxu1 }
 0x39c   : > { %6188 = vmatprep.mubr.bf16.mxu0 %v14697_v58  ;;  %14791 = vst [vmem:[#allocation95_spill] sm:$0xff] %v13480_v50  ;;  %v13482_v49 = vpop.f32.mrb[141].mxu1 }
 0x39d   : > { %14792 = vst [vmem:[#allocation96_spill] sm:$0xff] %v13482_v49  ;;  %v13485_v44 = vpop.f32.mrb[142].mxu1 }
 0x39e   : > { %14793 = vst [vmem:[#allocation97_spill] sm:$0xff] %v13485_v44  ;;  %v13487_v13 = vpop.f32.mrb[143].mxu1 }
 0x39f   : > { %14794 = vst [vmem:[#allocation98_spill] sm:$0xff] %v13487_v13 }
 0x3a3   : > { %10005 = vmatmul.mubr.msk.bf16.gmra.mrb[36].mxu0 %vm1246_vm1, %v12143_v8  ;;  %v13491_v59 = vpop.f32.mrb[144].mxu1 }
 0x3a4   : > { %6198 = vmatprep.mubr.bf16.mxu0 %v14697_v58  ;;  %14795 = vst [vmem:[#allocation99_spill] sm:$0xff] %v13491_v59  ;;  %v13493_v8 = vpop.f32.mrb[145].mxu1 }
 0x3a5   : > { %14796 = vst [vmem:[#allocation100_spill] sm:$0xff] %v13493_v8  ;;  %v13496_v38 = vpop.f32.mrb[146].mxu1 }
 0x3a6   : > { %14797 = vst [vmem:[#allocation101_spill] sm:$0xff] %v13496_v38  ;;  %v13498_v50 = vpop.f32.mrb[147].mxu1 }
 0x3a7   : > { %14798 = vst [vmem:[#allocation102_spill] sm:$0xff] %v13498_v50 }
 0x3ab   : > { %10006 = vmatmul.mubr.msk.bf16.gmra.mrb[40].mxu0 %vm1246_vm1, %v12144_v55  ;;  %v13502_v44 = vpop.f32.mrb[148].mxu1  ;;  %v12146_v55 = vld [vmem:[%s12527_s17 + $0xa0] sm:$0xff]  }
 0x3ac   : > { %6208 = vmatprep.mubr.bf16.mxu0 %v14697_v58  ;;  %14799 = vst [vmem:[#allocation103_spill] sm:$0xff] %v13502_v44  ;;  %v13504_v13 = vpop.f32.mrb[149].mxu1 }
 0x3ad   : > { %14800 = vst [vmem:[#allocation104_spill] sm:$0xff] %v13504_v13  ;;  %v13507_v49 = vpop.f32.mrb[150].mxu1 }
 0x3ae   : > { %14801 = vst [vmem:[#allocation105_spill] sm:$0xff] %v13507_v49  ;;  %v13509_v59 = vpop.f32.mrb[151].mxu1  ;;  %v12167_v49 = vld [vmem:[%s14688_s3 + $0x20] sm:$0xff]  }
 0x3af   : > { %14802 = vst [vmem:[#allocation106_spill] sm:$0xff] %v13509_v59  ;;  %10407 = vmatprep.subr.bf16.mxu1 %v12167_v49 }
 0x3b0   : > { %10408 = vmatpush3.bf16.msra.mxu1 %v12167_v49 }
 0x3b3   : > { %10007 = vmatmul.mubr.msk.bf16.gmra.mrb[44].mxu0 %vm1246_vm1, %v12145_v43  ;;  %v13513_v38 = vpop.f32.mrb[152].mxu1  ;;  %v12148_v43 = vld [vmem:[%s12527_s17 + $0xa8] sm:$0xff]  }
 0x3b4   : > { %6218 = vmatprep.mubr.bf16.mxu0 %v14697_v58  ;;  %14803 = vst [vmem:[#allocation107_spill] sm:$0xff] %v13513_v38  ;;  %v13515_v50 = vpop.f32.mrb[153].mxu1 }
 0x3b5   : > { %14804 = vst [vmem:[#allocation108_spill] sm:$0xff] %v13515_v50  ;;  %v13518_v8 = vpop.f32.mrb[154].mxu1 }
 0x3b6   : > { %14805 = vst [vmem:[#allocation109_spill] sm:$0xff] %v13518_v8  ;;  %v13520_v44 = vpop.f32.mrb[155].mxu1  ;;  %v12168_v8 = vld [vmem:[%s14688_s3 + $0x28] sm:$0xff]  }
 0x3b7   : > { %14806 = vst [vmem:[#allocation110_spill] sm:$0xff] %v13520_v44  ;;  %v12149_v44 = vld [vmem:[%s12527_s17 + $0xb0] sm:$0xff]   ;;  %10409 = vmatprep.subr.bf16.mxu1 %v12168_v8 }
 0x3b8   : > { %10410 = vmatpush3.bf16.msra.mxu1 %v12168_v8  ;;  %v12150_v8 = vld [vmem:[%s12527_s17 + $0xb8] sm:$0xff]  }
 0x3bb   : > { %10008 = vmatmul.mubr.msk.bf16.gmra.mrb[48].mxu0 %vm1246_vm1, %v12146_v55  ;;  %v13527_v55 = vpop.f32.mrb[156].mxu1 }
 0x3bc   : > { %6228 = vmatprep.mubr.bf16.mxu0 %v14697_v58  ;;  %14807 = vst [vmem:[#allocation111_spill] sm:$0xff] %v13527_v55  ;;  %v13529_v38 = vpop.f32.mrb[157].mxu1 }
 0x3bd   : > { %14808 = vst [vmem:[#allocation112_spill] sm:$0xff] %v13529_v38  ;;  %v13535_v50 = vpop.f32.mrb[158].mxu1 }
 0x3be   : > { %14809 = vst [vmem:[#allocation113_spill] sm:$0xff] %v13535_v50  ;;  %v13537_v59 = vpop.f32.mrb[159].mxu1 }
 0x3bf   : > { %14810 = vst [vmem:[#allocation114_spill] sm:$0xff] %v13537_v59  ;;  %v12171_v59 = vld [vmem:[%s14688_s3 + $0x38] sm:$0xff]  }
 0x3c3   : > { %10009 = vmatmul.mubr.msk.bf16.gmra.mrb[52].mxu0 %vm1246_vm1, %v12148_v43  ;;  %v12170_v43 = vld [vmem:[%s14688_s3 + $0x30] sm:$0xff]   ;;  %v13544_v49 = vpop.f32.mrb[160].mxu1 }
 0x3c4   : > { %6238 = vmatprep.mubr.bf16.mxu0 %v14697_v58  ;;  %10411 = vmatprep.subr.bf16.mxu1 %v12170_v43  ;;  %14811 = vst [vmem:[#allocation115_spill] sm:$0xff] %v13544_v49  ;;  %v13546_v38 = vpop.f32.mrb[161].mxu1 }
 0x3c5   : > { %10412 = vmatpush3.bf16.msra.mxu1 %v12170_v43  ;;  %14812 = vst [vmem:[#allocation116_spill] sm:$0xff] %v13546_v38  ;;  %v13552_v50 = vpop.f32.mrb[162].mxu1  ;;  %v12151_v38 = vld [vmem:[%s12527_s17 + $0xc0] sm:$0xff]  }
 0x3c6   : > { %14813 = vst [vmem:[#allocation117_spill] sm:$0xff] %v13552_v50  ;;  %v13554_v55 = vpop.f32.mrb[163].mxu1  ;;  %10413 = vmatprep.subr.bf16.mxu1 %v12171_v59 }
 0x3c7   : > { %14814 = vst [vmem:[#allocation118_spill] sm:$0xff] %v13554_v55 }
 0x3c9   : > { %10414 = vmatpush3.bf16.msra.mxu1 %v12171_v59 }
 0x3cb   : > { %10010 = vmatmul.mubr.msk.bf16.gmra.mrb[56].mxu0 %vm1246_vm1, %v12149_v44  ;;  %v13558_v44 = vpop.f32.mrb[164].mxu1 }
 0x3cc   : > { %6248 = vmatprep.mubr.bf16.mxu0 %v14697_v58  ;;  %14815 = vst [vmem:[#allocation119_spill] sm:$0xff] %v13558_v44  ;;  %v13560_v43 = vpop.f32.mrb[165].mxu1 }
 0x3cd   : > { %14816 = vst [vmem:[#allocation120_spill] sm:$0xff] %v13560_v43  ;;  %v13563_v49 = vpop.f32.mrb[166].mxu1 }
 0x3ce   : > { %14817 = vst [vmem:[#allocation121_spill] sm:$0xff] %v13563_v49  ;;  %v13565_v13 = vpop.f32.mrb[167].mxu1 }
 0x3cf   : > { %14818 = vst [vmem:[#allocation122_spill] sm:$0xff] %v13565_v13  ;;  %v12153_v13 = vld [vmem:[%s12527_s17 + $0xd0] sm:$0xff]  }
 0x3d3   : > { %10011 = vmatmul.mubr.msk.bf16.gmra.mrb[60].mxu0 %vm1246_vm1, %v12150_v8  ;;  %v13569_v55 = vpop.f32.mrb[168].mxu1  ;;  %v12152_v8 = vld [vmem:[%s12527_s17 + $0xc8] sm:$0xff]  }
 0x3d4   : > { %6258 = vmatprep.mubr.bf16.mxu0 %v14697_v58  ;;  %14819 = vst [vmem:[#allocation123_spill] sm:$0xff] %v13569_v55  ;;  %v13571_v59 = vpop.f32.mrb[169].mxu1 }
 0x3d5   : > { %14820 = vst [vmem:[#allocation124_spill] sm:$0xff] %v13571_v59  ;;  %v13574_v50 = vpop.f32.mrb[170].mxu1 }
 0x3d6   : > { %14821 = vst [vmem:[#allocation125_spill] sm:$0xff] %v13574_v50  ;;  %v13576_v44 = vpop.f32.mrb[171].mxu1 }
 0x3d7   : > { %14822 = vst [vmem:[#allocation126_spill] sm:$0xff] %v13576_v44  ;;  %v12155_v44 = vld [vmem:[%s12527_s17 + $0xd8] sm:$0xff]  }
 0x3db   : > { %10012 = vmatmul.mubr.msk.bf16.gmra.mrb[64].mxu0 %vm1246_vm1, %v12151_v38  ;;  %v13580_v49 = vpop.f32.mrb[172].mxu1 }
 0x3dc   : > { %6268 = vmatprep.mubr.bf16.mxu0 %v14697_v58  ;;  %14823 = vst [vmem:[#allocation127_spill] sm:$0xff] %v13580_v49  ;;  %v13582_v38 = vpop.f32.mrb[173].mxu1 }
 0x3dd   : > { %14824 = vst [vmem:[#allocation128_spill] sm:$0xff] %v13582_v38  ;;  %v13585_v43 = vpop.f32.mrb[174].mxu1 }
 0x3de   : > { %14825 = vst [vmem:[#allocation129_spill] sm:$0xff] %v13585_v43  ;;  %v13587_v55 = vpop.f32.mrb[175].mxu1 }
 0x3df   : > { %14826 = vst [vmem:[#allocation130_spill] sm:$0xff] %v13587_v55  ;;  %v12156_v55 = vld [vmem:[%s12527_s17 + $0xe0] sm:$0xff]  }
 0x3e3   : > { %10013 = vmatmul.mubr.msk.bf16.gmra.mrb[68].mxu0 %vm1246_vm1, %v12152_v8  ;;  %v13591_v50 = vpop.f32.mrb[176].mxu1 }
 0x3e4   : > { %6278 = vmatprep.mubr.bf16.mxu0 %v14697_v58  ;;  %14827 = vst [vmem:[#allocation131_spill] sm:$0xff] %v13591_v50  ;;  %v13593_v8 = vpop.f32.mrb[177].mxu1 }
 0x3e5   : > { %14828 = vst [vmem:[#allocation132_spill] sm:$0xff] %v13593_v8  ;;  %v13596_v59 = vpop.f32.mrb[178].mxu1 }
 0x3e6   : > { %14829 = vst [vmem:[#allocation133_spill] sm:$0xff] %v13596_v59  ;;  %v13598_v49 = vpop.f32.mrb[179].mxu1  ;;  %v12157_v59 = vld [vmem:[%s12527_s17 + $0xe8] sm:$0xff]  }
 0x3e7   : > { %14830 = vst [vmem:[#allocation134_spill] sm:$0xff] %v13598_v49 }
 0x3eb   : > { %10014 = vmatmul.mubr.msk.bf16.gmra.mrb[72].mxu0 %vm1246_vm1, %v12153_v13  ;;  %v13602_v43 = vpop.f32.mrb[180].mxu1 }
 0x3ec   : > { %6288 = vmatprep.mubr.bf16.mxu0 %v14697_v58  ;;  %14831 = vst [vmem:[#allocation135_spill] sm:$0xff] %v13602_v43  ;;  %v13604_v13 = vpop.f32.mrb[181].mxu1 }
 0x3ed   : > { %14832 = vst [vmem:[#allocation136_spill] sm:$0xff] %v13604_v13  ;;  %v13607_v38 = vpop.f32.mrb[182].mxu1 }
 0x3ee   : > { %14833 = vst [vmem:[#allocation137_spill] sm:$0xff] %v13607_v38  ;;  %v13609_v50 = vpop.f32.mrb[183].mxu1  ;;  %v12158_v38 = vld [vmem:[%s12527_s17 + $0xf0] sm:$0xff]  }
 0x3ef   : > { %14834 = vst [vmem:[#allocation138_spill] sm:$0xff] %v13609_v50 }
 0x3f3   : > { %10015 = vmatmul.mubr.msk.bf16.gmra.mrb[76].mxu0 %vm1246_vm1, %v12155_v44  ;;  %v13613_v49 = vpop.f32.mrb[184].mxu1 }
 0x3f4   : > { %6298 = vmatprep.mubr.bf16.mxu0 %v14697_v58  ;;  %14835 = vst [vmem:[#allocation139_spill] sm:$0xff] %v13613_v49  ;;  %v13615_v44 = vpop.f32.mrb[185].mxu1 }
 0x3f5   : > { %14836 = vst [vmem:[#allocation140_spill] sm:$0xff] %v13615_v44  ;;  %v13618_v43 = vpop.f32.mrb[186].mxu1 }
 0x3f6   : > { %14837 = vst [vmem:[#allocation141_spill] sm:$0xff] %v13618_v43  ;;  %v13620_v8 = vpop.f32.mrb[187].mxu1  ;;  %v12163_v43 = vld [vmem:[%s12527_s17 + $0x110] sm:$0xff]  }
 0x3f7   : > { %14838 = vst [vmem:[#allocation142_spill] sm:$0xff] %v13620_v8  ;;  %v12159_v8 = vld [vmem:[%s12527_s17 + $0xf8] sm:$0xff]  }
 0x3fb   : > { %10016 = vmatmul.mubr.msk.bf16.gmra.mrb[80].mxu0 %vm1246_vm1, %v12156_v55  ;;  %v13624_v50 = vpop.f32.mrb[188].mxu1 }
 0x3fc   : > { %6308 = vmatprep.mubr.bf16.mxu0 %v14697_v58  ;;  %14839 = vst [vmem:[#allocation143_spill] sm:$0xff] %v13624_v50  ;;  %v13626_v55 = vpop.f32.mrb[189].mxu1  ;;  %v12162_v50 = vld [vmem:[%s12527_s17 + $0x108] sm:$0xff]  }
 0x3fd   : > { %14840 = vst [vmem:[#allocation144_spill] sm:$0xff] %v13626_v55  ;;  %v13629_v13 = vpop.f32.mrb[190].mxu1  ;;  %v978_v55 = vlaneseq }
 0x3fe   : > { %14841 = vst [vmem:[#allocation145_spill] sm:$0xff] %v13629_v13  ;;  %v13631_v49 = vpop.f32.mrb[191].mxu1 }
 0x3ff   : > { %14842 = vst [vmem:[#allocation146_spill] sm:$0xff] %v13631_v49  ;;  %v979_v13 = vshrl.u32 %v978_v55, 7 }
 0x401   : > { %v984_v49 = vsub.s32 1, %v979_v13 }
 0x403   : > { %10017 = vmatmul.mubr.msk.bf16.gmra.mrb[84].mxu0 %vm1246_vm1, %v12157_v59  ;;  %v12160_v59 = vld [vmem:[%s12527_s17 + $0x100] sm:$0xff]  }
 0x404   : > { %6318 = vmatprep.mubr.bf16.mxu0 %v14697_v58 }
 0x40b   : > { %10018 = vmatmul.mubr.msk.bf16.gmra.mrb[88].mxu0 %vm1246_vm1, %v12158_v38  ;;  %v980_v38 = vsub.s32 0, %v979_v13 }
 0x40c   : > { %6328 = vmatprep.mubr.bf16.mxu0 %v14697_v58 }
 0x413   : > { %10019 = vmatmul.mubr.msk.bf16.gmra.mrb[92].mxu0 %vm1246_vm1, %v12159_v8  ;;  %v976_v8 = vld [vmem:[%s14687_s2] sm:$0x3] }
 0x414   : > { %6338 = vmatprep.mubr.bf16.mxu0 %v14697_v58  ;;  %v13648_v44 = vrot.slane %v976_v8, %v980_v38  ;;  %v12164_v38 = vld [vmem:[%s12527_s17 + $0x118] sm:$0xff]  }
 0x416   : > { %v1437_v25 = vadd.f32 %v12970_v22, %v13648_v44  ;;  %v1443_v22 = vadd.f32 %v12975_v24, %v13648_v44 }
 0x41b   : > { %10020 = vmatmul.mubr.msk.bf16.gmra.mrb[96].mxu0 %vm1246_vm1, %v12160_v59  ;;  %v13650_v59 = vrot.slane %v976_v8, %v984_v49 }
 0x41c   : > { %6348 = vmatprep.mubr.bf16.mxu0 %v14697_v58 }
 0x41d   : > { %v1435_v55 = vadd.f32 %v12963_v19, %v13650_v59  ;;  %v1439_v49 = vadd.f32 %v12973_v23, %v13650_v59  ;;  %v1447_v23 = vadd.f32 %v12984_v28, %v13648_v44  ;;  %v1453_v28 = vadd.f32 %v12989_v30, %v13648_v44 }
 0x423   : > { %10021 = vmatmul.mubr.msk.bf16.gmra.mrb[100].mxu0 %vm1246_vm1, %v12162_v50  ;;  %v1433_v50 = vadd.f32 %v12960_v18, %v13648_v44 }
 0x424   : > { %6358 = vmatprep.mubr.bf16.mxu0 %v14697_v58 }
 0x42b   : > { %10022 = vmatmul.mubr.msk.bf16.gmra.mrb[104].mxu0 %vm1246_vm1, %v12163_v43 }
 0x42c   : > { %6368 = vmatprep.mubr.bf16.mxu0 %v14697_v58 }
 0x42e   : > { %v6100_v37 = vpop.f32.mrb[0].mxu0 }
 0x42f   : > { %v10684_v13 = vadd.f32 %v6100_v37, %v1433_v50  ;;  %v6102_v21 = vpop.f32.mrb[1].mxu0  ;;  %v1445_v37 = vadd.f32 %v12978_v26, %v13650_v59 }
 0x430   : > { %v10686_v43 = vadd.f32 %v6102_v21, %v1435_v55  ;;  %v6104_v8 = vpop.f32.mrb[2].mxu0  ;;  %v12165_v55 = vld [vmem:[%s12527_s17 + $0x120] sm:$0xff]  }
 0x431   : > { %v10688_v58 = vadd.f32 %v6104_v8, %v1437_v25  ;;  %v6106_v14 = vpop.f32.mrb[3].mxu0  ;;  %v1455_v8 = vadd.f32 %v12992_v32, %v13650_v59 }
 0x432   : > { %v6771_v7 = vmax.f32 %v10684_v13, %v10686_v43  ;;  %v10690_v18 = vadd.f32 %v6106_v14, %v1439_v49  ;;  %v1449_v14 = vadd.f32 %v12987_v29, %v13650_v59  ;;  %v1457_v29 = vadd.f32 %v12998_v34, %v13648_v44 }
 0x433   : > { %10023 = vmatmul.mubr.msk.bf16.gmra.mrb[108].mxu0 %vm1246_vm1, %v12164_v38  ;;  %v10707_v34 = vadd.f32 %v13063_v56, %v13648_v44 }
 0x434   : > { %v6772_v19 = vmax.f32 %v10688_v58, %v10690_v18  ;;  %6378 = vmatprep.mubr.bf16.mxu0 %v14843_v2  ;;  %v6867_v32 = vmax.f32 %v6771_v7, 0.0  ;;  %v12169_v7 = vld [vmem:[%s12527_s17 + $0x130] sm:$0xff]  }
 0x436   : > { %v6110_v50 = vpop.f32.mrb[4].mxu0 }
 0x437   : > { %v10692_v21 = vadd.f32 %v6110_v50, %v1443_v22  ;;  %v6112_v25 = vpop.f32.mrb[5].mxu0  ;;  %v12166_v50 = vld [vmem:[%s12527_s17 + $0x128] sm:$0xff]  }
 0x438   : > { %v10694_v58 = vadd.f32 %v6112_v25, %v1445_v37  ;;  %v6114_v13 = vpop.f32.mrb[6].mxu0 }
 0x439   : > { %v10696_v38 = vadd.f32 %v6114_v13, %v1447_v23  ;;  %v6116_v49 = vpop.f32.mrb[7].mxu0  ;;  %v1459_v23 = vadd.f32 %v13001_v35, %v13650_v59  ;;  %v10709_v35 = vadd.f32 %v13065_v57, %v13650_v59 }
 0x43a   : > { %v6773_v43 = vmax.f32 %v10692_v21, %v10694_v58  ;;  %v10698_v24 = vadd.f32 %v6116_v49, %v1449_v14  ;;  %v6868_v49 = vmax.f32 %v6772_v19, 0.0 }
 0x43b   : > { %10024 = vmatmul.mubr.msk.bf16.gmra.mrb[112].mxu0 %vm1246_vm1, %v12165_v55 }
 0x43c   : > { %v6774_v26 = vmax.f32 %v10696_v38, %v10698_v24  ;;  %6388 = vmatprep.mubr.bf16.mxu0 %v14843_v2 }
 0x43e   : > { %v6120_v18 = vpop.f32.mrb[8].mxu0 }
 0x43f   : > { %v10700_v22 = vadd.f32 %v6120_v18, %v1453_v28  ;;  %v6122_v37 = vpop.f32.mrb[9].mxu0  ;;  %v10711_v18 = vadd.f32 %v13069_v61, %v13648_v44 }
 0x440   : > { %v10702_v21 = vadd.f32 %v6122_v37, %v1455_v8  ;;  %v6124_v25 = vpop.f32.mrb[10].mxu0  ;;  %v10713_v37 = vadd.f32 %v13071_v62, %v13650_v59  ;;  %v10715_v62 = vadd.f32 %v13077_v63, %v13648_v44 }
 0x441   : > { %v10704_v55 = vadd.f32 %v6124_v25, %v1457_v29  ;;  %v6126_v14 = vpop.f32.mrb[11].mxu0 }
 0x442   : > { %v6775_v58 = vmax.f32 %v10700_v22, %v10702_v21  ;;  %v10706_v30 = vadd.f32 %v6126_v14, %v1459_v23  ;;  %v6869_v14 = vmax.f32 %v6773_v43, 0.0 }
 0x443   : > { %10025 = vmatmul.mubr.msk.bf16.gmra.mrb[116].mxu0 %vm1246_vm1, %v12166_v50 }
 0x444   : > { %v6871_v13 = vmax.f32 %v6775_v58, 0.0  ;;  %v6776_v38 = vmax.f32 %v10704_v55, %v10706_v30  ;;  %6398 = vmatprep.mubr.bf16.mxu0 %v14843_v2  ;;  %v10717_v30 = vadd.f32 %v13079_v0, %v13650_v59 }
 0x446   : > { %v6963_v24 = vmax.f32 %v6867_v32, %v6871_v13  ;;  %v6872_v28 = vmax.f32 %v6776_v38, 0.0  ;;  %v6130_v8 = vpop.f32.mrb[12].mxu0  ;;  %v6870_v32 = vmax.f32 %v6774_v26, 0.0 }
 0x447   : > { %v10708_v29 = vadd.f32 %v10707_v34, %v6130_v8  ;;  %v6132_v22 = vpop.f32.mrb[13].mxu0 }
 0x448   : > { %v6964_v50 = vmax.f32 %v6868_v49, %v6872_v28  ;;  %v10710_v23 = vadd.f32 %v10709_v35, %v6132_v22  ;;  %v6134_v21 = vpop.f32.mrb[14].mxu0  ;;  %v10719_v35 = vadd.f32 %v13083_v3, %v13648_v44  ;;  %v10721_v28 = vadd.f32 %v13085_v4, %v13650_v59 }
 0x449   : > { %v10712_v56 = vadd.f32 %v10711_v18, %v6134_v21  ;;  %v6136_v25 = vpop.f32.mrb[15].mxu0  ;;  %v10723_v3 = vadd.f32 %v13091_v5, %v13648_v44  ;;  %v10725_v4 = vadd.f32 %v13093_v6, %v13650_v59 }
 0x44a   : > { %v6777_v55 = vmax.f32 %v10708_v29, %v10710_v23  ;;  %v10714_v57 = vadd.f32 %v10713_v37, %v6136_v25  ;;  %v7011_v19 = vpack.c.bf16 %v6964_v50, %v6963_v24  ;;  %v12172_v24 = vld [vmem:[%s12527_s17 + $0x138] sm:$0xff]   ;;  %v10727_v23 = vadd.f32 %v13097_v9, %v13648_v44  ;;  %v12173_v25 = vld [vmem:[%s12527_s17 + $0x140] sm:$0xff]  }
 0x44b   : > { %10026 = vmatmul.mubr.msk.bf16.gmra.mrb[120].mxu0 %vm1246_vm1, %v12169_v7  ;;  %v10731_v9 = vadd.f32 %v13105_v11, %v13648_v44 }
 0x44c   : > { %v6873_v58 = vmax.f32 %v6777_v55, 0.0  ;;  %v6778_v61 = vmax.f32 %v10712_v56, %v10714_v57  ;;  %10415 = vmatprep.mubr.bf16.mxu1 %v7011_v19  ;;  %6408 = vmatprep.mubr.bf16.mxu0 %v14843_v2  ;;  %v10729_v55 = vadd.f32 %v13099_v10, %v13650_v59  ;;  %v10735_v10 = vadd.f32 %v13111_v15, %v13648_v44 }
 0x44d   : > { %v10739_v15 = vadd.f32 %v13119_v17, %v13648_v44 }
 0x44e   : > { %v6965_v13 = vmax.f32 %v6869_v14, %v6873_v58  ;;  %v6874_v38 = vmax.f32 %v6778_v61, 0.0  ;;  %v6140_v34 = vpop.f32.mrb[16].mxu0 }
 0x44f   : > { %v10716_v49 = vadd.f32 %v10715_v62, %v6140_v34  ;;  %v6142_v43 = vpop.f32.mrb[17].mxu0  ;;  %v10733_v62 = vadd.f32 %v13107_v12, %v13650_v59  ;;  %v10737_v34 = vadd.f32 %v13113_v16, %v13650_v59  ;;  %v10741_v16 = vadd.f32 %v13121_v20, %v13650_v59 }
 0x450   : > { %v6966_v8 = vmax.f32 %v6870_v32, %v6874_v38  ;;  %v10718_v18 = vadd.f32 %v10717_v30, %v6142_v43  ;;  %v6144_v29 = vpop.f32.mrb[18].mxu0  ;;  %v12174_v38 = vld [vmem:[%s12527_s17 + $0x148] sm:$0xff]  }
 0x451   : > { %v10720_v63 = vadd.f32 %v10719_v35, %v6144_v29  ;;  %v6146_v22 = vpop.f32.mrb[19].mxu0 }
 0x452   : > { %v7012_v0 = vpack.c.bf16 %v6966_v8, %v6965_v13  ;;  %v6779_v26 = vmax.f32 %v10716_v49, %v10718_v18  ;;  %v10722_v7 = vadd.f32 %v10721_v28, %v6146_v22 }
 0x453   : > { %10027 = vmatmul.mubr.msk.bf16.gmra.mrb[124].mxu0 %vm1246_vm1, %v12172_v24 }
 0x454   : > { %v6780_v37 = vmax.f32 %v10720_v63, %v10722_v7  ;;  %10416 = vmatmul.mubr.bf16.vlgmr.msra.gmra.mrb[192].mxu1 %v7012_v0  ;;  %6418 = vmatprep.mubr.bf16.mxu0 %v14843_v2  ;;  %v6875_v12 = vmax.f32 %v6779_v26, 0.0  ;;  %v10743_v7 = vadd.f32 %v13125_v27, %v13648_v44  ;;  %v12175_v26 = vld [vmem:[%s12527_s17 + $0x150] sm:$0xff]  }
 0x456   : > { %v6150_v50 = vpop.f32.mrb[20].mxu0  ;;  %v6876_v29 = vmax.f32 %v6780_v37, 0.0 }
 0x457   : > { %v10724_v21 = vadd.f32 %v10723_v3, %v6150_v50  ;;  %v6152_v56 = vpop.f32.mrb[21].mxu0  ;;  %v10745_v50 = vadd.f32 %v13127_v31, %v13650_v59  ;;  %v10747_v31 = vadd.f32 %v13133_v33, %v13648_v44 }
 0x458   : > { %v10726_v57 = vadd.f32 %v10725_v4, %v6152_v56  ;;  %v6154_v19 = vpop.f32.mrb[22].mxu0 }
 0x459   : > { %v10728_v14 = vadd.f32 %v10727_v23, %v6154_v19  ;;  %v6156_v58 = vpop.f32.mrb[23].mxu0 }
 0x45a   : > { %v6781_v61 = vmax.f32 %v10724_v21, %v10726_v57  ;;  %v10730_v5 = vadd.f32 %v10729_v55, %v6156_v58 }
 0x45b   : > { %10028 = vmatmul.mubr.msk.bf16.gmra.mrb[128].mxu0 %vm1246_vm1, %v12173_v25 }
 0x45c   : > { %v6782_v6 = vmax.f32 %v10728_v14, %v10730_v5  ;;  %6428 = vmatprep.mubr.bf16.mxu0 %v14843_v2  ;;  %v6877_v57 = vmax.f32 %v6781_v61, 0.0  ;;  %v10749_v14 = vadd.f32 %v13135_v36, %v13650_v59 }
 0x45e   : > { %v6160_v30 = vpop.f32.mrb[24].mxu0  ;;  %v6878_v58 = vmax.f32 %v6782_v6, 0.0 }
 0x45f   : > { %v10732_v32 = vadd.f32 %v10731_v9, %v6160_v30  ;;  %v6162_v13 = vpop.f32.mrb[25].mxu0  ;;  %v10751_v30 = vadd.f32 %v13139_v39, %v13648_v44  ;;  %v10755_v39 = vadd.f32 %v13147_v41, %v13648_v44 }
 0x460   : > { %v10734_v35 = vadd.f32 %v10733_v62, %v6162_v13  ;;  %v6164_v49 = vpop.f32.mrb[26].mxu0  ;;  %v10753_v13 = vadd.f32 %v13141_v40, %v13650_v59  ;;  %v10757_v40 = vadd.f32 %v13149_v42, %v13650_v59 }
 0x461   : > { %v10736_v43 = vadd.f32 %v10735_v10, %v6164_v49  ;;  %v6166_v24 = vpop.f32.mrb[27].mxu0 }
 0x462   : > { %v6783_v28 = vmax.f32 %v10732_v32, %v10734_v35  ;;  %v10738_v11 = vadd.f32 %v10737_v34, %v6166_v24  ;;  %v12176_v32 = vld [vmem:[%s12527_s17 + $0x158] sm:$0xff]  }
 0x463   : > { %10029 = vmatmul.mubr.msk.bf16.gmra.mrb[132].mxu0 %vm1246_vm1, %v12174_v38 }
 0x464   : > { %v6879_v8 = vmax.f32 %v6783_v28, 0.0  ;;  %v6784_v18 = vmax.f32 %v10736_v43, %v10738_v11  ;;  %6438 = vmatprep.mubr.bf16.mxu0 %v14843_v2  ;;  %v10759_v11 = vadd.f32 %v13153_v45, %v13648_v44  ;;  %v10763_v45 = vadd.f32 %v13161_v47, %v13648_v44 }
 0x466   : > { %v6967_v63 = vmax.f32 %v6875_v12, %v6879_v8  ;;  %v6880_v22 = vmax.f32 %v6784_v18, 0.0  ;;  %v6170_v0 = vpop.f32.mrb[28].mxu0  ;;  %v12177_v18 = vld [vmem:[%s12527_s17 + $0x160] sm:$0xff]  }
 0x467   : > { %v10740_v3 = vadd.f32 %v10739_v15, %v6170_v0  ;;  %v6172_v4 = vpop.f32.mrb[29].mxu0  ;;  %v10761_v15 = vadd.f32 %v13155_v46, %v13650_v59  ;;  %v12189_v46 = vld [vmem:[%s14688_s3 + $0x40] sm:$0xff]  }
 0x468   : > { %v6968_v23 = vmax.f32 %v6876_v29, %v6880_v22  ;;  %v10742_v21 = vadd.f32 %v10741_v16, %v6172_v4  ;;  %v6174_v56 = vpop.f32.mrb[30].mxu0  ;;  %v10767_v4 = vadd.f32 %v13167_v51, %v13648_v44  ;;  %10447 = vmatprep.subr.bf16.mxu1 %v12189_v46 }
 0x469   : > { %v10744_v17 = vadd.f32 %v10743_v7, %v6174_v56  ;;  %v6176_v25 = vpop.f32.mrb[31].mxu0  ;;  %v10765_v7 = vadd.f32 %v13163_v48, %v13650_v59  ;;  %10448 = vmatpush3.bf16.msra.mxu1 %v12189_v46 }
 0x46a   : > { %v6785_v55 = vmax.f32 %v10740_v3, %v10742_v21  ;;  %v10746_v20 = vadd.f32 %v10745_v50, %v6176_v25  ;;  %v13740_v37 = vpack.c.bf16 %v6968_v23, %v6967_v63  ;;  %v12178_v23 = vld [vmem:[%s12527_s17 + $0x168] sm:$0xff]   ;;  %v10769_v21 = vadd.f32 %v13169_v52, %v13650_v59 }
 0x46b   : > { %10030 = vmatmul.mubr.msk.bf16.gmra.mrb[136].mxu0 %vm1246_vm1, %v12175_v26  ;;  %v10773_v52 = vadd.f32 %v13177_v54, %v13650_v59 }
 0x46c   : > { %v6881_v27 = vmax.f32 %v6785_v55, 0.0  ;;  %v6786_v19 = vmax.f32 %v10744_v17, %v10746_v20  ;;  %10419 = vmatprep.mubr.bf16.mxu1 %v13740_v37  ;;  %6448 = vmatprep.mubr.bf16.mxu0 %v14843_v2 }
 0x46e   : > { %v6969_v5 = vmax.f32 %v6877_v57, %v6881_v27  ;;  %v6882_v9 = vmax.f32 %v6786_v19, 0.0  ;;  %v6180_v62 = vpop.f32.mrb[32].mxu0  ;;  %v10771_v27 = vadd.f32 %v13175_v53, %v13648_v44 }
 0x46f   : > { %v10748_v61 = vadd.f32 %v10747_v31, %v6180_v62  ;;  %v6182_v10 = vpop.f32.mrb[33].mxu0 }
 0x470   : > { %v6970_v38 = vmax.f32 %v6878_v58, %v6882_v9  ;;  %v10750_v34 = vadd.f32 %v10749_v14, %v6182_v10  ;;  %v6184_v35 = vpop.f32.mrb[34].mxu0 }
 0x471   : > { %v10752_v33 = vadd.f32 %v10751_v30, %v6184_v35  ;;  %v6186_v49 = vpop.f32.mrb[35].mxu0  ;;  %v12179_v30 = vld [vmem:[%s12527_s17 + $0x170] sm:$0xff]  }
 0x472   : > { %v6787_v36 = vmax.f32 %v10748_v61, %v10750_v34  ;;  %v10754_v6 = vadd.f32 %v10753_v13, %v6186_v49  ;;  %v13754_v43 = vpack.c.bf16 %v6970_v38, %v6969_v5  ;;  %v10775_v5 = vadd.f32 %v13181_v60, %v13648_v44 }
 0x473   : > { %10031 = vmatmul.mubr.msk.bf16.gmra.mrb[140].mxu0 %vm1246_vm1, %v12176_v32  ;;  %v10777_v61 = vadd.f32 %v13183_v1, %v13650_v59  ;;  %v14844_v1 = vld [vmem:[#allocation3_spill] sm:$0xff] }
 0x474   : > { %v6788_v24 = vmax.f32 %v10752_v33, %v10754_v6  ;;  %10420 = vmatmul.mubr.bf16.gmra.mrb[196].mxu1 %v13754_v43  ;;  %6458 = vmatprep.mubr.bf16.mxu0 %v14843_v2  ;;  %v6883_v20 = vmax.f32 %v6787_v36, 0.0  ;;  %v12190_v33 = vld [vmem:[%s14688_s3 + $0x48] sm:$0xff]   ;;  %v10779_v6 = vadd.f32 %v14844_v1, %v13648_v44 }
 0x475   : > { %10449 = vmatprep.subr.bf16.mxu1 %v12190_v33 }
 0x476   : > { %v6190_v28 = vpop.f32.mrb[36].mxu0  ;;  %v6884_v19 = vmax.f32 %v6788_v24, 0.0  ;;  %v14845_v24 = vld [vmem:[#allocation4_spill] sm:$0xff]  ;;  %10450 = vmatpush3.bf16.msra.mxu1 %v12190_v33 }
 0x477   : > { %v10756_v12 = vadd.f32 %v10755_v39, %v6190_v28  ;;  %v6192_v8 = vpop.f32.mrb[37].mxu0  ;;  %v10781_v39 = vadd.f32 %v14845_v24, %v13650_v59 }
 0x478   : > { %v10758_v16 = vadd.f32 %v10757_v40, %v6192_v8  ;;  %v6194_v29 = vpop.f32.mrb[38].mxu0  ;;  %v14846_v8 = vld [vmem:[#allocation5_spill] sm:$0xff] }
 0x479   : > { %v10760_v63 = vadd.f32 %v10759_v11, %v6194_v29  ;;  %v6196_v22 = vpop.f32.mrb[39].mxu0  ;;  %v12180_v29 = vld [vmem:[%s12527_s17 + $0x178] sm:$0xff]  }
 0x47a   : > { %v6789_v0 = vmax.f32 %v10756_v12, %v10758_v16  ;;  %v10762_v41 = vadd.f32 %v10761_v15, %v6196_v22 }
 0x47b   : > { %10032 = vmatmul.mubr.msk.bf16.gmra.mrb[144].mxu0 %vm1246_vm1, %v12177_v18  ;;  %v10783_v18 = vadd.f32 %v14846_v8, %v13648_v44 }
 0x47c   : > { %v6790_v42 = vmax.f32 %v10760_v63, %v10762_v41  ;;  %6468 = vmatprep.mubr.bf16.mxu0 %v14843_v2  ;;  %v6885_v60 = vmax.f32 %v6789_v0, 0.0  ;;  %v14847_v63 = vld [vmem:[#allocation6_spill] sm:$0xff] }
 0x47d   : > { %v10785_v22 = vadd.f32 %v14847_v63, %v13650_v59 }
 0x47e   : > { %v6200_v3 = vpop.f32.mrb[40].mxu0  ;;  %v6886_v40 = vmax.f32 %v6790_v42, 0.0 }
 0x47f   : > { %v10764_v26 = vadd.f32 %v10763_v45, %v6200_v3  ;;  %v6202_v50 = vpop.f32.mrb[41].mxu0 }
 0x480   : > { %v10766_v56 = vadd.f32 %v10765_v7, %v6202_v50  ;;  %v6204_v17 = vpop.f32.mrb[42].mxu0 }
 0x481   : > { %v10768_v47 = vadd.f32 %v10767_v4, %v6204_v17  ;;  %v6206_v25 = vpop.f32.mrb[43].mxu0 }
 0x482   : > { %v6791_v48 = vmax.f32 %v10764_v26, %v10766_v56  ;;  %v10770_v55 = vadd.f32 %v10769_v21, %v6206_v25  ;;  %v12191_v26 = vld [vmem:[%s14688_s3 + $0x50] sm:$0xff]   ;;  %v14849_v56 = vld [vmem:[#allocation8_spill] sm:$0xff]  ;;  %v12192_v25 = vld [vmem:[%s14688_s3 + $0x58] sm:$0xff]  }
 0x483   : > { %10033 = vmatmul.mubr.msk.bf16.gmra.mrb[148].mxu0 %vm1246_vm1, %v12178_v23  ;;  %v14848_v23 = vld [vmem:[#allocation7_spill] sm:$0xff]  ;;  %10451 = vmatprep.subr.bf16.mxu1 %v12191_v26  ;;  %v10789_v17 = vadd.f32 %v14849_v56, %v13650_v59 }
 0x484   : > { %v6887_v57 = vmax.f32 %v6791_v48, 0.0  ;;  %v6792_v51 = vmax.f32 %v10768_v47, %v10770_v55  ;;  %6478 = vmatprep.mubr.bf16.mxu0 %v14843_v2  ;;  %v10787_v21 = vadd.f32 %v14848_v23, %v13648_v44  ;;  %10452 = vmatpush3.bf16.msra.mxu1 %v12191_v26  ;;  %v14850_v48 = vld [vmem:[#allocation9_spill] sm:$0xff]  ;;  %v14859_v26 = vld [vmem:[#allocation18_spill] sm:$0xff] }
 0x485   : > { %v10791_v55 = vadd.f32 %v14850_v48, %v13648_v44  ;;  %10453 = vmatprep.subr.bf16.mxu1 %v12192_v25  ;;  %v10809_v23 = vadd.f32 %v14859_v26, %v13650_v59 }
 0x486   : > { %v6971_v31 = vmax.f32 %v6883_v20, %v6887_v57  ;;  %v6888_v14 = vmax.f32 %v6792_v51, 0.0  ;;  %v6210_v58 = vpop.f32.mrb[44].mxu0  ;;  %v12181_v51 = vld [vmem:[%s12527_s17 + $0x180] sm:$0xff]  }
 0x487   : > { %v10772_v9 = vadd.f32 %v10771_v27, %v6210_v58  ;;  %v6212_v62 = vpop.f32.mrb[45].mxu0  ;;  %v14851_v27 = vld [vmem:[#allocation10_spill] sm:$0xff] }
 0x488   : > { %v6972_v10 = vmax.f32 %v6884_v19, %v6888_v14  ;;  %v10774_v32 = vadd.f32 %v10773_v52, %v6212_v62  ;;  %v6214_v13 = vpop.f32.mrb[46].mxu0  ;;  %v10793_v52 = vadd.f32 %v14851_v27, %v13650_v59  ;;  %10454 = vmatpush3.bf16.msra.mxu1 %v12192_v25 }
 0x489   : > { %v10776_v53 = vadd.f32 %v10775_v5, %v6214_v13  ;;  %v6216_v38 = vpop.f32.mrb[47].mxu0 }
 0x48a   : > { %v6793_v34 = vmax.f32 %v10772_v9, %v10774_v32  ;;  %v10778_v54 = vadd.f32 %v10777_v61, %v6216_v38  ;;  %v13793_v35 = vpack.c.bf16 %v6972_v10, %v6971_v31  ;;  %v14853_v10 = vld [vmem:[#allocation12_spill] sm:$0xff]  ;;  %v14854_v38 = vld [vmem:[#allocation13_spill] sm:$0xff] }
 0x48b   : > { %10034 = vmatmul.mubr.msk.bf16.gmra.mrb[152].mxu0 %vm1246_vm1, %v12179_v30  ;;  %v14852_v30 = vld [vmem:[#allocation11_spill] sm:$0xff]  ;;  %v10797_v32 = vadd.f32 %v14853_v10, %v13650_v59 }
 0x48c   : > { %v6889_v49 = vmax.f32 %v6793_v34, 0.0  ;;  %v6794_v36 = vmax.f32 %v10776_v53, %v10778_v54  ;;  %10423 = vmatprep.mubr.bf16.mxu1 %v13793_v35  ;;  %6488 = vmatprep.mubr.bf16.mxu0 %v14843_v2  ;;  %v10795_v61 = vadd.f32 %v14852_v30, %v13648_v44  ;;  %v12193_v53 = vld [vmem:[%s14688_s3 + $0x60] sm:$0xff]   ;;  %v10799_v34 = vadd.f32 %v14854_v38, %v13648_v44  ;;  %v14863_v38 = vld [vmem:[#allocation22_spill] sm:$0xff] }
 0x48d   : > { %10455 = vmatprep.subr.bf16.mxu1 %v12193_v53 }
 0x48e   : > { %v6973_v28 = vmax.f32 %v6885_v60, %v6889_v49  ;;  %v6890_v11 = vmax.f32 %v6794_v36, 0.0  ;;  %v6220_v12 = vpop.f32.mrb[48].mxu0  ;;  %v12182_v60 = vld [vmem:[%s12527_s17 + $0x188] sm:$0xff]   ;;  %v14855_v49 = vld [vmem:[#allocation14_spill] sm:$0xff]  ;;  %10456 = vmatpush3.bf16.msra.mxu1 %v12193_v53 }
 0x48f   : > { %v10780_v15 = vadd.f32 %v10779_v6, %v6220_v12  ;;  %v6222_v16 = vpop.f32.mrb[49].mxu0  ;;  %v10801_v36 = vadd.f32 %v14855_v49, %v13650_v59  ;;  %v12184_v53 = vld [vmem:[%s12527_s17 + $0x198] sm:$0xff]  }
 0x490   : > { %v6974_v0 = vmax.f32 %v6886_v40, %v6890_v11  ;;  %v10782_v41 = vadd.f32 %v10781_v39, %v6222_v16  ;;  %v6224_v45 = vpop.f32.mrb[50].mxu0  ;;  %v14857_v16 = vld [vmem:[#allocation16_spill] sm:$0xff] }
 0x491   : > { %v10784_v7 = vadd.f32 %v10783_v18, %v6224_v45  ;;  %v6226_v3 = vpop.f32.mrb[51].mxu0  ;;  %v14856_v18 = vld [vmem:[#allocation15_spill] sm:$0xff]  ;;  %v14858_v45 = vld [vmem:[#allocation17_spill] sm:$0xff] }
 0x492   : > { %v6795_v46 = vmax.f32 %v10780_v15, %v10782_v41  ;;  %v10786_v42 = vadd.f32 %v10785_v22, %v6226_v3  ;;  %v13810_v4 = vpack.c.bf16 %v6974_v0, %v6973_v28  ;;  %v10803_v15 = vadd.f32 %v14856_v18, %v13648_v44  ;;  %v12196_v18 = vld [vmem:[%s14688_s3 + $0x78] sm:$0xff]  }
 0x493   : > { %10035 = vmatmul.mubr.msk.bf16.gmra.mrb[156].mxu0 %vm1246_vm1, %v12180_v29  ;;  %v10805_v29 = vadd.f32 %v14857_v16, %v13650_v59 }
 0x494   : > { %v6796_v50 = vmax.f32 %v10784_v7, %v10786_v42  ;;  %10424 = vmatmul.mubr.bf16.gmra.mrb[200].mxu1 %v13810_v4  ;;  %6498 = vmatprep.mubr.bf16.mxu0 %v14843_v2  ;;  %v6891_v11 = vmax.f32 %v6795_v46, 0.0  ;;  %v10807_v7 = vadd.f32 %v14858_v45, %v13648_v44  ;;  %v12183_v46 = vld [vmem:[%s12527_s17 + $0x190] sm:$0xff]  }
 0x496   : > { %v6230_v47 = vpop.f32.mrb[52].mxu0  ;;  %v6892_v63 = vmax.f32 %v6796_v50, 0.0 }
 0x497   : > { %v10788_v20 = vadd.f32 %v10787_v21, %v6230_v47  ;;  %v6232_v57 = vpop.f32.mrb[53].mxu0 }
 0x498   : > { %v10790_v19 = vadd.f32 %v10789_v17, %v6232_v57  ;;  %v6234_v31 = vpop.f32.mrb[54].mxu0 }
 0x499   : > { %v10792_v14 = vadd.f32 %v10791_v55, %v6234_v31  ;;  %v6236_v58 = vpop.f32.mrb[55].mxu0  ;;  %v14861_v31 = vld [vmem:[#allocation20_spill] sm:$0xff] }
 0x49a   : > { %v6797_v5 = vmax.f32 %v10788_v20, %v10790_v19  ;;  %v10794_v9 = vadd.f32 %v10793_v52, %v6236_v58  ;;  %v12194_v20 = vld [vmem:[%s14688_s3 + $0x68] sm:$0xff]   ;;  %v14860_v52 = vld [vmem:[#allocation19_spill] sm:$0xff] }
 0x49b   : > { %10036 = vmatmul.mubr.msk.bf16.gmra.mrb[160].mxu0 %vm1246_vm1, %v12181_v51  ;;  %v10811_v19 = vadd.f32 %v14860_v52, %v13648_v44  ;;  %10457 = vmatprep.subr.bf16.mxu1 %v12194_v20  ;;  %v14871_v52 = vld [vmem:[#allocation30_spill] sm:$0xff] }
 0x49c   : > { %v6798_v62 = vmax.f32 %v10792_v14, %v10794_v9  ;;  %6508 = vmatprep.mubr.bf16.mxu0 %v14843_v2  ;;  %v6893_v57 = vmax.f32 %v6797_v5, 0.0  ;;  %v10813_v14 = vadd.f32 %v14861_v31, %v13650_v59  ;;  %10458 = vmatpush3.bf16.msra.mxu1 %v12194_v20  ;;  %v14862_v5 = vld [vmem:[#allocation21_spill] sm:$0xff] }
 0x49d   : > { %v10815_v10 = vadd.f32 %v14862_v5, %v13648_v44 }
 0x49e   : > { %v6240_v13 = vpop.f32.mrb[56].mxu0  ;;  %v6894_v58 = vmax.f32 %v6798_v62, 0.0 }
 0x49f   : > { %v10796_v54 = vadd.f32 %v10795_v61, %v6240_v13  ;;  %v6242_v33 = vpop.f32.mrb[57].mxu0 }
 0x4a0   : > { %v10798_v1 = vadd.f32 %v10797_v32, %v6242_v33  ;;  %v6244_v6 = vpop.f32.mrb[58].mxu0 }
 0x4a1   : > { %v10800_v24 = vadd.f32 %v10799_v34, %v6244_v6  ;;  %v6246_v39 = vpop.f32.mrb[59].mxu0  ;;  %v10817_v34 = vadd.f32 %v14863_v38, %v13650_v59  ;;  %v14873_v38 = vld [vmem:[#allocation32_spill] sm:$0xff] }
 0x4a2   : > { %v6799_v40 = vmax.f32 %v10796_v54, %v10798_v1  ;;  %v10802_v28 = vadd.f32 %v10801_v36, %v6246_v39 }
 0x4a3   : > { %10037 = vmatmul.mubr.msk.bf16.gmra.mrb[164].mxu0 %vm1246_vm1, %v12182_v60 }
 0x4a4   : > { %v6895_v12 = vmax.f32 %v6799_v40, 0.0  ;;  %v6800_v8 = vmax.f32 %v10800_v24, %v10802_v28  ;;  %6518 = vmatprep.mubr.bf16.mxu0 %v14843_v2  ;;  %v12195_v24 = vld [vmem:[%s14688_s3 + $0x70] sm:$0xff]   ;;  %v14864_v40 = vld [vmem:[#allocation23_spill] sm:$0xff] }
 0x4a5   : > { %v10819_v28 = vadd.f32 %v14864_v40, %v13648_v44  ;;  %10459 = vmatprep.subr.bf16.mxu1 %v12195_v24 }
 0x4a6   : > { %v6975_v22 = vmax.f32 %v6891_v11, %v6895_v12  ;;  %v6896_v0 = vmax.f32 %v6800_v8, 0.0  ;;  %v6250_v41 = vpop.f32.mrb[60].mxu0  ;;  %v14865_v11 = vld [vmem:[#allocation24_spill] sm:$0xff]  ;;  %10460 = vmatpush3.bf16.msra.mxu1 %v12195_v24 }
 0x4a7   : > { %v10804_v3 = vadd.f32 %v10803_v15, %v6250_v41  ;;  %v6252_v42 = vpop.f32.mrb[61].mxu0  ;;  %v10821_v12 = vadd.f32 %v14865_v11, %v13650_v59  ;;  %v14866_v15 = vld [vmem:[#allocation25_spill] sm:$0xff]  ;;  %10461 = vmatprep.subr.bf16.mxu1 %v12196_v18 }
 0x4a8   : > { %v6976_v21 = vmax.f32 %v6892_v63, %v6896_v0  ;;  %v10806_v56 = vadd.f32 %v10805_v29, %v6252_v42  ;;  %v6254_v17 = vpop.f32.mrb[62].mxu0  ;;  %v10823_v16 = vadd.f32 %v14866_v15, %v13648_v44  ;;  %v14867_v0 = vld [vmem:[#allocation26_spill] sm:$0xff] }
 0x4a9   : > { %v10808_v47 = vadd.f32 %v10807_v7, %v6254_v17  ;;  %v6256_v25 = vpop.f32.mrb[63].mxu0  ;;  %v10825_v41 = vadd.f32 %v14867_v0, %v13650_v59  ;;  %v14869_v17 = vld [vmem:[#allocation28_spill] sm:$0xff] }
 0x4aa   : > { %v13855_v48 = vpack.c.bf16 %v6976_v21, %v6975_v22  ;;  %v6801_v50 = vmax.f32 %v10804_v3, %v10806_v56  ;;  %v10810_v55 = vadd.f32 %v10809_v23, %v6256_v25  ;;  %v12185_v22 = vld [vmem:[%s12527_s17 + $0x1a0] sm:$0xff]   ;;  %10462 = vmatpush3.bf16.msra.mxu1 %v12196_v18 }
 0x4ab   : > { %10038 = vmatmul.mubr.msk.bf16.gmra.mrb[168].mxu0 %vm1246_vm1, %v12183_v46  ;;  %v14868_v21 = vld [vmem:[#allocation27_spill] sm:$0xff] }
 0x4ac   : > { %v6897_v51 = vmax.f32 %v6801_v50, 0.0  ;;  %v6802_v27 = vmax.f32 %v10808_v47, %v10810_v55  ;;  %10427 = vmatprep.mubr.bf16.mxu1 %v13855_v48  ;;  %6528 = vmatprep.mubr.bf16.mxu0 %v14843_v2  ;;  %v10827_v56 = vadd.f32 %v14868_v21, %v13648_v44  ;;  %v10829_v47 = vadd.f32 %v14869_v17, %v13650_v59  ;;  %v13901_v50 = vld [vmem:[%s14688_s3 + $0x80] sm:$0xff]   ;;  %v14870_v55 = vld [vmem:[#allocation29_spill] sm:$0xff] }
 0x4ad   : > { %v10831_v20 = vadd.f32 %v14870_v55, %v13648_v44  ;;  %10495 = vmatprep.subr.bf16.mxu1 %v13901_v50 }
 0x4ae   : > { %v6977_v9 = vmax.f32 %v6893_v57, %v6897_v51  ;;  %v6898_v30 = vmax.f32 %v6802_v27, 0.0  ;;  %v6260_v61 = vpop.f32.mrb[64].mxu0  ;;  %v12186_v27 = vld [vmem:[%s12527_s17 + $0x1a8] sm:$0xff]  }
 0x4af   : > { %v10812_v32 = vadd.f32 %v10811_v19, %v6260_v61  ;;  %v6262_v13 = vpop.f32.mrb[65].mxu0  ;;  %v10833_v19 = vadd.f32 %v14871_v52, %v13650_v59 }
 0x4b0   : > { %v6978_v54 = vmax.f32 %v6894_v58, %v6898_v30  ;;  %v10814_v33 = vadd.f32 %v10813_v14, %v6262_v13  ;;  %v6264_v60 = vpop.f32.mrb[66].mxu0  ;;  %v14872_v13 = vld [vmem:[#allocation31_spill] sm:$0xff] }
 0x4b1   : > { %v10816_v49 = vadd.f32 %v10815_v10, %v6264_v60  ;;  %v6266_v36 = vpop.f32.mrb[67].mxu0 }
 0x4b2   : > { %v13872_v1 = vpack.c.bf16 %v6978_v54, %v6977_v9  ;;  %v6803_v62 = vmax.f32 %v10812_v32, %v10814_v33  ;;  %v10818_v6 = vadd.f32 %v10817_v34, %v6266_v36  ;;  %v10837_v34 = vadd.f32 %v14873_v38, %v13650_v59  ;;  %v14874_v36 = vld [vmem:[#allocation33_spill] sm:$0xff] }
 0x4b3   : > { %10039 = vmatmul.mubr.msk.bf16.gmra.mrb[172].mxu0 %vm1246_vm1, %v12184_v53  ;;  %v10835_v53 = vadd.f32 %v14872_v13, %v13648_v44  ;;  %v14882_v13 = vld [vmem:[#allocation41_spill] sm:$0xff] }
 0x4b4   : > { %v6804_v39 = vmax.f32 %v10816_v49, %v10818_v6  ;;  %10428 = vmatmul.mubr.bf16.gmra.mrb[204].mxu1 %v13872_v1  ;;  %6538 = vmatprep.mubr.bf16.mxu0 %v14843_v2  ;;  %v6899_v5 = vmax.f32 %v6803_v62, 0.0  ;;  %v10839_v6 = vadd.f32 %v14874_v36, %v13648_v44  ;;  %v12187_v62 = vld [vmem:[%s12527_s17 + $0x1b0] sm:$0xff]  }
 0x4b6   : > { %v6270_v8 = vpop.f32.mrb[68].mxu0  ;;  %v6900_v54 = vmax.f32 %v6804_v39, 0.0 }
 0x4b7   : > { %v10820_v29 = vadd.f32 %v10819_v28, %v6270_v8  ;;  %v6272_v63 = vpop.f32.mrb[69].mxu0  ;;  %v14875_v28 = vld [vmem:[#allocation34_spill] sm:$0xff] }
 0x4b8   : > { %v10822_v45 = vadd.f32 %v10821_v12, %v6272_v63  ;;  %v6274_v7 = vpop.f32.mrb[70].mxu0  ;;  %v10841_v11 = vadd.f32 %v14875_v28, %v13650_v59  ;;  %v14884_v28 = vld [vmem:[#allocation43_spill] sm:$0xff] }
 0x4b9   : > { %v10824_v3 = vadd.f32 %v10823_v16, %v6274_v7  ;;  %v6276_v42 = vpop.f32.mrb[71].mxu0 }
 0x4ba   : > { %v6805_v46 = vmax.f32 %v10820_v29, %v10822_v45  ;;  %v10826_v26 = vadd.f32 %v10825_v41, %v6276_v42  ;;  %v14876_v45 = vld [vmem:[#allocation35_spill] sm:$0xff] }
 0x4bb   : > { %10040 = vmatmul.mubr.msk.bf16.gmra.mrb[176].mxu0 %vm1246_vm1, %v12185_v22  ;;  %v10843_v7 = vadd.f32 %v14876_v45, %v13648_v44 }
 0x4bc   : > { %v6806_v23 = vmax.f32 %v10824_v3, %v10826_v26  ;;  %6548 = vmatprep.mubr.bf16.mxu0 %v14843_v2  ;;  %v6901_v22 = vmax.f32 %v6805_v46, 0.0  ;;  %v14877_v3 = vld [vmem:[#allocation36_spill] sm:$0xff] }
 0x4bd   : > { %v10845_v42 = vadd.f32 %v14877_v3, %v13650_v59 }
 0x4be   : > { %v6280_v25 = vpop.f32.mrb[72].mxu0  ;;  %v6902_v26 = vmax.f32 %v6806_v23, 0.0 }
 0x4bf   : > { %v10828_v57 = vadd.f32 %v10827_v56, %v6280_v25  ;;  %v6282_v51 = vpop.f32.mrb[73].mxu0 }
 0x4c0   : > { %v10830_v31 = vadd.f32 %v10829_v47, %v6282_v51  ;;  %v6284_v14 = vpop.f32.mrb[74].mxu0  ;;  %v14878_v47 = vld [vmem:[#allocation37_spill] sm:$0xff] }
 0x4c1   : > { %v10832_v58 = vadd.f32 %v10831_v20, %v6284_v14  ;;  %v6286_v9 = vpop.f32.mrb[75].mxu0  ;;  %v10847_v25 = vadd.f32 %v14878_v47, %v13648_v44  ;;  %v12188_v20 = vld [vmem:[%s12527_s17 + $0x1b8] sm:$0xff]   ;;  %v14888_v47 = vld [vmem:[#allocation47_spill] sm:$0xff] }
 0x4c2   : > { %v6807_v30 = vmax.f32 %v10828_v57, %v10830_v31  ;;  %v10834_v61 = vadd.f32 %v10833_v19, %v6286_v9  ;;  %v14879_v57 = vld [vmem:[#allocation38_spill] sm:$0xff] }
 0x4c3   : > { %10041 = vmatmul.mubr.msk.bf16.gmra.mrb[180].mxu0 %vm1246_vm1, %v12186_v27  ;;  %v10849_v51 = vadd.f32 %v14879_v57, %v13650_v59 }
 0x4c4   : > { %v6903_v10 = vmax.f32 %v6807_v30, 0.0  ;;  %v6808_v32 = vmax.f32 %v10832_v58, %v10834_v61  ;;  %6558 = vmatprep.mubr.bf16.mxu0 %v14843_v2  ;;  %v14880_v30 = vld [vmem:[#allocation39_spill] sm:$0xff] }
 0x4c5   : > { %v10851_v61 = vadd.f32 %v14880_v30, %v13648_v44 }
 0x4c6   : > { %v6979_v33 = vmax.f32 %v6899_v5, %v6903_v10  ;;  %v6904_v60 = vmax.f32 %v6808_v32, 0.0  ;;  %v6290_v49 = vpop.f32.mrb[76].mxu0  ;;  %v14881_v5 = vld [vmem:[#allocation40_spill] sm:$0xff] }
 0x4c7   : > { %v10836_v24 = vadd.f32 %v10835_v53, %v6290_v49  ;;  %v6292_v40 = vpop.f32.mrb[77].mxu0  ;;  %v10853_v10 = vadd.f32 %v14881_v5, %v13650_v59  ;;  %v10855_v53 = vadd.f32 %v14882_v13, %v13648_v44 }
 0x4c8   : > { %v6980_v12 = vmax.f32 %v6900_v54, %v6904_v60  ;;  %v10838_v8 = vadd.f32 %v10837_v34, %v6292_v40  ;;  %v6294_v18 = vpop.f32.mrb[78].mxu0  ;;  %v14883_v54 = vld [vmem:[#allocation42_spill] sm:$0xff] }
 0x4c9   : > { %v10840_v15 = vadd.f32 %v10839_v6, %v6294_v18  ;;  %v6296_v16 = vpop.f32.mrb[79].mxu0 }
 0x4ca   : > { %v13920_v29 = vpack.c.bf16 %v6980_v12, %v6979_v33  ;;  %v6809_v39 = vmax.f32 %v10836_v24, %v10838_v8  ;;  %v10842_v63 = vadd.f32 %v10841_v11, %v6296_v16  ;;  %v10857_v33 = vadd.f32 %v14883_v54, %v13650_v59  ;;  %v14885_v12 = vld [vmem:[#allocation44_spill] sm:$0xff] }
 0x4cb   : > { %10042 = vmatmul.mubr.msk.bf16.gmra.mrb[184].mxu0 %vm1246_vm1, %v12187_v62  ;;  %v10859_v11 = vadd.f32 %v14884_v28, %v13648_v44  ;;  %v10861_v8 = vadd.f32 %v14885_v12, %v13650_v59  ;;  %v14894_v12 = vld [vmem:[#allocation53_spill] sm:$0xff] }
 0x4cc   : > { %v6905_v0 = vmax.f32 %v6809_v39, 0.0  ;;  %v6810_v41 = vmax.f32 %v10840_v15, %v10842_v63  ;;  %10431 = vmatprep.mubr.bf16.mxu1 %v13920_v29  ;;  %6568 = vmatprep.mubr.bf16.mxu0 %v14843_v2  ;;  %v14886_v15 = vld [vmem:[#allocation45_spill] sm:$0xff] }
 0x4cd   : > { %v10863_v16 = vadd.f32 %v14886_v15, %v13648_v44 }
 0x4ce   : > { %v6981_v21 = vmax.f32 %v6901_v22, %v6905_v0  ;;  %v6906_v56 = vmax.f32 %v6810_v41, 0.0  ;;  %v6300_v17 = vpop.f32.mrb[80].mxu0  ;;  %v14887_v22 = vld [vmem:[#allocation46_spill] sm:$0xff] }
 0x4cf   : > { %v10844_v46 = vadd.f32 %v10843_v7, %v6300_v17  ;;  %v6302_v55 = vpop.f32.mrb[81].mxu0  ;;  %v10865_v0 = vadd.f32 %v14887_v22, %v13650_v59 }
 0x4d0   : > { %v6982_v2 = vmax.f32 %v6902_v26, %v6906_v56  ;;  %v10846_v27 = vadd.f32 %v10845_v42, %v6302_v55  ;;  %v6304_v52 = vpop.f32.mrb[82].mxu0 }
 0x4d1   : > { %v10848_v19 = vadd.f32 %v10847_v25, %v6304_v52  ;;  %v6306_v31 = vpop.f32.mrb[83].mxu0  ;;  %v10867_v25 = vadd.f32 %v14888_v47, %v13648_v44  ;;  %v14898_v47 = vld [vmem:[#allocation57_spill] sm:$0xff] }
 0x4d2   : > { %v13934_v14 = vpack.c.bf16 %v6982_v2, %v6981_v21  ;;  %v6811_v23 = vmax.f32 %v10844_v46, %v10846_v27  ;;  %v10850_v58 = vadd.f32 %v10849_v51, %v6306_v31  ;;  %v14889_v46 = vld [vmem:[#allocation48_spill] sm:$0xff]  ;;  %v14890_v27 = vld [vmem:[#allocation49_spill] sm:$0xff] }
 0x4d3   : > { %10043 = vmatmul.mubr.msk.bf16.gmra.mrb[188].mxu0 %vm1246_vm1, %v12188_v20  ;;  %v10869_v55 = vadd.f32 %v14889_v46, %v13650_v59  ;;  %v10871_v52 = vadd.f32 %v14890_v27, %v13648_v44 }
 0x4d4   : > { %v6812_v9 = vmax.f32 %v10848_v19, %v10850_v58  ;;  %10432 = vmatmul.mubr.bf16.gmra.mrb[208].mxu1 %v13934_v14  ;;  %v6907_v21 = vmax.f32 %v6811_v23, 0.0  ;;  %v14891_v58 = vld [vmem:[#allocation50_spill] sm:$0xff] }
 0x4d5   : > { %v10873_v23 = vadd.f32 %v14891_v58, %v13650_v59 }
 0x4d6   : > { %v6310_v32 = vpop.f32.mrb[84].mxu0  ;;  %v6908_v20 = vmax.f32 %v6812_v9, 0.0 }
 0x4d7   : > { %v10852_v38 = vadd.f32 %v10851_v61, %v6310_v32  ;;  %v6312_v34 = vpop.f32.mrb[85].mxu0 }
 0x4d8   : > { %v10854_v60 = vadd.f32 %v10853_v10, %v6312_v34  ;;  %v6314_v49 = vpop.f32.mrb[86].mxu0 }
 0x4d9   : > { %v10856_v36 = vadd.f32 %v10855_v53, %v6314_v49  ;;  %v6316_v6 = vpop.f32.mrb[87].mxu0  ;;  %v14893_v49 = vld [vmem:[#allocation52_spill] sm:$0xff] }
 0x4da   : > { %v6813_v24 = vmax.f32 %v10852_v38, %v10854_v60  ;;  %v10858_v40 = vadd.f32 %v10857_v33, %v6316_v6  ;;  %v14892_v33 = vld [vmem:[#allocation51_spill] sm:$0xff] }
 0x4db   : > { %v10875_v60 = vadd.f32 %v14892_v33, %v13648_v44 }
 0x4dc   : > { %v6814_v62 = vmax.f32 %v10856_v36, %v10858_v40  ;;  %v6909_v38 = vmax.f32 %v6813_v24, 0.0  ;;  %v10877_v36 = vadd.f32 %v14893_v49, %v13650_v59  ;;  %v14895_v24 = vld [vmem:[#allocation54_spill] sm:$0xff] }
 0x4de   : > { %v6320_v18 = vpop.f32.mrb[88].mxu0  ;;  %v6910_v6 = vmax.f32 %v6814_v62, 0.0 }
 0x4df   : > { %v10860_v39 = vadd.f32 %v10859_v11, %v6320_v18  ;;  %v6322_v63 = vpop.f32.mrb[89].mxu0 }
 0x4e0   : > { %v10862_v41 = vadd.f32 %v10861_v8, %v6322_v63  ;;  %v6324_v45 = vpop.f32.mrb[90].mxu0  ;;  %v10879_v8 = vadd.f32 %v14894_v12, %v13648_v44 }
 0x4e1   : > { %v10864_v7 = vadd.f32 %v10863_v16, %v6324_v45  ;;  %v6326_v3 = vpop.f32.mrb[91].mxu0  ;;  %v10881_v16 = vadd.f32 %v14895_v24, %v13650_v59 }
 0x4e2   : > { %v6815_v42 = vmax.f32 %v10860_v39, %v10862_v41  ;;  %v10866_v26 = vadd.f32 %v10865_v0, %v6326_v3 }
 0x4e4   : > { %v6911_v56 = vmax.f32 %v6815_v42, 0.0  ;;  %v6816_v17 = vmax.f32 %v10864_v7, %v10866_v26  ;;  %v14896_v42 = vld [vmem:[#allocation55_spill] sm:$0xff] }
 0x4e5   : > { %v10883_v26 = vadd.f32 %v14896_v42, %v13648_v44 }
 0x4e6   : > { %v6983_v57 = vmax.f32 %v6907_v21, %v6911_v56  ;;  %v6912_v51 = vmax.f32 %v6816_v17, 0.0  ;;  %v6330_v2 = vpop.f32.mrb[92].mxu0  ;;  %v14897_v21 = vld [vmem:[#allocation56_spill] sm:$0xff] }
 0x4e7   : > { %v10868_v19 = vadd.f32 %v10867_v25, %v6330_v2  ;;  %v6332_v31 = vpop.f32.mrb[93].mxu0  ;;  %v10885_v56 = vadd.f32 %v14897_v21, %v13650_v59  ;;  %v10887_v25 = vadd.f32 %v14898_v47, %v13648_v44 }
 0x4e8   : > { %v6984_v30 = vmax.f32 %v6908_v20, %v6912_v51  ;;  %v10870_v61 = vadd.f32 %v10869_v55, %v6332_v31  ;;  %v6334_v5 = vpop.f32.mrb[94].mxu0  ;;  %v14899_v20 = vld [vmem:[#allocation58_spill] sm:$0xff] }
 0x4e9   : > { %v10872_v10 = vadd.f32 %v10871_v52, %v6334_v5  ;;  %v6336_v32 = vpop.f32.mrb[95].mxu0 }
 0x4ea   : > { %v13962_v13 = vpack.c.bf16 %v6984_v30, %v6983_v57  ;;  %v6817_v53 = vmax.f32 %v10868_v19, %v10870_v61  ;;  %v10874_v9 = vadd.f32 %v10873_v23, %v6336_v32  ;;  %v10889_v57 = vadd.f32 %v14899_v20, %v13650_v59  ;;  %v14900_v23 = vld [vmem:[#allocation59_spill] sm:$0xff]  ;;  %v14901_v61 = vld [vmem:[#allocation60_spill] sm:$0xff]  ;;  %v14902_v32 = vld [vmem:[#allocation61_spill] sm:$0xff] }
 0x4eb   : > { %v10891_v30 = vadd.f32 %v14900_v23, %v13648_v44  ;;  %v10893_v5 = vadd.f32 %v14901_v61, %v13650_v59 }
 0x4ec   : > { %v6913_v34 = vmax.f32 %v6817_v53, 0.0  ;;  %v6818_v54 = vmax.f32 %v10872_v10, %v10874_v9  ;;  %10435 = vmatprep.mubr.bf16.mxu1 %v13962_v13  ;;  %v10895_v53 = vadd.f32 %v14902_v32, %v13648_v44 }
 0x4ee   : > { %v6985_v40 = vmax.f32 %v6909_v38, %v6913_v34  ;;  %v6914_v28 = vmax.f32 %v6818_v54, 0.0  ;;  %v6340_v11 = vpop.f32.mrb[96].mxu0  ;;  %v14903_v34 = vld [vmem:[#allocation62_spill] sm:$0xff] }
 0x4ef   : > { %v10876_v18 = vadd.f32 %v10875_v60, %v6340_v11  ;;  %v6342_v15 = vpop.f32.mrb[97].mxu0  ;;  %v10897_v54 = vadd.f32 %v14903_v34, %v13650_v59 }
 0x4f0   : > { %v6986_v39 = vmax.f32 %v6910_v6, %v6914_v28  ;;  %v10878_v63 = vadd.f32 %v10877_v36, %v6342_v15  ;;  %v6344_v22 = vpop.f32.mrb[98].mxu0  ;;  %v14905_v15 = vld [vmem:[#allocation64_spill] sm:$0xff] }
 0x4f1   : > { %v10880_v0 = vadd.f32 %v10879_v8, %v6344_v22  ;;  %v6346_v41 = vpop.f32.mrb[99].mxu0  ;;  %v14904_v8 = vld [vmem:[#allocation63_spill] sm:$0xff]  ;;  %v10901_v24 = vadd.f32 %v14905_v15, %v13650_v59  ;;  %v14914_v15 = vld [vmem:[#allocation73_spill] sm:$0xff] }
 0x4f2   : > { %v13973_v45 = vpack.c.bf16 %v6986_v39, %v6985_v40  ;;  %v6819_v7 = vmax.f32 %v10876_v18, %v10878_v63  ;;  %v10882_v62 = vadd.f32 %v10881_v16, %v6346_v41  ;;  %v10899_v18 = vadd.f32 %v14904_v8, %v13648_v44 }
 0x4f4   : > { %v6820_v3 = vmax.f32 %v10880_v0, %v10882_v62  ;;  %10436 = vmatmul.mubr.bf16.gmra.mrb[212].mxu1 %v13973_v45  ;;  %v6915_v28 = vmax.f32 %v6819_v7, 0.0  ;;  %v14906_v0 = vld [vmem:[#allocation65_spill] sm:$0xff] }
 0x4f5   : > { %v10903_v41 = vadd.f32 %v14906_v0, %v13648_v44 }
 0x4f6   : > { %v6350_v17 = vpop.f32.mrb[100].mxu0  ;;  %v6916_v16 = vmax.f32 %v6820_v3, 0.0 }
 0x4f7   : > { %v10884_v46 = vadd.f32 %v10883_v26, %v6350_v17  ;;  %v6352_v55 = vpop.f32.mrb[101].mxu0  ;;  %v14907_v26 = vld [vmem:[#allocation66_spill] sm:$0xff] }
 0x4f8   : > { %v10886_v51 = vadd.f32 %v10885_v56, %v6352_v55  ;;  %v6354_v2 = vpop.f32.mrb[102].mxu0  ;;  %v10905_v7 = vadd.f32 %v14907_v26, %v13650_v59 }
 0x4f9   : > { %v10888_v27 = vadd.f32 %v10887_v25, %v6354_v2  ;;  %v6356_v52 = vpop.f32.mrb[103].mxu0  ;;  %v14908_v2 = vld [vmem:[#allocation67_spill] sm:$0xff] }
 0x4fa   : > { %v6821_v19 = vmax.f32 %v10884_v46, %v10886_v51  ;;  %v10890_v31 = vadd.f32 %v10889_v57, %v6356_v52  ;;  %v14909_v52 = vld [vmem:[#allocation68_spill] sm:$0xff] }
 0x4fc   : > { %v6822_v58 = vmax.f32 %v10888_v27, %v10890_v31  ;;  %v6917_v20 = vmax.f32 %v6821_v19, 0.0  ;;  %v10907_v27 = vadd.f32 %v14908_v2, %v13648_v44  ;;  %v10909_v31 = vadd.f32 %v14909_v52, %v13650_v59  ;;  %v14911_v19 = vld [vmem:[#allocation70_spill] sm:$0xff] }
 0x4fd   : > { %v14919_v2 = vld [vmem:[#allocation78_spill] sm:$0xff] }
 0x4fe   : > { %v6360_v10 = vpop.f32.mrb[104].mxu0  ;;  %v6918_v23 = vmax.f32 %v6822_v58, 0.0 }
 0x4ff   : > { %v10892_v9 = vadd.f32 %v10891_v30, %v6360_v10  ;;  %v6362_v38 = vpop.f32.mrb[105].mxu0  ;;  %v14910_v10 = vld [vmem:[#allocation69_spill] sm:$0xff] }
 0x500   : > { %v10894_v33 = vadd.f32 %v10893_v5, %v6362_v38  ;;  %v6364_v60 = vpop.f32.mrb[106].mxu0  ;;  %v10911_v32 = vadd.f32 %v14910_v10, %v13648_v44  ;;  %v10913_v38 = vadd.f32 %v14911_v19, %v13650_v59 }
 0x501   : > { %v10896_v49 = vadd.f32 %v10895_v53, %v6364_v60  ;;  %v6366_v36 = vpop.f32.mrb[107].mxu0 }
 0x502   : > { %v6823_v6 = vmax.f32 %v10892_v9, %v10894_v33  ;;  %v10898_v40 = vadd.f32 %v10897_v54, %v6366_v36 }
 0x504   : > { %v6919_v11 = vmax.f32 %v6823_v6, 0.0  ;;  %v6824_v12 = vmax.f32 %v10896_v49, %v10898_v40 }
 0x506   : > { %v6987_v39 = vmax.f32 %v6915_v28, %v6919_v11  ;;  %v6920_v63 = vmax.f32 %v6824_v12, 0.0  ;;  %v6370_v22 = vpop.f32.mrb[108].mxu0  ;;  %v14912_v28 = vld [vmem:[#allocation71_spill] sm:$0xff]  ;;  %v14913_v12 = vld [vmem:[#allocation72_spill] sm:$0xff] }
 0x507   : > { %v10900_v62 = vadd.f32 %v10899_v18, %v6370_v22  ;;  %v6372_v42 = vpop.f32.mrb[109].mxu0  ;;  %v10915_v11 = vadd.f32 %v14912_v28, %v13648_v44  ;;  %v10917_v8 = vadd.f32 %v14913_v12, %v13650_v59 }
 0x508   : > { %v6988_v21 = vmax.f32 %v6916_v16, %v6920_v63  ;;  %v10902_v56 = vadd.f32 %v10901_v24, %v6372_v42  ;;  %v6374_v17 = vpop.f32.mrb[110].mxu0  ;;  %v10919_v24 = vadd.f32 %v14914_v15, %v13648_v44  ;;  %v14915_v63 = vld [vmem:[#allocation74_spill] sm:$0xff] }
 0x509   : > { %v10904_v47 = vadd.f32 %v10903_v41, %v6374_v17  ;;  %v6376_v25 = vpop.f32.mrb[111].mxu0  ;;  %v10921_v22 = vadd.f32 %v14915_v63, %v13650_v59 }
 0x50a   : > { %v14000_v46 = vpack.c.bf16 %v6988_v21, %v6987_v39  ;;  %v6825_v55 = vmax.f32 %v10900_v62, %v10902_v56  ;;  %v10906_v3 = vadd.f32 %v10905_v7, %v6376_v25  ;;  %v14916_v56 = vld [vmem:[#allocation75_spill] sm:$0xff] }
 0x50b   : > { %v10923_v17 = vadd.f32 %v14916_v56, %v13648_v44  ;;  %v14925_v56 = vld [vmem:[#allocation84_spill] sm:$0xff] }
 0x50c   : > { %v6921_v57 = vmax.f32 %v6825_v55, 0.0  ;;  %v6826_v51 = vmax.f32 %v10904_v47, %v10906_v3  ;;  %10439 = vmatprep.mubr.bf16.mxu1 %v14000_v46  ;;  %v14917_v47 = vld [vmem:[#allocation76_spill] sm:$0xff]  ;;  %v14918_v3 = vld [vmem:[#allocation77_spill] sm:$0xff] }
 0x50d   : > { %v10925_v25 = vadd.f32 %v14917_v47, %v13650_v59 }
 0x50e   : > { %v6989_v30 = vmax.f32 %v6917_v20, %v6921_v57  ;;  %v6922_v61 = vmax.f32 %v6826_v51, 0.0  ;;  %v6380_v5 = vpop.f32.mrb[112].mxu0  ;;  %v10927_v20 = vadd.f32 %v14918_v3, %v13648_v44 }
 0x50f   : > { %v10908_v53 = vadd.f32 %v10907_v27, %v6380_v5  ;;  %v6382_v9 = vpop.f32.mrb[113].mxu0  ;;  %v10929_v27 = vadd.f32 %v14919_v2, %v13650_v59 }
 0x510   : > { %v6990_v34 = vmax.f32 %v6918_v23, %v6922_v61  ;;  %v10910_v54 = vadd.f32 %v10909_v31, %v6382_v9  ;;  %v6384_v33 = vpop.f32.mrb[114].mxu0  ;;  %v14920_v9 = vld [vmem:[#allocation79_spill] sm:$0xff] }
 0x511   : > { %v10912_v60 = vadd.f32 %v10911_v32, %v6384_v33  ;;  %v6386_v49 = vpop.f32.mrb[115].mxu0  ;;  %v10931_v19 = vadd.f32 %v14920_v9, %v13648_v44 }
 0x512   : > { %v14011_v36 = vpack.c.bf16 %v6990_v34, %v6989_v30  ;;  %v6827_v6 = vmax.f32 %v10908_v53, %v10910_v54  ;;  %v10914_v58 = vadd.f32 %v10913_v38, %v6386_v49  ;;  %v14921_v38 = vld [vmem:[#allocation80_spill] sm:$0xff] }
 0x513   : > { %v10933_v34 = vadd.f32 %v14921_v38, %v13650_v59 }
 0x514   : > { %v6828_v40 = vmax.f32 %v10912_v60, %v10914_v58  ;;  %10440 = vmatmul.mubr.bf16.gmra.mrb[216].mxu1 %v14011_v36  ;;  %v6923_v10 = vmax.f32 %v6827_v6, 0.0  ;;  %v14922_v58 = vld [vmem:[#allocation81_spill] sm:$0xff] }
 0x515   : > { %v10935_v28 = vadd.f32 %v14922_v58, %v13648_v44  ;;  %v14931_v58 = vld [vmem:[#allocation90_spill] sm:$0xff] }
 0x516   : > { %v6390_v18 = vpop.f32.mrb[116].mxu0  ;;  %v6924_v54 = vmax.f32 %v6828_v40, 0.0 }
 0x517   : > { %v10916_v16 = vadd.f32 %v10915_v11, %v6390_v18  ;;  %v6392_v39 = vpop.f32.mrb[117].mxu0 }
 0x518   : > { %v10918_v0 = vadd.f32 %v10917_v8, %v6392_v39  ;;  %v6394_v41 = vpop.f32.mrb[118].mxu0  ;;  %v14923_v8 = vld [vmem:[#allocation82_spill] sm:$0xff] }
 0x519   : > { %v10920_v62 = vadd.f32 %v10919_v24, %v6394_v41  ;;  %v6396_v42 = vpop.f32.mrb[119].mxu0  ;;  %v10937_v6 = vadd.f32 %v14923_v8, %v13650_v59 }
 0x51a   : > { %v6829_v26 = vmax.f32 %v10916_v16, %v10918_v0  ;;  %v10922_v7 = vadd.f32 %v10921_v22, %v6396_v42  ;;  %v14924_v42 = vld [vmem:[#allocation83_spill] sm:$0xff] }
 0x51c   : > { %v6830_v21 = vmax.f32 %v10920_v62, %v10922_v7  ;;  %v6925_v0 = vmax.f32 %v6829_v26, 0.0  ;;  %v10939_v7 = vadd.f32 %v14924_v42, %v13648_v44  ;;  %v14927_v26 = vld [vmem:[#allocation86_spill] sm:$0xff] }
 0x51e   : > { %v6400_v55 = vpop.f32.mrb[120].mxu0  ;;  %v6926_v47 = vmax.f32 %v6830_v21, 0.0 }
 0x51f   : > { %v10924_v57 = vadd.f32 %v10923_v17, %v6400_v55  ;;  %v6402_v51 = vpop.f32.mrb[121].mxu0  ;;  %v10941_v17 = vadd.f32 %v14925_v56, %v13650_v59  ;;  %v14935_v56 = vld [vmem:[#allocation94_spill] sm:$0xff] }
 0x520   : > { %v10926_v52 = vadd.f32 %v10925_v25, %v6402_v51  ;;  %v6404_v31 = vpop.f32.mrb[122].mxu0 }
 0x521   : > { %v10928_v23 = vadd.f32 %v10927_v20, %v6404_v31  ;;  %v6406_v30 = vpop.f32.mrb[123].mxu0  ;;  %v14926_v20 = vld [vmem:[#allocation85_spill] sm:$0xff] }
 0x522   : > { %v6831_v61 = vmax.f32 %v10924_v57, %v10926_v52  ;;  %v10930_v5 = vadd.f32 %v10929_v27, %v6406_v30  ;;  %v10943_v57 = vadd.f32 %v14926_v20, %v13648_v44  ;;  %v10945_v27 = vadd.f32 %v14927_v26, %v13650_v59 }
 0x524   : > { %v6927_v32 = vmax.f32 %v6831_v61, 0.0  ;;  %v6832_v53 = vmax.f32 %v10928_v23, %v10930_v5 }
 0x526   : > { %v6991_v33 = vmax.f32 %v6923_v10, %v6927_v32  ;;  %v6928_v60 = vmax.f32 %v6832_v53, 0.0  ;;  %v6410_v49 = vpop.f32.mrb[124].mxu0  ;;  %v14928_v53 = vld [vmem:[#allocation87_spill] sm:$0xff] }
 0x527   : > { %v10932_v11 = vadd.f32 %v10931_v19, %v6410_v49  ;;  %v6412_v12 = vpop.f32.mrb[125].mxu0  ;;  %v10947_v9 = vadd.f32 %v14928_v53, %v13648_v44  ;;  %v14929_v19 = vld [vmem:[#allocation88_spill] sm:$0xff] }
 0x528   : > { %v6992_v18 = vmax.f32 %v6924_v54, %v6928_v60  ;;  %v10934_v15 = vadd.f32 %v10933_v34, %v6412_v12  ;;  %v6414_v24 = vpop.f32.mrb[126].mxu0  ;;  %v10949_v38 = vadd.f32 %v14929_v19, %v13650_v59  ;;  %v14930_v54 = vld [vmem:[#allocation89_spill] sm:$0xff] }
 0x529   : > { %v10936_v16 = vadd.f32 %v10935_v28, %v6414_v24  ;;  %v6416_v39 = vpop.f32.mrb[127].mxu0  ;;  %v10953_v28 = vadd.f32 %v14931_v58, %v13650_v59 }
 0x52a   : > { %v14038_v63 = vpack.c.bf16 %v6992_v18, %v6991_v33  ;;  %v6833_v22 = vmax.f32 %v10932_v11, %v10934_v15  ;;  %v10938_v40 = vadd.f32 %v10937_v6, %v6416_v39  ;;  %v10951_v33 = vadd.f32 %v14930_v54, %v13648_v44  ;;  %v14939_v54 = vld [vmem:[#allocation98_spill] sm:$0xff] }
 0x52c   : > { %v6929_v41 = vmax.f32 %v6833_v22, 0.0  ;;  %v6834_v62 = vmax.f32 %v10936_v16, %v10938_v40  ;;  %10443 = vmatprep.mubr.bf16.mxu1 %v14038_v63  ;;  %v14932_v16 = vld [vmem:[#allocation91_spill] sm:$0xff]  ;;  %v14933_v22 = vld [vmem:[#allocation92_spill] sm:$0xff] }
 0x52d   : > { %v10955_v39 = vadd.f32 %v14932_v16, %v13648_v44  ;;  %v10957_v40 = vadd.f32 %v14933_v22, %v13650_v59 }
 0x52e   : > { %v6993_v25 = vmax.f32 %v6925_v0, %v6929_v41  ;;  %v6930_v55 = vmax.f32 %v6834_v62, 0.0  ;;  %v6420_v3 = vpop.f32.mrb[128].mxu0  ;;  %v12199_v41 = vld [vmem:[%s14688_s3 + $0x90] sm:$0xff]  }
 0x52f   : > { %v10940_v51 = vadd.f32 %v10939_v7, %v6420_v3  ;;  %v6422_v2 = vpop.f32.mrb[129].mxu0  ;;  %v14934_v62 = vld [vmem:[#allocation93_spill] sm:$0xff] }
 0x530   : > { %v6994_v52 = vmax.f32 %v6926_v47, %v6930_v55  ;;  %v10942_v31 = vadd.f32 %v10941_v17, %v6422_v2  ;;  %v6424_v23 = vpop.f32.mrb[130].mxu0  ;;  %v10959_v42 = vadd.f32 %v14934_v62, %v13648_v44  ;;  %v10961_v17 = vadd.f32 %v14935_v56, %v13650_v59 }
 0x531   : > { %v10944_v30 = vadd.f32 %v10943_v57, %v6424_v23  ;;  %v6426_v61 = vpop.f32.mrb[131].mxu0  ;;  %v12200_v57 = vld [vmem:[%s14688_s3 + $0x98] sm:$0xff]  }
 0x532   : > { %v14049_v5 = vpack.c.bf16 %v6994_v52, %v6993_v25  ;;  %v6835_v10 = vmax.f32 %v10940_v51, %v10942_v31  ;;  %v10946_v21 = vadd.f32 %v10945_v27, %v6426_v61  ;;  %v14936_v27 = vld [vmem:[#allocation95_spill] sm:$0xff]  ;;  %v14937_v31 = vld [vmem:[#allocation96_spill] sm:$0xff] }
 0x533   : > { %v10963_v52 = vadd.f32 %v14936_v27, %v13648_v44  ;;  %v10965_v23 = vadd.f32 %v14937_v31, %v13650_v59  ;;  %v12204_v27 = vld [vmem:[%s14688_s3 + $0xb8] sm:$0xff]   ;;  %v14944_v31 = vld [vmem:[#allocation103_spill] sm:$0xff] }
 0x534   : > { %v6836_v32 = vmax.f32 %v10944_v30, %v10946_v21  ;;  %10444 = vmatmul.mubr.bf16.gmra.mrb[220].mxu1 %v14049_v5  ;;  %v6931_v51 = vmax.f32 %v6835_v10, 0.0  ;;  %v12201_v10 = vld [vmem:[%s14688_s3 + $0xa0] sm:$0xff]  }
 0x535   : > { %10463 = vmatprep.mubr.bf16.mxu1 %v13740_v37  ;;  %v12198_v37 = vld [vmem:[%s14688_s3 + $0x88] sm:$0xff]  }
 0x536   : > { %v6430_v34 = vpop.f32.mrb[132].mxu0  ;;  %v6932_v30 = vmax.f32 %v6836_v32, 0.0 }
 0x537   : > { %v10948_v60 = vadd.f32 %v10947_v9, %v6430_v34  ;;  %v6432_v49 = vpop.f32.mrb[133].mxu0  ;;  %v14938_v9 = vld [vmem:[#allocation97_spill] sm:$0xff] }
 0x538   : > { %v10950_v11 = vadd.f32 %v10949_v38, %v6432_v49  ;;  %v6434_v12 = vpop.f32.mrb[134].mxu0  ;;  %v10967_v19 = vadd.f32 %v14938_v9, %v13648_v44 }
 0x539   : > { %v14061_v8 = vadd.f32 %v10951_v33, %v6434_v12  ;;  %v6436_v6 = vpop.f32.mrb[135].mxu0  ;;  %v10969_v33 = vadd.f32 %v14939_v54, %v13650_v59 }
 0x53a   : > { %v6837_v18 = vmax.f32 %v10948_v60, %v10950_v11  ;;  %v10954_v15 = vadd.f32 %v10953_v28, %v6436_v6  ;;  %v12202_v6 = vld [vmem:[%s14688_s3 + $0xa8] sm:$0xff]  }
 0x53c   : > { %v6838_v24 = vmax.f32 %v14061_v8, %v10954_v15  ;;  %10464 = vmatmul.mubr.bf16.vlgmr.msra.gmra.mrb[192].mxu1 %v13754_v43  ;;  %v6933_v15 = vmax.f32 %v6837_v18, 0.0  ;;  %v12203_v18 = vld [vmem:[%s14688_s3 + $0xb0] sm:$0xff]  }
 0x53d   : > { %10467 = vmatprep.mubr.bf16.mxu1 %v13793_v35  ;;  %10496 = vmatpush3.bf16.msra.mxu1 %v13901_v50 }
 0x53e   : > { %v6440_v0 = vpop.f32.mrb[136].mxu0  ;;  %10497 = vmatprep.subr.bf16.mxu1 %v12198_v37 }
 0x53f   : > { %v10956_v43 = vadd.f32 %v10955_v39, %v6440_v0  ;;  %v6442_v7 = vpop.f32.mrb[137].mxu0  ;;  %v14940_v39 = vld [vmem:[#allocation99_spill] sm:$0xff] }
 0x540   : > { %v10958_v47 = vadd.f32 %v10957_v40, %v6442_v7  ;;  %v6444_v25 = vpop.f32.mrb[138].mxu0  ;;  %v10971_v22 = vadd.f32 %v14940_v39, %v13648_v44  ;;  %v14941_v40 = vld [vmem:[#allocation100_spill] sm:$0xff]  ;;  %v14942_v7 = vld [vmem:[#allocation101_spill] sm:$0xff] }
 0x541   : > { %v10960_v50 = vadd.f32 %v10959_v42, %v6444_v25  ;;  %v6446_v55 = vpop.f32.mrb[139].mxu0  ;;  %10498 = vmatpush3.bf16.msra.mxu1 %v12198_v37  ;;  %v10973_v0 = vadd.f32 %v14941_v40, %v13650_v59  ;;  %v10975_v56 = vadd.f32 %v14942_v7, %v13648_v44  ;;  %v14943_v25 = vld [vmem:[#allocation102_spill] sm:$0xff]  ;;  %v14950_v39 = vld [vmem:[#allocation109_spill] sm:$0xff] }
 0x542   : > { %v6839_v3 = vmax.f32 %v10956_v43, %v10958_v47  ;;  %v10962_v20 = vadd.f32 %v10961_v17, %v6446_v55  ;;  %10499 = vmatprep.subr.bf16.mxu1 %v12199_v41 }
 0x544   : > { %v6935_v2 = vmax.f32 %v6839_v3, 0.0  ;;  %v6840_v26 = vmax.f32 %v10960_v50, %v10962_v20  ;;  %10468 = vmatmul.mubr.bf16.gmra.mrb[196].mxu1 %v13810_v4  ;;  %v10977_v50 = vadd.f32 %v14943_v25, %v13650_v59 }
 0x545   : > { %10471 = vmatprep.mubr.bf16.mxu1 %v13855_v48  ;;  %10500 = vmatpush3.bf16.msra.mxu1 %v12199_v41  ;;  %v6934_v41 = vmax.f32 %v6838_v24, 0.0 }
 0x546   : > { %v6995_v61 = vmax.f32 %v6931_v51, %v6935_v2  ;;  %v6936_v21 = vmax.f32 %v6840_v26, 0.0  ;;  %v6450_v53 = vpop.f32.mrb[140].mxu0  ;;  %10501 = vmatprep.subr.bf16.mxu1 %v12200_v57 }
 0x547   : > { %v10964_v38 = vadd.f32 %v10963_v52, %v6450_v53  ;;  %v6452_v34 = vpop.f32.mrb[141].mxu0  ;;  %v14129_v53 = vld [vmem:[%s14688_s3 + $0xc0] sm:$0xff]  }
 0x548   : > { %v6996_v60 = vmax.f32 %v6932_v30, %v6936_v21  ;;  %v10966_v49 = vadd.f32 %v10965_v23, %v6452_v34  ;;  %v6454_v58 = vpop.f32.mrb[142].mxu0  ;;  %v10979_v23 = vadd.f32 %v14944_v31, %v13648_v44  ;;  %v14945_v30 = vld [vmem:[#allocation104_spill] sm:$0xff]  ;;  %v14947_v34 = vld [vmem:[#allocation106_spill] sm:$0xff] }
 0x549   : > { %v10968_v32 = vadd.f32 %v10967_v19, %v6454_v58  ;;  %v6456_v28 = vpop.f32.mrb[143].mxu0  ;;  %10502 = vmatpush3.bf16.msra.mxu1 %v12200_v57  ;;  %v10985_v54 = vadd.f32 %v14947_v34, %v13650_v59 }
 0x54a   : > { %v14097_v11 = vpack.c.bf16 %v6996_v60, %v6995_v61  ;;  %v6841_v12 = vmax.f32 %v10964_v38, %v10966_v49  ;;  %v10970_v8 = vadd.f32 %v10969_v33, %v6456_v28  ;;  %10503 = vmatprep.subr.bf16.mxu1 %v12201_v10  ;;  %v10981_v61 = vadd.f32 %v14945_v30, %v13650_v59 }
 0x54c   : > { %v6937_v37 = vmax.f32 %v6841_v12, 0.0  ;;  %v6842_v16 = vmax.f32 %v10968_v32, %v10970_v8  ;;  %10472 = vmatmul.mubr.bf16.gmra.mrb[200].mxu1 %v13872_v1  ;;  %v14948_v8 = vld [vmem:[#allocation107_spill] sm:$0xff] }
 0x54d   : > { %10475 = vmatprep.mubr.bf16.mxu1 %v13920_v29  ;;  %10504 = vmatpush3.bf16.msra.mxu1 %v12201_v10  ;;  %v14946_v10 = vld [vmem:[#allocation105_spill] sm:$0xff] }
 0x54e   : > { %v6997_v62 = vmax.f32 %v6933_v15, %v6937_v37  ;;  %v6938_v42 = vmax.f32 %v6842_v16, 0.0  ;;  %v6460_v43 = vpop.f32.mrb[144].mxu0  ;;  %10505 = vmatprep.subr.bf16.mxu1 %v12202_v6  ;;  %v10983_v9 = vadd.f32 %v14946_v10, %v13648_v44  ;;  %v14949_v15 = vld [vmem:[#allocation108_spill] sm:$0xff] }
 0x54f   : > { %v10972_v17 = vadd.f32 %v10971_v22, %v6460_v43  ;;  %v6462_v47 = vpop.f32.mrb[145].mxu0  ;;  %v10989_v37 = vadd.f32 %v14949_v15, %v13650_v59  ;;  %v10991_v22 = vadd.f32 %v14950_v39, %v13648_v44  ;;  %v14957_v15 = vld [vmem:[#allocation116_spill] sm:$0xff] }
 0x550   : > { %v6998_v55 = vmax.f32 %v6934_v41, %v6938_v42  ;;  %v10974_v3 = vadd.f32 %v10973_v0, %v6462_v47  ;;  %v6464_v20 = vpop.f32.mrb[146].mxu0  ;;  %v14951_v41 = vld [vmem:[#allocation110_spill] sm:$0xff] }
 0x551   : > { %v10976_v24 = vadd.f32 %v10975_v56, %v6464_v20  ;;  %v6466_v57 = vpop.f32.mrb[147].mxu0  ;;  %10506 = vmatpush3.bf16.msra.mxu1 %v12202_v6  ;;  %v10987_v6 = vadd.f32 %v14948_v8, %v13648_v44  ;;  %v14953_v20 = vld [vmem:[#allocation112_spill] sm:$0xff]  ;;  %v14956_v8 = vld [vmem:[#allocation115_spill] sm:$0xff] }
 0x552   : > { %v14115_v51 = vpack.c.bf16 %v6998_v55, %v6997_v62  ;;  %v6843_v2 = vmax.f32 %v10972_v17, %v10974_v3  ;;  %v10978_v26 = vadd.f32 %v10977_v50, %v6466_v57  ;;  %10507 = vmatprep.subr.bf16.mxu1 %v12203_v18  ;;  %v10993_v62 = vadd.f32 %v14951_v41, %v13650_v59  ;;  %v14952_v55 = vld [vmem:[#allocation111_spill] sm:$0xff] }
 0x553   : > { %v10995_v3 = vadd.f32 %v14952_v55, %v13648_v44 }
 0x554   : > { %v6844_v52 = vmax.f32 %v10976_v24, %v10978_v26  ;;  %10476 = vmatmul.mubr.bf16.gmra.mrb[204].mxu1 %v13934_v14  ;;  %v6939_v47 = vmax.f32 %v6843_v2, 0.0  ;;  %v10997_v24 = vadd.f32 %v14953_v20, %v13650_v59 }
 0x555   : > { %10479 = vmatprep.mubr.bf16.mxu1 %v13962_v13  ;;  %10508 = vmatpush3.bf16.msra.mxu1 %v12203_v18 }
 0x556   : > { %v6470_v21 = vpop.f32.mrb[148].mxu0  ;;  %10509 = vmatprep.subr.bf16.mxu1 %v12204_v27  ;;  %v6940_v57 = vmax.f32 %v6844_v52, 0.0 }
 0x557   : > { %v10980_v19 = vadd.f32 %v10979_v23, %v6470_v21  ;;  %v6472_v38 = vpop.f32.mrb[149].mxu0  ;;  %v14954_v23 = vld [vmem:[#allocation113_spill] sm:$0xff]  ;;  %v14955_v21 = vld [vmem:[#allocation114_spill] sm:$0xff] }
 0x558   : > { %v10982_v33 = vadd.f32 %v10981_v61, %v6472_v38  ;;  %v6474_v60 = vpop.f32.mrb[150].mxu0  ;;  %v10999_v30 = vadd.f32 %v14954_v23, %v13648_v44  ;;  %v11001_v10 = vadd.f32 %v14955_v21, %v13650_v59 }
 0x559   : > { %v10984_v49 = vadd.f32 %v10983_v9, %v6474_v60  ;;  %v6476_v58 = vpop.f32.mrb[151].mxu0  ;;  %10510 = vmatpush3.bf16.msra.mxu1 %v12204_v27 }
 0x55a   : > { %v6845_v32 = vmax.f32 %v10980_v19, %v10982_v33  ;;  %v10986_v28 = vadd.f32 %v10985_v54, %v6476_v58  ;;  %10543 = vmatprep.subr.bf16.mxu1 %v14129_v53 }
 0x55c   : > { %v6846_v12 = vmax.f32 %v10984_v49, %v10986_v28  ;;  %10480 = vmatmul.mubr.bf16.gmra.mrb[208].mxu1 %v13973_v45  ;;  %v6941_v52 = vmax.f32 %v6845_v32, 0.0 }
 0x55d   : > { %10483 = vmatprep.mubr.bf16.mxu1 %v14000_v46 }
 0x55e   : > { %v6480_v16 = vpop.f32.mrb[152].mxu0 }
 0x55f   : > { %v10988_v40 = vadd.f32 %v10987_v6, %v6480_v16  ;;  %v6482_v0 = vpop.f32.mrb[153].mxu0  ;;  %v11003_v6 = vadd.f32 %v14956_v8, %v13648_v44  ;;  %v6942_v16 = vmax.f32 %v6846_v12, 0.0  ;;  %v12207_v8 = vld [vmem:[%s14688_s3 + $0xd0] sm:$0xff]  }
 0x560   : > { %v10990_v42 = vadd.f32 %v10989_v37, %v6482_v0  ;;  %v6484_v43 = vpop.f32.mrb[154].mxu0  ;;  %v11005_v37 = vadd.f32 %v14957_v15, %v13650_v59  ;;  %v14958_v0 = vld [vmem:[#allocation117_spill] sm:$0xff] }
 0x561   : > { %v10992_v18 = vadd.f32 %v10991_v22, %v6484_v43  ;;  %v6486_v7 = vpop.f32.mrb[155].mxu0  ;;  %v11007_v41 = vadd.f32 %v14958_v0, %v13648_v44 }
 0x562   : > { %v6847_v56 = vmax.f32 %v10988_v40, %v10990_v42  ;;  %v10994_v17 = vadd.f32 %v10993_v62, %v6486_v7  ;;  %v14959_v42 = vld [vmem:[#allocation118_spill] sm:$0xff] }
 0x563   : > { %v11009_v43 = vadd.f32 %v14959_v42, %v13650_v59 }
 0x564   : > { %v6943_v25 = vmax.f32 %v6847_v56, 0.0  ;;  %v6848_v50 = vmax.f32 %v10992_v18, %v10994_v17  ;;  %10484 = vmatmul.mubr.bf16.gmra.mrb[212].mxu1 %v14011_v36 }
 0x565   : > { %10487 = vmatprep.mubr.bf16.mxu1 %v14038_v63 }
 0x566   : > { %v6999_v26 = vmax.f32 %v6939_v47, %v6943_v25  ;;  %v6944_v27 = vmax.f32 %v6848_v50, 0.0  ;;  %v6490_v31 = vpop.f32.mrb[156].mxu0 }
 0x567   : > { %v10996_v2 = vadd.f32 %v10995_v3, %v6490_v31  ;;  %v6492_v61 = vpop.f32.mrb[157].mxu0  ;;  %v14960_v3 = vld [vmem:[#allocation119_spill] sm:$0xff] }
 0x568   : > { %v7000_v9 = vmax.f32 %v6940_v57, %v6944_v27  ;;  %v10998_v19 = vadd.f32 %v10997_v24, %v6492_v61  ;;  %v6494_v38 = vpop.f32.mrb[158].mxu0  ;;  %v11011_v20 = vadd.f32 %v14960_v3, %v13648_v44  ;;  %v14961_v24 = vld [vmem:[#allocation120_spill] sm:$0xff]  ;;  %v14962_v27 = vld [vmem:[#allocation121_spill] sm:$0xff] }
 0x569   : > { %v11000_v34 = vadd.f32 %v10999_v30, %v6494_v38  ;;  %v6496_v54 = vpop.f32.mrb[159].mxu0  ;;  %v11013_v57 = vadd.f32 %v14961_v24, %v13650_v59  ;;  %v11015_v31 = vadd.f32 %v14962_v27, %v13648_v44 }
 0x56a   : > { %v6849_v33 = vmax.f32 %v10996_v2, %v10998_v19  ;;  %v11002_v60 = vadd.f32 %v11001_v10, %v6496_v54  ;;  %v14156_v49 = vpack.c.bf16 %v7000_v9, %v6999_v26  ;;  %v14963_v2 = vld [vmem:[#allocation122_spill] sm:$0xff] }
 0x56b   : > { %v11017_v61 = vadd.f32 %v14963_v2, %v13650_v59 }
 0x56c   : > { %v6945_v58 = vmax.f32 %v6849_v33, 0.0  ;;  %v6850_v28 = vmax.f32 %v11000_v34, %v11002_v60  ;;  %10488 = vmatmul.mubr.bf16.gmra.mrb[216].mxu1 %v14049_v5  ;;  %v14964_v33 = vld [vmem:[#allocation123_spill] sm:$0xff] }
 0x56d   : > { %10491 = vmatprep.mubr.bf16.mxu1 %v14097_v11  ;;  %v11019_v60 = vadd.f32 %v14964_v33, %v13648_v44 }
 0x56e   : > { %v7001_v39 = vmax.f32 %v6941_v52, %v6945_v58  ;;  %v6946_v22 = vmax.f32 %v6850_v28, 0.0  ;;  %v6500_v40 = vpop.f32.mrb[160].mxu0  ;;  %v14965_v52 = vld [vmem:[#allocation124_spill] sm:$0xff] }
 0x56f   : > { %v11004_v32 = vadd.f32 %v11003_v6, %v6500_v40  ;;  %v6502_v62 = vpop.f32.mrb[161].mxu0  ;;  %v11021_v58 = vadd.f32 %v14965_v52, %v13650_v59  ;;  %v14966_v6 = vld [vmem:[#allocation125_spill] sm:$0xff] }
 0x570   : > { %v7002_v18 = vmax.f32 %v6942_v16, %v6946_v22  ;;  %v11006_v7 = vadd.f32 %v11005_v37, %v6502_v62  ;;  %v6504_v56 = vpop.f32.mrb[162].mxu0  ;;  %v11023_v15 = vadd.f32 %v14966_v6, %v13648_v44  ;;  %v14967_v16 = vld [vmem:[#allocation126_spill] sm:$0xff] }
 0x571   : > { %v11008_v17 = vadd.f32 %v11007_v41, %v6504_v56  ;;  %v6506_v47 = vpop.f32.mrb[163].mxu0  ;;  %v12208_v62 = vld [vmem:[%s14688_s3 + $0xd8] sm:$0xff]  }
 0x572   : > { %v6851_v25 = vmax.f32 %v11004_v32, %v11006_v7  ;;  %v11010_v50 = vadd.f32 %v11009_v43, %v6506_v47  ;;  %v14168_v55 = vpack.c.bf16 %v7002_v18, %v7001_v39  ;;  %v11025_v39 = vadd.f32 %v14967_v16, %v13650_v59  ;;  %v14968_v7 = vld [vmem:[#allocation127_spill] sm:$0xff] }
 0x573   : > { %v11027_v56 = vadd.f32 %v14968_v7, %v13648_v44 }
 0x574   : > { %v6852_v12 = vmax.f32 %v11008_v17, %v11010_v50  ;;  %10492 = vmatmul.mubr.bf16.gmra.mrb[220].mxu1 %v14115_v51  ;;  %v6947_v42 = vmax.f32 %v6851_v25, 0.0  ;;  %v14969_v17 = vld [vmem:[#allocation128_spill] sm:$0xff]  ;;  %v12209_v25 = vld [vmem:[%s14688_s3 + $0xe0] sm:$0xff]  }
 0x575   : > { %10511 = vmatprep.mubr.bf16.mxu1 %v13793_v35  ;;  %v12206_v35 = vld [vmem:[%s14688_s3 + $0xc8] sm:$0xff]   ;;  %v11029_v47 = vadd.f32 %v14969_v17, %v13650_v59 }
 0x576   : > { %v6510_v26 = vpop.f32.mrb[164].mxu0  ;;  %v6948_v50 = vmax.f32 %v6852_v12, 0.0 }
 0x577   : > { %v11012_v23 = vadd.f32 %v11011_v20, %v6510_v26  ;;  %v6512_v30 = vpop.f32.mrb[165].mxu0 }
 0x578   : > { %v11014_v21 = vadd.f32 %v11013_v57, %v6512_v30  ;;  %v6514_v10 = vpop.f32.mrb[166].mxu0  ;;  %v14970_v57 = vld [vmem:[#allocation129_spill] sm:$0xff] }
 0x579   : > { %v14180_v9 = vadd.f32 %v11015_v31, %v6514_v10  ;;  %v6516_v19 = vpop.f32.mrb[167].mxu0  ;;  %v11031_v26 = vadd.f32 %v14970_v57, %v13648_v44  ;;  %v14248_v57 = vld [vmem:[%s14688_s3 + $0x100] sm:$0xff]  }
 0x57a   : > { %v6853_v38 = vmax.f32 %v11012_v23, %v11014_v21  ;;  %v11018_v34 = vadd.f32 %v11017_v61, %v6516_v19  ;;  %v14971_v23 = vld [vmem:[#allocation130_spill] sm:$0xff] }
 0x57b   : > { %v11033_v30 = vadd.f32 %v14971_v23, %v13650_v59 }
 0x57c   : > { %v6854_v54 = vmax.f32 %v14180_v9, %v11018_v34  ;;  %10512 = vmatmul.mubr.bf16.vlgmr.msra.gmra.mrb[192].mxu1 %v13810_v4  ;;  %v12210_v34 = vld [vmem:[%s14688_s3 + $0xe8] sm:$0xff]   ;;  %v6949_v33 = vmax.f32 %v6853_v38, 0.0  ;;  %v12211_v38 = vld [vmem:[%s14688_s3 + $0xf0] sm:$0xff]  }
 0x57d   : > { %10515 = vmatprep.mubr.bf16.mxu1 %v13855_v48  ;;  %10544 = vmatpush3.bf16.msra.mxu1 %v14129_v53 }
 0x57e   : > { %v6520_v28 = vpop.f32.mrb[168].mxu0  ;;  %10545 = vmatprep.subr.bf16.mxu1 %v12206_v35 }
 0x57f   : > { %v11020_v4 = vadd.f32 %v11019_v60, %v6520_v28  ;;  %v6522_v37 = vpop.f32.mrb[169].mxu0 }
 0x580   : > { %v11022_v22 = vadd.f32 %v11021_v58, %v6522_v37  ;;  %v6524_v40 = vpop.f32.mrb[170].mxu0  ;;  %v14972_v58 = vld [vmem:[#allocation131_spill] sm:$0xff] }
 0x581   : > { %v11024_v53 = vadd.f32 %v11023_v15, %v6524_v40  ;;  %v6526_v0 = vpop.f32.mrb[171].mxu0  ;;  %10546 = vmatpush3.bf16.msra.mxu1 %v12206_v35  ;;  %v11035_v28 = vadd.f32 %v14972_v58, %v13648_v44  ;;  %v6950_v15 = vmax.f32 %v6854_v54, 0.0 }
 0x582   : > { %v6855_v41 = vmax.f32 %v11020_v4, %v11022_v22  ;;  %v11026_v32 = vadd.f32 %v11025_v39, %v6526_v0  ;;  %10547 = vmatprep.subr.bf16.mxu1 %v12207_v8  ;;  %v14974_v39 = vld [vmem:[#allocation133_spill] sm:$0xff]  ;;  %v14975_v0 = vld [vmem:[#allocation134_spill] sm:$0xff] }
 0x583   : > { %v11039_v22 = vadd.f32 %v14974_v39, %v13648_v44 }
 0x584   : > { %v6951_v43 = vmax.f32 %v6855_v41, 0.0  ;;  %v6856_v18 = vmax.f32 %v11024_v53, %v11026_v32  ;;  %10516 = vmatmul.mubr.bf16.gmra.mrb[196].mxu1 %v13872_v1  ;;  %v11041_v41 = vadd.f32 %v14975_v0, %v13650_v59 }
 0x585   : > { %10519 = vmatprep.mubr.bf16.mxu1 %v13920_v29  ;;  %10548 = vmatpush3.bf16.msra.mxu1 %v12207_v8  ;;  %v14973_v8 = vld [vmem:[#allocation132_spill] sm:$0xff] }
 0x586   : > { %v7003_v3 = vmax.f32 %v6947_v42, %v6951_v43  ;;  %v6952_v20 = vmax.f32 %v6856_v18, 0.0  ;;  %v6530_v24 = vpop.f32.mrb[172].mxu0  ;;  %10549 = vmatprep.subr.bf16.mxu1 %v12208_v62  ;;  %v11037_v6 = vadd.f32 %v14973_v8, %v13650_v59  ;;  %v14982_v8 = vld [vmem:[#allocation141_spill] sm:$0xff] }
 0x587   : > { %v11028_v27 = vadd.f32 %v11027_v56, %v6530_v24  ;;  %v6532_v31 = vpop.f32.mrb[173].mxu0  ;;  %v12212_v56 = vld [vmem:[%s14688_s3 + $0xf8] sm:$0xff]  }
 0x588   : > { %v7004_v2 = vmax.f32 %v6948_v50, %v6952_v20  ;;  %v11030_v61 = vadd.f32 %v11029_v47, %v6532_v31  ;;  %v6534_v21 = vpop.f32.mrb[174].mxu0  ;;  %v14976_v50 = vld [vmem:[#allocation135_spill] sm:$0xff]  ;;  %v14977_v20 = vld [vmem:[#allocation136_spill] sm:$0xff] }
 0x589   : > { %v11032_v12 = vadd.f32 %v11031_v26, %v6534_v21  ;;  %v6536_v10 = vpop.f32.mrb[175].mxu0  ;;  %10550 = vmatpush3.bf16.msra.mxu1 %v12208_v62  ;;  %v11045_v24 = vadd.f32 %v14977_v20, %v13650_v59  ;;  %v14978_v26 = vld [vmem:[#allocation137_spill] sm:$0xff] }
 0x58a   : > { %v6857_v9 = vmax.f32 %v11028_v27, %v11030_v61  ;;  %v11034_v19 = vadd.f32 %v11033_v30, %v6536_v10  ;;  %10551 = vmatprep.subr.bf16.mxu1 %v12209_v25  ;;  %v14219_v35 = vpack.c.bf16 %v7004_v2, %v7003_v3  ;;  %v11043_v3 = vadd.f32 %v14976_v50, %v13648_v44  ;;  %v14979_v30 = vld [vmem:[#allocation138_spill] sm:$0xff] }
 0x58b   : > { %v11047_v27 = vadd.f32 %v14978_v26, %v13648_v44  ;;  %v11049_v2 = vadd.f32 %v14979_v30, %v13650_v59 }
 0x58c   : > { %v6953_v60 = vmax.f32 %v6857_v9, 0.0  ;;  %v6858_v52 = vmax.f32 %v11032_v12, %v11034_v19  ;;  %10520 = vmatmul.mubr.bf16.gmra.mrb[200].mxu1 %v13934_v14 }
 0x58d   : > { %10523 = vmatprep.mubr.bf16.mxu1 %v13962_v13  ;;  %10552 = vmatpush3.bf16.msra.mxu1 %v12209_v25 }
 0x58e   : > { %v7005_v4 = vmax.f32 %v6949_v33, %v6953_v60  ;;  %v6954_v37 = vmax.f32 %v6858_v52, 0.0  ;;  %v6540_v16 = vpop.f32.mrb[176].mxu0  ;;  %10553 = vmatprep.subr.bf16.mxu1 %v12210_v34  ;;  %v14980_v33 = vld [vmem:[#allocation139_spill] sm:$0xff]  ;;  %v14981_v52 = vld [vmem:[#allocation140_spill] sm:$0xff] }
 0x58f   : > { %v11036_v40 = vadd.f32 %v11035_v28, %v6540_v16  ;;  %v6542_v53 = vpop.f32.mrb[177].mxu0  ;;  %v11051_v60 = vadd.f32 %v14980_v33, %v13648_v44  ;;  %v11053_v58 = vadd.f32 %v14981_v52, %v13650_v59 }
 0x590   : > { %v7006_v32 = vmax.f32 %v6950_v15, %v6954_v37  ;;  %v11038_v62 = vadd.f32 %v11037_v6, %v6542_v53  ;;  %v6544_v42 = vpop.f32.mrb[178].mxu0  ;;  %v11055_v6 = vadd.f32 %v14982_v8, %v13648_v44  ;;  %v14983_v37 = vld [vmem:[#allocation142_spill] sm:$0xff]  ;;  %v12214_v8 = vld [vmem:[%s14688_s3 + $0x108] sm:$0xff]  }
 0x591   : > { %v11040_v54 = vadd.f32 %v11039_v22, %v6544_v42  ;;  %v6546_v43 = vpop.f32.mrb[179].mxu0  ;;  %10554 = vmatpush3.bf16.msra.mxu1 %v12210_v34  ;;  %v11057_v16 = vadd.f32 %v14983_v37, %v13650_v59  ;;  %v14984_v42 = vld [vmem:[#allocation143_spill] sm:$0xff] }
 0x592   : > { %v6859_v18 = vmax.f32 %v11036_v40, %v11038_v62  ;;  %v11042_v7 = vadd.f32 %v11041_v41, %v6546_v43  ;;  %10555 = vmatprep.subr.bf16.mxu1 %v12211_v38  ;;  %v14237_v17 = vpack.c.bf16 %v7006_v32, %v7005_v4  ;;  %v14985_v43 = vld [vmem:[#allocation144_spill] sm:$0xff] }
 0x594   : > { %v6860_v47 = vmax.f32 %v11040_v54, %v11042_v7  ;;  %10524 = vmatmul.mubr.bf16.gmra.mrb[204].mxu1 %v13973_v45  ;;  %v6955_v41 = vmax.f32 %v6859_v18, 0.0  ;;  %v11059_v54 = vadd.f32 %v14984_v42, %v13648_v44  ;;  %v11061_v7 = vadd.f32 %v14985_v43, %v13650_v59 }
 0x595   : > { %10527 = vmatprep.mubr.bf16.mxu1 %v14000_v46  ;;  %10556 = vmatpush3.bf16.msra.mxu1 %v12211_v38 }
 0x596   : > { %v6550_v25 = vpop.f32.mrb[180].mxu0  ;;  %10557 = vmatprep.subr.bf16.mxu1 %v12212_v56 }
 0x597   : > { %v11044_v31 = vadd.f32 %v11043_v3, %v6550_v25  ;;  %v6552_v23 = vpop.f32.mrb[181].mxu0 }
 0x598   : > { %v11046_v61 = vadd.f32 %v11045_v24, %v6552_v23  ;;  %v6554_v21 = vpop.f32.mrb[182].mxu0  ;;  %v14986_v24 = vld [vmem:[#allocation145_spill] sm:$0xff] }
 0x599   : > { %v11048_v12 = vadd.f32 %v11047_v27, %v6554_v21  ;;  %v6556_v10 = vpop.f32.mrb[183].mxu0  ;;  %10558 = vmatpush3.bf16.msra.mxu1 %v12212_v56  ;;  %v6956_v56 = vmax.f32 %v6860_v47, 0.0  ;;  %v11063_v25 = vadd.f32 %v14986_v24, %v13648_v44  ;;  %v14987_v27 = vld [vmem:[#allocation146_spill] sm:$0xff] }
 0x59a   : > { %v6861_v9 = vmax.f32 %v11044_v31, %v11046_v61  ;;  %v11050_v19 = vadd.f32 %v11049_v2, %v6556_v10  ;;  %10591 = vmatprep.subr.bf16.mxu1 %v14248_v57  ;;  %v11065_v31 = vadd.f32 %v14987_v27, %v13650_v59  ;;  %v12236_v27 = vld [vmem:[%s14690_s5 + $0x38] sm:$0xff]  }
 0x59c   : > { %v6862_v34 = vmax.f32 %v11048_v12, %v11050_v19  ;;  %10528 = vmatmul.mubr.bf16.gmra.mrb[208].mxu1 %v14011_v36  ;;  %v6957_v47 = vmax.f32 %v6861_v9, 0.0  ;;  %v12215_v9 = vld [vmem:[%s14688_s3 + $0x110] sm:$0xff]  }
 0x59d   : > { %10531 = vmatprep.mubr.bf16.mxu1 %v14038_v63 }
 0x59e   : > { %v6560_v28 = vpop.f32.mrb[184].mxu0  ;;  %v6958_v44 = vmax.f32 %v6862_v34, 0.0  ;;  %v12219_v34 = vld [vmem:[%s14688_s3 + $0x130] sm:$0xff]  }
 0x59f   : > { %v11052_v15 = vadd.f32 %v11051_v60, %v6560_v28  ;;  %v6562_v4 = vpop.f32.mrb[185].mxu0 }
 0x5a0   : > { %v11054_v38 = vadd.f32 %v11053_v58, %v6562_v4  ;;  %v6564_v39 = vpop.f32.mrb[186].mxu0 }
 0x5a1   : > { %v11056_v22 = vadd.f32 %v11055_v6, %v6564_v39  ;;  %v6566_v40 = vpop.f32.mrb[187].mxu0  ;;  %v12220_v6 = vld [vmem:[%s14688_s3 + $0x138] sm:$0xff]  }
 0x5a2   : > { %v6863_v53 = vmax.f32 %v11052_v15, %v11054_v38  ;;  %v11058_v0 = vadd.f32 %v11057_v16, %v6566_v40  ;;  %v12230_v40 = vld [vmem:[%s14690_s5 + $0x20] sm:$0xff]  }
 0x5a4   : > { %v6959_v32 = vmax.f32 %v6863_v53, 0.0  ;;  %v6864_v62 = vmax.f32 %v11056_v22, %v11058_v0  ;;  %10532 = vmatmul.mubr.bf16.gmra.mrb[212].mxu1 %v14049_v5  ;;  %v12231_v53 = vld [vmem:[%s14690_s5 + $0x68] sm:$0xff]  }
 0x5a5   : > { %10535 = vmatprep.mubr.bf16.mxu1 %v14097_v11 }
 0x5a6   : > { %v7007_v50 = vmax.f32 %v6955_v41, %v6959_v32  ;;  %v6960_v3 = vmax.f32 %v6864_v62, 0.0  ;;  %v6570_v20 = vpop.f32.mrb[188].mxu0  ;;  %v12232_v62 = vld [vmem:[%s14690_s5 + $0x28] sm:$0xff]  }
 0x5a7   : > { %v11060_v18 = vadd.f32 %v11059_v54, %v6570_v20  ;;  %v6572_v26 = vpop.f32.mrb[189].mxu0  ;;  %v12234_v20 = vld [vmem:[%s14690_s5 + $0x30] sm:$0xff]  }
 0x5a8   : > { %v7008_v23 = vmax.f32 %v6956_v56, %v6960_v3  ;;  %v11062_v30 = vadd.f32 %v11061_v7, %v6572_v26  ;;  %v6574_v2 = vpop.f32.mrb[190].mxu0  ;;  %v12233_v3 = vld [vmem:[%s14690_s5 + $0x70] sm:$0xff]  }
 0x5a9   : > { %v11064_v61 = vadd.f32 %v11063_v25, %v6574_v2  ;;  %v6576_v21 = vpop.f32.mrb[191].mxu0 }
 0x5aa   : > { %v6865_v12 = vmax.f32 %v11060_v18, %v11062_v30  ;;  %v11066_v10 = vadd.f32 %v11065_v31, %v6576_v21  ;;  %v14275_v19 = vpack.c.bf16 %v7008_v23, %v7007_v50  ;;  %v12235_v18 = vld [vmem:[%s14690_s5 + $0x78] sm:$0xff]  }
 0x5ac   : > { %v6961_v33 = vmax.f32 %v6865_v12, 0.0  ;;  %v6866_v60 = vmax.f32 %v11064_v61, %v11066_v10  ;;  %10536 = vmatmul.mubr.bf16.gmra.mrb[216].mxu1 %v14115_v51 }
 0x5ad   : > { %10539 = vmatprep.mubr.bf16.mxu1 %v14156_v49 }
 0x5ae   : > { %v7009_v52 = vmax.f32 %v6957_v47, %v6961_v33  ;;  %v6962_v58 = vmax.f32 %v6866_v60, 0.0 }
 0x5b0   : > { %v7010_v59 = vmax.f32 %v6958_v44, %v6962_v58 }
 0x5b2   : > { %v7034_v28 = vpack.c.bf16 %v7010_v59, %v7009_v52  ;;  %v12237_v52 = vld [vmem:[%s14690_s5 + $0xc0] sm:$0xff]  }
 0x5b4   : > { %10540 = vmatmul.mubr.bf16.gmra.mrb[220].mxu1 %v14168_v55 }
 0x5b5   : > { %10559 = vmatprep.mubr.bf16.mxu1 %v13855_v48  ;;  %v12216_v48 = vld [vmem:[%s14688_s3 + $0x118] sm:$0xff]  }
 0x5bc   : > { %10560 = vmatmul.mubr.bf16.vlgmr.msra.gmra.mrb[192].mxu1 %v13872_v1  ;;  %v12217_v1 = vld [vmem:[%s14688_s3 + $0x120] sm:$0xff]  }
 0x5bd   : > { %10563 = vmatprep.mubr.bf16.mxu1 %v13920_v29  ;;  %10592 = vmatpush3.bf16.msra.mxu1 %v14248_v57  ;;  %v12218_v57 = vld [vmem:[%s14688_s3 + $0x128] sm:$0xff]  }
 0x5be   : > { %10593 = vmatprep.subr.bf16.mxu1 %v12214_v8 }
 0x5c1   : > { %10594 = vmatpush3.bf16.msra.mxu1 %v12214_v8 }
 0x5c2   : > { %10595 = vmatprep.subr.bf16.mxu1 %v12215_v9 }
 0x5c4   : > { %10564 = vmatmul.mubr.bf16.gmra.mrb[196].mxu1 %v13934_v14 }
 0x5c5   : > { %10567 = vmatprep.mubr.bf16.mxu1 %v13962_v13  ;;  %10596 = vmatpush3.bf16.msra.mxu1 %v12215_v9 }
 0x5c6   : > { %10597 = vmatprep.subr.bf16.mxu1 %v12216_v48 }
 0x5c9   : > { %10598 = vmatpush3.bf16.msra.mxu1 %v12216_v48 }
 0x5ca   : > { %10599 = vmatprep.subr.bf16.mxu1 %v12217_v1 }
 0x5cc   : > { %10568 = vmatmul.mubr.bf16.gmra.mrb[200].mxu1 %v13973_v45 }
 0x5cd   : > { %10571 = vmatprep.mubr.bf16.mxu1 %v14000_v46  ;;  %10600 = vmatpush3.bf16.msra.mxu1 %v12217_v1 }
 0x5ce   : > { %10601 = vmatprep.subr.bf16.mxu1 %v12218_v57 }
 0x5d1   : > { %10602 = vmatpush3.bf16.msra.mxu1 %v12218_v57 }
 0x5d2   : > { %10603 = vmatprep.subr.bf16.mxu1 %v12219_v34 }
 0x5d4   : > { %10572 = vmatmul.mubr.bf16.gmra.mrb[204].mxu1 %v14011_v36 }
 0x5d5   : > { %10575 = vmatprep.mubr.bf16.mxu1 %v14038_v63  ;;  %10604 = vmatpush3.bf16.msra.mxu1 %v12219_v34 }
 0x5d6   : > { %10605 = vmatprep.subr.bf16.mxu1 %v12220_v6 }
 0x5d9   : > { %10606 = vmatpush3.bf16.msra.mxu1 %v12220_v6 }
 0x5dc   : > { %10576 = vmatmul.mubr.bf16.gmra.mrb[208].mxu1 %v14049_v5 }
 0x5dd   : > { %10579 = vmatprep.mubr.bf16.mxu1 %v14097_v11 }
 0x5e4   : > { %10580 = vmatmul.mubr.bf16.gmra.mrb[212].mxu1 %v14115_v51 }
 0x5e5   : > { %10583 = vmatprep.mubr.bf16.mxu1 %v14156_v49 }
 0x5ec   : > { %10584 = vmatmul.mubr.bf16.gmra.mrb[216].mxu1 %v14168_v55 }
 0x5ed   : > { %10587 = vmatprep.mubr.bf16.mxu1 %v14219_v35 }
 0x5f4   : > { %10588 = vmatmul.mubr.bf16.gmra.mrb[220].mxu1 %v14237_v17 }
 0x5f5   : > { %10607 = vmatprep.mubr.bf16.mxu1 %v13920_v29  ;;  %v12221_v29 = vld [vmem:[%s14690_s5 + $0x40] sm:$0xff]  }
 0x5f6   : > { %10323 = vmatprep.subr.bf16.mxu1 %v12221_v29 }
 0x5fc   : > { %10608 = vmatmul.mubr.bf16.vlgmr.msra.gmra.mrb[192].mxu1 %v13934_v14  ;;  %v12222_v14 = vld [vmem:[%s14690_s5] sm:$0xff]  }
 0x5fd   : > { %10611 = vmatprep.mubr.bf16.mxu1 %v13962_v13  ;;  %v12223_v13 = vld [vmem:[%s14690_s5 + $0x48] sm:$0xff]   ;;  %10324 = vmatpush3.bf16.msra.mxu1 %v12222_v14 }
 0x5fe   : > { %10325 = vmatprep.subr.bf16.mxu1 %v12223_v13 }
 0x604   : > { %10612 = vmatmul.mubr.bf16.gmra.mrb[196].mxu1 %v13973_v45  ;;  %v12224_v45 = vld [vmem:[%s14690_s5 + $0x8] sm:$0xff]  }
 0x605   : > { %10615 = vmatprep.mubr.bf16.mxu1 %v14000_v46  ;;  %v12225_v46 = vld [vmem:[%s14690_s5 + $0x50] sm:$0xff]   ;;  %10326 = vmatpush3.bf16.msra.mxu1 %v12224_v45 }
 0x606   : > { %10327 = vmatprep.subr.bf16.mxu1 %v12225_v46 }
 0x60c   : > { %10616 = vmatmul.mubr.bf16.gmra.mrb[200].mxu1 %v14011_v36  ;;  %v12226_v36 = vld [vmem:[%s14690_s5 + $0x10] sm:$0xff]  }
 0x60d   : > { %10619 = vmatprep.mubr.bf16.mxu1 %v14038_v63  ;;  %v12227_v63 = vld [vmem:[%s14690_s5 + $0x58] sm:$0xff]   ;;  %10328 = vmatpush3.bf16.msra.mxu1 %v12226_v36 }
 0x60e   : > { %10329 = vmatprep.subr.bf16.mxu1 %v12227_v63 }
 0x614   : > { %10620 = vmatmul.mubr.bf16.gmra.mrb[204].mxu1 %v14049_v5  ;;  %v12228_v5 = vld [vmem:[%s14690_s5 + $0x18] sm:$0xff]  }
 0x615   : > { %10623 = vmatprep.mubr.bf16.mxu1 %v14097_v11  ;;  %v12229_v11 = vld [vmem:[%s14690_s5 + $0x60] sm:$0xff]   ;;  %10330 = vmatpush3.bf16.msra.mxu1 %v12228_v5 }
 0x616   : > { %10331 = vmatprep.subr.bf16.mxu1 %v12229_v11 }
 0x619   : > { %10332 = vmatpush3.bf16.msra.mxu1 %v12230_v40 }
 0x61a   : > { %10333 = vmatprep.subr.bf16.mxu1 %v12231_v53 }
 0x61c   : > { %10624 = vmatmul.mubr.bf16.gmra.mrb[208].mxu1 %v14115_v51 }
 0x61d   : > { %10627 = vmatprep.mubr.bf16.mxu1 %v14156_v49  ;;  %v14365_v49 = vld [vmem:[%s14689_s4] ss:$0 sm:$0xff]  ;;  %10334 = vmatpush3.bf16.msra.mxu1 %v12232_v62 }
 0x61e   : > { %10335 = vmatprep.subr.bf16.mxu1 %v12233_v3 }
 0x621   : > { %10336 = vmatpush3.bf16.msra.mxu1 %v12234_v20 }
 0x622   : > { %10337 = vmatprep.subr.bf16.mxu1 %v12235_v18 }
 0x624   : > { %10628 = vmatmul.mubr.bf16.gmra.mrb[212].mxu1 %v14168_v55 }
 0x625   : > { %10631 = vmatprep.mubr.bf16.mxu1 %v14219_v35  ;;  %10338 = vmatpush3.bf16.msra.mxu1 %v12236_v27 }
 0x626   : > { %10351 = vmatprep.subr.bf16.mxu1 %v12237_v52 }
 0x62c   : > { %10632 = vmatmul.mubr.bf16.gmra.mrb[216].mxu1 %v14237_v17 }
 0x62d   : > { %10635 = vmatprep.mubr.bf16.mxu1 %v14275_v19 }
 0x634   : > { %10636 = vmatmul.mubr.bf16.gmra.mrb[220].mxu1 %v7034_v28 }
 0x6cf   : > { %v14360_v51 = vpop.f32.mrb[192].mxu1 }
 0x6d0   : > { %v8140_v55 = vpop.f32.mrb[193].mxu1  ;;  %v14458_v1 = vadd.f32 %v14360_v51, %v14365_v49 }
 0x6d1   : > { %v10610_v35 = vpop.f32.mrb[194].mxu1  ;;  %v14368_v15 = vadd.f32 %v14365_v49, %v8140_v55 }
 0x6d2   : > { %v8143_v17 = vpop.f32.mrb[195].mxu1  ;;  %v14451_v28 = vadd.f32 %v10610_v35, %v14365_v49 }
 0x6d3   : > { %v14371_v4 = vadd.f32 %v14365_v49, %v8143_v17 }
 0x6d4   : > { %v11861_v57 = vpack.i.bf16 %v14451_v28, %v14458_v1 }
 0x6d5   : > { %v11841_v37 = vpack.i.bf16 %v14371_v4, %v14368_v15 }
 0x6d7   : > { %11842 = vrot.lane.b32.xlu1 %v11841_v37, %s12294_s28  ;;  %v10613_v16 = vpop.f32.mrb[196].mxu1 }
 0x6d8   : > { %v8156_v38 = vpop.f32.mrb[197].mxu1  ;;  %v14438_v33 = vadd.f32 %v10613_v16, %v14365_v49 }
 0x6d9   : > { %v10614_v39 = vpop.f32.mrb[198].mxu1  ;;  %v14383_v0 = vadd.f32 %v14365_v49, %v8156_v38 }
 0x6da   : > { %v8159_v22 = vpop.f32.mrb[199].mxu1  ;;  %v14428_v12 = vadd.f32 %v10614_v39, %v14365_v49 }
 0x6db   : > { %v14386_v41 = vadd.f32 %v14365_v49, %v8159_v22 }
 0x6dc   : > { %v11866_v58 = vpack.i.bf16 %v14428_v12, %v14438_v33 }
 0x6dd   : > { %v11846_v32 = vpack.i.bf16 %v14386_v41, %v14383_v0 }
 0x6df   : > { %11847 = vrot.lane.b32.xlu1 %v11846_v32, %s12294_s28  ;;  %v10617_v42 = vpop.f32.mrb[200].mxu1 }
 0x6e0   : > { %v8172_v54 = vpop.f32.mrb[201].mxu1  ;;  %v14442_v60 = vadd.f32 %v10617_v42, %v14365_v49 }
 0x6e1   : > { %v10618_v43 = vpop.f32.mrb[202].mxu1  ;;  %v14395_v56 = vadd.f32 %v14365_v49, %v8172_v54 }
 0x6e2   : > { %v8175_v7 = vpop.f32.mrb[203].mxu1  ;;  %v14433_v19 = vadd.f32 %v10618_v43, %v14365_v49 }
 0x6e3   : > { %v14398_v50 = vadd.f32 %v14365_v49, %v8175_v7 }
 0x6e4   : > { %v11851_v8 = vpack.i.bf16 %v14433_v19, %v14442_v60 }
 0x6e5   : > { %v11831_v24 = vpack.i.bf16 %v14398_v50, %v14395_v56 }
 0x6e7   : > { %11832 = vrot.lane.b32.xlu0 %v11831_v24, %s12294_s28  ;;  %v10621_v25 = vpop.f32.mrb[204].mxu1 }
 0x6e8   : > { %v8188_v26 = vpop.f32.mrb[205].mxu1  ;;  %v14416_v23 = vadd.f32 %v10621_v25, %v14365_v49 }
 0x6e9   : > { %v10622_v31 = vpop.f32.mrb[206].mxu1  ;;  %v14422_v61 = vadd.f32 %v14365_v49, %v8188_v26 }
 0x6ea   : > { %v14419_v30 = vadd.f32 %v10622_v31, %v14365_v49  ;;  %v8191_v2 = vpop.f32.mrb[207].mxu1 }
 0x6eb   : > { %v14425_v21 = vadd.f32 %v14365_v49, %v8191_v2 }
 0x6ec   : > { %v11856_v10 = vpack.i.bf16 %v14419_v30, %v14416_v23 }
 0x6ed   : > { %v11836_v47 = vpack.i.bf16 %v14425_v21, %v14422_v61 }
 0x6ee   : > { %11857 = vrot.lane.b32.xlu1 %v11856_v10, %s12294_s28 }
 0x6ef   : > { %11837 = vrot.lane.b32.xlu0 %v11836_v47, %s12294_s28  ;;  %v10625_v44 = vpop.f32.mrb[208].mxu1 }
 0x6f0   : > { %v8204_v59 = vpop.f32.mrb[209].mxu1  ;;  %v14517_v24 = vadd.f32 %v10625_v44, %v14365_v49 }
 0x6f1   : > { %v10626_v9 = vpop.f32.mrb[210].mxu1  ;;  %v14482_v17 = vadd.f32 %v14365_v49, %v8204_v59 }
 0x6f2   : > { %11867 = vrot.lane.b32.xlu1 %v11866_v58, %s12294_s28  ;;  %v8207_v48 = vpop.f32.mrb[211].mxu1  ;;  %v14507_v43 = vadd.f32 %v10626_v9, %v14365_v49 }
 0x6f3   : > { %11852 = vrot.lane.b32.xlu0 %v11851_v8, %s12294_s28  ;;  %v14477_v55 = vadd.f32 %v14365_v49, %v8207_v48 }
 0x6f4   : > { %v11901_v18 = vpack.i.bf16 %v14507_v43, %v14517_v24 }
 0x6f5   : > { %v11876_v39 = vpack.i.bf16 %v14477_v55, %v14482_v17 }
 0x6f7   : > { %11862 = vrot.lane.b32.xlu0 %v11861_v57, %s12294_s28  ;;  %v10629_v34 = vpop.f32.mrb[212].mxu1 }
 0x6f8   : > { %v14465_v6 = vadd.f32 %v10629_v34, %v14365_v49  ;;  %v8220_v29 = vpop.f32.mrb[213].mxu1 }
 0x6f9   : > { %v10630_v14 = vpop.f32.mrb[214].mxu1  ;;  %v14520_v25 = vadd.f32 %v14365_v49, %v8220_v29 }
 0x6fa   : > { %v14468_v13 = vadd.f32 %v10630_v14, %v14365_v49  ;;  %v8223_v45 = vpop.f32.mrb[215].mxu1 }
 0x6fb   : > { %v14510_v7 = vadd.f32 %v14365_v49, %v8223_v45 }
 0x6fd   : > { %v11886_v26 = vpack.i.bf16 %v14510_v7, %v14520_v25 }
 0x6ff   : > { %v10633_v46 = vpop.f32.mrb[216].mxu1 }
 0x700   : > { %v8236_v36 = vpop.f32.mrb[217].mxu1  ;;  %v14497_v62 = vadd.f32 %v10633_v46, %v14365_v49 }
 0x701   : > { %v10634_v63 = vpop.f32.mrb[218].mxu1  ;;  %v14471_v11 = vadd.f32 %v14365_v49, %v8236_v36 }
 0x702   : > { %v8239_v5 = vpop.f32.mrb[219].mxu1  ;;  %v14491_v22 = vadd.f32 %v10634_v63, %v14365_v49 }
 0x703   : > { %v14474_v51 = vadd.f32 %v14365_v49, %v8239_v5 }
 0x704   : > { %v11891_v3 = vpack.i.bf16 %v14491_v22, %v14497_v62 }
 0x705   : > { %v11871_v35 = vpack.i.bf16 %v14474_v51, %v14471_v11 }
 0x707   : > { %11872 = vrot.lane.b32.xlu0 %v11871_v35, %s12294_s28  ;;  %v10637_v37 = vpop.f32.mrb[220].mxu1 }
 0x708   : > { %v14486_v16 = vadd.f32 %v10637_v37, %v14365_v49  ;;  %v8252_v38 = vpop.f32.mrb[221].mxu1 }
 0x709   : > { %v10638_v40 = vpop.f32.mrb[222].mxu1  ;;  %v14500_v42 = vadd.f32 %v14365_v49, %v8252_v38 }
 0x70a   : > { %v14494_v53 = vadd.f32 %v10638_v40, %v14365_v49  ;;  %v8255_v32 = vpop.f32.mrb[223].mxu1 }
 0x70b   : > { %v14503_v54 = vadd.f32 %v14365_v49, %v8255_v32  ;;  %11877 = vrot.lane.b32.xlu0 %v11876_v39, %s12294_s28  ;;  %v11906_v49 = vpack.i.bf16 %v14468_v13, %v14465_v6 }
 0x70c   : > { %v11896_v27 = vpack.i.bf16 %v14494_v53, %v14486_v16 }
 0x70d   : > { %v11881_v20 = vpack.i.bf16 %v14503_v54, %v14500_v42 }
 0x70f   : > { %11892 = vrot.lane.b32.xlu0 %v11891_v3, %s12294_s28  ;;  %11882 = vrot.lane.b32.xlu1 %v11881_v20, %s12294_s28 }
 0x713   : > { %11902 = vrot.lane.b32.xlu0 %v11901_v18, %s12294_s28  ;;  %11887 = vrot.lane.b32.xlu1 %v11886_v26, %s12294_s28 }
 0x717   : > { %11897 = vrot.lane.b32.xlu1 %v11896_v27, %s12294_s28 }
 0x71b   : > { %11907 = vrot.lane.b32.xlu1 %v11906_v49, %s12294_s28 }
 0x749   : > { %v11843_v31 = vpop.permute.xlu1 %11842 }
 0x74a   : > { %v11845_v47 = vunpack.i.h.bf16 %v11843_v31  ;;  %v11844_v44 = vunpack.i.l.bf16 %v11843_v31 }
 0x74c   : > { %v8364_v9 = vmax.f32 %v14371_v4, %v11845_v47  ;;  %v8363_v48 = vmax.f32 %v14368_v15, %v11844_v44 }
 0x74e   : > { %v8396_v37 = vmax.f32 %v8364_v9, 0.0  ;;  %v8395_v38 = vmax.f32 %v8363_v48, 0.0 }
 0x751   : > { %v11848_v2 = vpop.permute.xlu1 %11847 }
 0x752   : > { %v11850_v52 = vunpack.i.h.bf16 %v11848_v2  ;;  %v11849_v58 = vunpack.i.l.bf16 %v11848_v2 }
 0x754   : > { %v8368_v57 = vmax.f32 %v14386_v41, %v11850_v52  ;;  %v8367_v34 = vmax.f32 %v14383_v0, %v11849_v58 }
 0x756   : > { %v8400_v39 = vmax.f32 %v8368_v57, 0.0  ;;  %v8399_v4 = vmax.f32 %v8367_v34, 0.0 }
 0x758   : > { %v8428_v2 = vmax.f32 %v8396_v37, %v8400_v39 }
 0x759   : > { %v11833_v10 = vpop.permute.xlu0 %11832 }
 0x75a   : > { %v11835_v59 = vunpack.i.h.bf16 %v11833_v10  ;;  %v11834_v8 = vunpack.i.l.bf16 %v11833_v10  ;;  %v8427_v10 = vmax.f32 %v8395_v38, %v8399_v4  ;;  %v12241_v38 = vld [vmem:[%s14690_s5 + $0xd0] sm:$0xff]  }
 0x75b   : > { %v12242_v4 = vld [vmem:[%s14690_s5 + $0x90] sm:$0xff]  }
 0x75c   : > { %v8372_v29 = vmax.f32 %v14398_v50, %v11835_v59  ;;  %v8371_v14 = vmax.f32 %v14395_v56, %v11834_v8  ;;  %v8443_v34 = vpack.c.bf16 %v8428_v2, %v8427_v10 }
 0x75e   : > { %v8404_v40 = vmax.f32 %v8372_v29, 0.0  ;;  %v8403_v15 = vmax.f32 %v8371_v14, 0.0 }
 0x760   : > { %v11858_v45 = vpop.permute.xlu1 %11857 }
 0x761   : > { %v11860_v46 = vunpack.i.h.bf16 %v11858_v45  ;;  %v11859_v36 = vunpack.i.l.bf16 %v11858_v45  ;;  %v11838_v63 = vpop.permute.xlu0 %11837 }
 0x762   : > { %v11840_v5 = vunpack.i.h.bf16 %v11838_v63  ;;  %v11839_v35 = vunpack.i.l.bf16 %v11838_v63 }
 0x763   : > { %v8378_v50 = vmax.f32 %v14419_v30, %v11860_v46  ;;  %v8377_v56 = vmax.f32 %v14416_v23, %v11859_v36 }
 0x764   : > { %v8376_v41 = vmax.f32 %v14425_v21, %v11840_v5  ;;  %v8375_v0 = vmax.f32 %v14422_v61, %v11839_v35  ;;  %v11868_v32 = vpop.permute.xlu1 %11867 }
 0x765   : > { %v11870_v3 = vunpack.i.h.bf16 %v11868_v32  ;;  %v11869_v20 = vunpack.i.l.bf16 %v11868_v32  ;;  %v11853_v18 = vpop.permute.xlu0 %11852  ;;  %v8410_v52 = vmax.f32 %v8378_v50, 0.0  ;;  %v8409_v58 = vmax.f32 %v8377_v56, 0.0  ;;  %v12246_v32 = vld [vmem:[%s14690_s5 + $0xa0] sm:$0xff]   ;;  %v12247_v50 = vld [vmem:[%s14690_s5 + $0xe8] sm:$0xff]  }
 0x766   : > { %v8408_v26 = vmax.f32 %v8376_v41, 0.0  ;;  %v8407_v27 = vmax.f32 %v8375_v0, 0.0  ;;  %v11855_v49 = vunpack.i.h.bf16 %v11853_v18  ;;  %v11854_v31 = vunpack.i.l.bf16 %v11853_v18  ;;  %v12245_v41 = vld [vmem:[%s14690_s5 + $0xe0] sm:$0xff]   ;;  %v12248_v18 = vld [vmem:[%s14690_s5 + $0xa8] sm:$0xff]  }
 0x767   : > { %v8370_v30 = vmax.f32 %v14428_v12, %v11870_v3  ;;  %v8369_v23 = vmax.f32 %v14438_v33, %v11869_v20  ;;  %v12239_v12 = vld [vmem:[%s14690_s5 + $0xc8] sm:$0xff]  }
 0x768   : > { %v8374_v47 = vmax.f32 %v14433_v19, %v11855_v49  ;;  %v8373_v21 = vmax.f32 %v14442_v60, %v11854_v31  ;;  %v8431_v44 = vmax.f32 %v8403_v15, %v8407_v27  ;;  %v8432_v61 = vmax.f32 %v8404_v40, %v8408_v26  ;;  %v12238_v19 = vld [vmem:[%s14690_s5 + $0x80] sm:$0xff]   ;;  %v12243_v40 = vld [vmem:[%s14690_s5 + $0xd8] sm:$0xff]   ;;  %v12249_v26 = vld [vmem:[%s14690_s5 + $0xf0] sm:$0xff]  }
 0x769   : > { %v11863_v59 = vpop.permute.xlu0 %11862  ;;  %v8402_v33 = vmax.f32 %v8370_v30, 0.0  ;;  %v8401_v36 = vmax.f32 %v8369_v23, 0.0  ;;  %v12244_v15 = vld [vmem:[%s14690_s5 + $0x98] sm:$0xff]  }
 0x76a   : > { %v8406_v8 = vmax.f32 %v8374_v47, 0.0  ;;  %v8405_v9 = vmax.f32 %v8373_v21, 0.0  ;;  %v11865_v48 = vunpack.i.h.bf16 %v11863_v59  ;;  %v11864_v57 = vunpack.i.l.bf16 %v11863_v59  ;;  %v12251_v30 = vld [vmem:[%s14690_s5 + $0xf8] sm:$0xff]  }
 0x76b   : > { %v8445_v29 = vpack.c.bf16 %v8432_v61, %v8431_v44  ;;  %v12250_v61 = vld [vmem:[%s14690_s5 + $0xb0] sm:$0xff]  }
 0x76c   : > { %v8366_v60 = vmax.f32 %v14451_v28, %v11865_v48  ;;  %v8365_v14 = vmax.f32 %v14458_v1, %v11864_v57  ;;  %v8433_v45 = vmax.f32 %v8405_v9, %v8409_v58  ;;  %v8434_v46 = vmax.f32 %v8406_v8, %v8410_v52  ;;  %v12240_v28 = vld [vmem:[%s14690_s5 + $0x88] sm:$0xff]  }
 0x76d   : > { %8746 = vmatprep.mubr.bf16.mxu1 %v8445_v29 }
 0x76e   : > { %v8398_v63 = vmax.f32 %v8366_v60, 0.0  ;;  %v8397_v5 = vmax.f32 %v8365_v14, 0.0  ;;  %8747 = vmatmul.mubr.bf16.vlgmr.msra.gmra.mrb[224].mxu1 %v8443_v34  ;;  %v8446_v35 = vpack.c.bf16 %v8434_v46, %v8433_v45  ;;  %v12252_v14 = vld [vmem:[%s14690_s5 + $0xb8] sm:$0xff]  }
 0x76f   : > { %10352 = vmatpush3.bf16.msra.mxu1 %v12238_v19 }
 0x770   : > { %8754 = vmatprep.mubr.bf16.mxu1 %v8446_v35  ;;  %10353 = vmatprep.subr.bf16.mxu1 %v12239_v12  ;;  %v8429_v1 = vmax.f32 %v8397_v5, %v8401_v36  ;;  %v8430_v37 = vmax.f32 %v8398_v63, %v8402_v33 }
 0x772   : > { %v8444_v39 = vpack.c.bf16 %v8430_v37, %v8429_v1 }
 0x773   : > { %10354 = vmatpush3.bf16.msra.mxu1 %v12240_v28 }
 0x774   : > { %10355 = vmatprep.subr.bf16.mxu1 %v12241_v38 }
 0x776   : > { %8755 = vmatmul.mubr.bf16.gmra.mrb[228].mxu1 %v8444_v39 }
 0x777   : > { %10356 = vmatpush3.bf16.msra.mxu1 %v12242_v4 }
 0x778   : > { %10357 = vmatprep.subr.bf16.mxu1 %v12243_v40 }
 0x779   : > { %v11873_v0 = vpop.permute.xlu0 %11872 }
 0x77a   : > { %v11875_v3 = vunpack.i.h.bf16 %v11873_v0  ;;  %v11874_v20 = vunpack.i.l.bf16 %v11873_v0 }
 0x77b   : > { %10358 = vmatpush3.bf16.msra.mxu1 %v12244_v15 }
 0x77c   : > { %10359 = vmatprep.subr.bf16.mxu1 %v12245_v41  ;;  %v8388_v31 = vmax.f32 %v14474_v51, %v11875_v3  ;;  %v8387_v2 = vmax.f32 %v14471_v11, %v11874_v20 }
 0x77d   : > { %v11878_v56 = vpop.permute.xlu0 %11877 }
 0x77e   : > { %v11880_v10 = vunpack.i.h.bf16 %v11878_v56  ;;  %v11879_v47 = vunpack.i.l.bf16 %v11878_v56  ;;  %v8420_v8 = vmax.f32 %v8388_v31, 0.0  ;;  %v8419_v9 = vmax.f32 %v8387_v2, 0.0 }
 0x77f   : > { %10360 = vmatpush3.bf16.msra.mxu1 %v12246_v32 }
 0x780   : > { %10361 = vmatprep.subr.bf16.mxu1 %v12247_v50  ;;  %v8380_v48 = vmax.f32 %v14477_v55, %v11880_v10  ;;  %v8379_v57 = vmax.f32 %v14482_v17, %v11879_v47  ;;  %v12253_v47 = vld [vmem:[%s14692_s7] sm:$0xff]  }
 0x781   : > { %v11893_v27 = vpop.permute.xlu0 %11892  ;;  %v11883_v49 = vpop.permute.xlu1 %11882 }
 0x782   : > { %v11885_v21 = vunpack.i.h.bf16 %v11883_v49  ;;  %v11884_v44 = vunpack.i.l.bf16 %v11883_v49  ;;  %v11895_v52 = vunpack.i.h.bf16 %v11893_v27  ;;  %v11894_v58 = vunpack.i.l.bf16 %v11893_v27 }
 0x783   : > { %10362 = vmatpush3.bf16.msra.mxu1 %v12248_v18  ;;  %v8412_v63 = vmax.f32 %v8380_v48, 0.0  ;;  %v8411_v28 = vmax.f32 %v8379_v57, 0.0 }
 0x784   : > { %10363 = vmatprep.subr.bf16.mxu1 %v12249_v26  ;;  %v8392_v51 = vmax.f32 %v14503_v54, %v11885_v21  ;;  %v8391_v11 = vmax.f32 %v14500_v42, %v11884_v44  ;;  %v8390_v54 = vmax.f32 %v14491_v22, %v11895_v52  ;;  %v8389_v42 = vmax.f32 %v14497_v62, %v11894_v58  ;;  %v12256_v21 = vld [vmem:[%s14692_s7 + $0x18] sm:$0xff]   ;;  %v12257_v44 = vld [vmem:[%s14692_s7 + $0x20] sm:$0xff]   ;;  %v12259_v52 = vld [vmem:[%s14692_s7 + $0x30] sm:$0xff]  }
 0x785   : > { %v11903_v23 = vpop.permute.xlu0 %11902  ;;  %v11888_v59 = vpop.permute.xlu1 %11887  ;;  %v12260_v58 = vld [vmem:[%s14692_s7 + $0x38] sm:$0xff]  }
 0x786   : > { %v8424_v34 = vmax.f32 %v8392_v51, 0.0  ;;  %v8423_v29 = vmax.f32 %v8391_v11, 0.0  ;;  %v11890_v19 = vunpack.i.h.bf16 %v11888_v59  ;;  %v11889_v60 = vunpack.i.l.bf16 %v11888_v59 }
 0x787   : > { %10364 = vmatpush3.bf16.msra.mxu1 %v12250_v61  ;;  %v11905_v45 = vunpack.i.h.bf16 %v11903_v23  ;;  %v11904_v46 = vunpack.i.l.bf16 %v11903_v23  ;;  %v8422_v22 = vmax.f32 %v8390_v54, 0.0  ;;  %v8421_v62 = vmax.f32 %v8389_v42, 0.0  ;;  %v12258_v61 = vld [vmem:[%s14692_s7 + $0x28] sm:$0xff]  }
 0x788   : > { %10365 = vmatprep.subr.bf16.mxu1 %v12251_v30  ;;  %v8384_v55 = vmax.f32 %v14510_v7, %v11890_v19  ;;  %v8383_v17 = vmax.f32 %v14520_v25, %v11889_v60  ;;  %v8439_v33 = vmax.f32 %v8419_v9, %v8423_v29  ;;  %v8440_v36 = vmax.f32 %v8420_v8, %v8424_v34  ;;  %v12261_v30 = vld [vmem:[%s14694_s9] sm:$0xff]  }
 0x789   : > { %v11898_v12 = vpop.permute.xlu1 %11897  ;;  %v8382_v7 = vmax.f32 %v14507_v43, %v11905_v45  ;;  %v8381_v25 = vmax.f32 %v14517_v24, %v11904_v46 }
 0x78a   : > { %v11900_v5 = vunpack.i.h.bf16 %v11898_v12  ;;  %v11899_v35 = vunpack.i.l.bf16 %v11898_v12  ;;  %v8416_v1 = vmax.f32 %v8384_v55, 0.0  ;;  %v8415_v37 = vmax.f32 %v8383_v17, 0.0 }
 0x78b   : > { %v8449_v38 = vpack.c.bf16 %v8440_v36, %v8439_v33  ;;  %10366 = vmatpush3.bf16.msra.mxu1 %v12252_v14  ;;  %v8413_v43 = vmax.f32 %v8381_v25, 0.0  ;;  %v10149_v14 = vld [vmem:[%s14691_s6] ss:$0 sm:$0xff] }
 0x78c   : > { %v8394_v39 = vmax.f32 %v14494_v53, %v11900_v5  ;;  %v8393_v4 = vmax.f32 %v14486_v16, %v11899_v35  ;;  %v8436_v40 = vmax.f32 %v8412_v63, %v8416_v1  ;;  %v8435_v15 = vmax.f32 %v8411_v28, %v8415_v37  ;;  %10639 = vmatprep.subr.bf16.mxu1 %v12253_v47 }
 0x78d   : > { %8795 = vmatprep.mubr.bf16.mxu1 %v8449_v38  ;;  %v11908_v41 = vpop.permute.xlu1 %11907  ;;  %v8414_v16 = vmax.f32 %v8382_v7, 0.0 }
 0x78e   : > { %v8426_v0 = vmax.f32 %v8394_v39, 0.0  ;;  %v8425_v32 = vmax.f32 %v8393_v4, 0.0  ;;  %v11910_v50 = vunpack.i.h.bf16 %v11908_v41  ;;  %v11909_v56 = vunpack.i.l.bf16 %v11908_v41 }
 0x78f   : > { %v8447_v3 = vpack.c.bf16 %v8436_v40, %v8435_v15 }
 0x790   : > { %v8386_v20 = vmax.f32 %v14468_v13, %v11910_v50  ;;  %v8385_v18 = vmax.f32 %v14465_v6, %v11909_v56  ;;  %v8441_v53 = vmax.f32 %v8421_v62, %v8425_v32  ;;  %v8442_v26 = vmax.f32 %v8422_v22, %v8426_v0  ;;  %v12254_v6 = vld [vmem:[%s14692_s7 + $0x8] sm:$0xff]   ;;  %v12255_v13 = vld [vmem:[%s14692_s7 + $0x10] sm:$0xff]   ;;  %v12264_v56 = vld [vmem:[%s14694_s9 + $0x18] sm:$0xff]  }
 0x791   : > { %8796 = vmatmul.mubr.bf16.vlgmr.msra.gmra.mrb[232].mxu1 %v8447_v3  ;;  %v12262_v32 = vld [vmem:[%s14694_s9 + $0x8] sm:$0xff]   ;;  %v12263_v50 = vld [vmem:[%s14694_s9 + $0x10] sm:$0xff]   ;;  %v12265_v3 = vld [vmem:[%s14694_s9 + $0x20] sm:$0xff]  }
 0x792   : > { %v8418_v27 = vmax.f32 %v8386_v20, 0.0  ;;  %v8417_v24 = vmax.f32 %v8385_v18, 0.0  ;;  %v8450_v49 = vpack.c.bf16 %v8442_v26, %v8441_v53  ;;  %10640 = vmatpush3.bf16.msra.mxu1 %v12253_v47  ;;  %v12266_v20 = vld [vmem:[%s14694_s9 + $0x28] sm:$0xff]   ;;  %v12267_v18 = vld [vmem:[%s14694_s9 + $0x30] sm:$0xff]   ;;  %v12268_v53 = vld [vmem:[%s14694_s9 + $0x38] sm:$0xff]  }
 0x793   : > { %10641 = vmatprep.subr.bf16.mxu1 %v12254_v6  ;;  %v10182_v26 = vld [vmem:[%s14693_s8] ss:$0 sm:$0xff] }
 0x794   : > { %v8438_v31 = vmax.f32 %v8414_v16, %v8418_v27  ;;  %v8437_v2 = vmax.f32 %v8413_v43, %v8417_v24  ;;  %8803 = vmatprep.mubr.bf16.mxu1 %v8450_v49 }
 0x796   : > { %v8448_v10 = vpack.c.bf16 %v8438_v31, %v8437_v2  ;;  %10642 = vmatpush3.bf16.msra.mxu1 %v12254_v6 }
 0x797   : > { %10643 = vmatprep.subr.bf16.mxu1 %v12255_v13 }
 0x799   : > { %8804 = vmatmul.mubr.bf16.gmra.mrb[236].mxu1 %v8448_v10 }
 0x79a   : > { %10644 = vmatpush3.bf16.msra.mxu1 %v12255_v13 }
 0x79b   : > { %10645 = vmatprep.subr.bf16.mxu1 %v12256_v21 }
 0x79e   : > { %10646 = vmatpush3.bf16.msra.mxu1 %v12256_v21 }
 0x79f   : > { %10647 = vmatprep.subr.bf16.mxu1 %v12257_v44 }
 0x7a2   : > { %10648 = vmatpush3.bf16.msra.mxu1 %v12257_v44 }
 0x7a3   : > { %10649 = vmatprep.subr.bf16.mxu1 %v12258_v61 }
 0x7a6   : > { %10650 = vmatpush3.bf16.msra.mxu1 %v12258_v61 }
 0x7a7   : > { %10651 = vmatprep.subr.bf16.mxu1 %v12259_v52 }
 0x7aa   : > { %10652 = vmatpush3.bf16.msra.mxu1 %v12259_v52  ;;  %v10191_v52 = vld [vmem:[%s14695_s10] ss:$0 sm:$0xff] }
 0x7ab   : > { %10653 = vmatprep.subr.bf16.mxu1 %v12260_v58 }
 0x7ae   : > { %10654 = vmatpush3.bf16.msra.mxu1 %v12260_v58 }
 0x7af   : > { %10659 = vmatprep.subr.bf16.mxu1 %v12261_v30 }
 0x841   : > { %v10339_v51 = vpop.f32.mrb[224].mxu1 }
 0x842   : > { %v10340_v11 = vpop.f32.mrb[225].mxu1 }
 0x843   : > { %v10341_v23 = vadd.f32 %v10340_v11, %v10339_v51  ;;  %v10342_v59 = vpop.f32.mrb[226].mxu1 }
 0x844   : > { %v10343_v8 = vpop.f32.mrb[227].mxu1 }
 0x845   : > { %v10344_v9 = vadd.f32 %v10343_v8, %v10342_v59  ;;  %v8749_v45 = vadd.f32 %v10341_v23, %v10149_v14 }
 0x847   : > { %v8752_v12 = vadd.f32 %v10344_v9, %v10149_v14 }
 0x849   : > { %v10345_v48 = vpop.f32.mrb[228].mxu1 }
 0x84a   : > { %v10346_v57 = vpop.f32.mrb[229].mxu1 }
 0x84b   : > { %v10347_v34 = vadd.f32 %v10346_v57, %v10345_v48  ;;  %v10348_v29 = vpop.f32.mrb[230].mxu1 }
 0x84c   : > { %v10349_v19 = vpop.f32.mrb[231].mxu1 }
 0x84d   : > { %v10350_v60 = vadd.f32 %v10349_v19, %v10348_v29  ;;  %v8757_v37 = vadd.f32 %v10347_v34, %v10149_v14 }
 0x84f   : > { %v8760_v4 = vadd.f32 %v10350_v60, %v10149_v14 }
 0x864   : > { %v10367_v54 = vpop.f32.mrb[232].mxu1 }
 0x865   : > { %v10368_v42 = vpop.f32.mrb[233].mxu1 }
 0x866   : > { %v10369_v46 = vadd.f32 %v10368_v42, %v10367_v54  ;;  %v10370_v55 = vpop.f32.mrb[234].mxu1 }
 0x867   : > { %v10371_v17 = vpop.f32.mrb[235].mxu1 }
 0x868   : > { %v8798_v33 = vadd.f32 %v10369_v46, %v8749_v45  ;;  %v10372_v36 = vadd.f32 %v10371_v17, %v10370_v55 }
 0x86a   : > { %v8801_v63 = vadd.f32 %v10372_v36, %v8752_v12  ;;  %v8812_v5 = vmax.f32 %v8798_v33, 0.0 }
 0x86c   : > { %v8813_v35 = vmax.f32 %v8801_v63, 0.0  ;;  %v10373_v28 = vpop.f32.mrb[236].mxu1 }
 0x86d   : > { %v10374_v1 = vpop.f32.mrb[237].mxu1 }
 0x86e   : > { %v10375_v38 = vadd.f32 %v10374_v1, %v10373_v28  ;;  %v10376_v22 = vpop.f32.mrb[238].mxu1  ;;  %v8816_v62 = vpack.c.bf16 %v8813_v35, %v8812_v5 }
 0x86f   : > { %v10377_v39 = vpop.f32.mrb[239].mxu1 }
 0x870   : > { %v8806_v7 = vadd.f32 %v10375_v38, %v8757_v37  ;;  %v10378_v25 = vadd.f32 %v10377_v39, %v10376_v22  ;;  %10655 = vmatprep.mubr.bf16.mxu1 %v8816_v62 }
 0x872   : > { %v8809_v40 = vadd.f32 %v10378_v25, %v8760_v4  ;;  %v8814_v15 = vmax.f32 %v8806_v7, 0.0 }
 0x874   : > { %v8815_v41 = vmax.f32 %v8809_v40, 0.0 }
 0x876   : > { %v8817_v0 = vpack.c.bf16 %v8815_v41, %v8814_v15 }
 0x878   : > { %10656 = vmatmul.mubr.bf16.vlgmr.msra.gmra.mrb[240].mxu1 %v8817_v0 }
 0x879   : > { %10660 = vmatpush3.bf16.msra.mxu1 %v12261_v30 }
 0x87a   : > { %10661 = vmatprep.subr.bf16.mxu1 %v12262_v32 }
 0x87d   : > { %10662 = vmatpush3.bf16.msra.mxu1 %v12262_v32 }
 0x87e   : > { %10663 = vmatprep.subr.bf16.mxu1 %v12263_v50 }
 0x881   : > { %10664 = vmatpush3.bf16.msra.mxu1 %v12263_v50 }
 0x882   : > { %10665 = vmatprep.subr.bf16.mxu1 %v12264_v56 }
 0x885   : > { %10666 = vmatpush3.bf16.msra.mxu1 %v12264_v56 }
 0x886   : > { %10667 = vmatprep.subr.bf16.mxu1 %v12265_v3 }
 0x889   : > { %10668 = vmatpush3.bf16.msra.mxu1 %v12265_v3 }
 0x88a   : > { %10669 = vmatprep.subr.bf16.mxu1 %v12266_v20 }
 0x88d   : > { %10670 = vmatpush3.bf16.msra.mxu1 %v12266_v20 }
 0x88e   : > { %10671 = vmatprep.subr.bf16.mxu1 %v12267_v18 }
 0x891   : > { %10672 = vmatpush3.bf16.msra.mxu1 %v12267_v18 }
 0x892   : > { %10673 = vmatprep.subr.bf16.mxu1 %v12268_v53 }
 0x895   : > { %10674 = vmatpush3.bf16.msra.mxu1 %v12268_v53 }
 0x94b   : > { %v10657_v16 = vpop.f32.mrb[240].mxu1 }
 0x94c   : > { %v8932_v43 = vadd.f32 %v10657_v16, %v10182_v26  ;;  %v8923_v27 = vpop.f32.mrb[241].mxu1 }
 0x94d   : > { %v8924_v24 = vadd.f32 %v10182_v26, %v8923_v27  ;;  %v10658_v49 = vpop.f32.mrb[242].mxu1 }
 0x94e   : > { %v8935_v31 = vadd.f32 %v10658_v49, %v10182_v26  ;;  %v8926_v2 = vpop.f32.mrb[243].mxu1  ;;  %v8940_v47 = vmax.f32 %v8932_v43, 0.0 }
 0x94f   : > { %v8927_v10 = vadd.f32 %v10182_v26, %v8926_v2  ;;  %v8938_v13 = vmax.f32 %v8924_v24, 0.0 }
 0x950   : > { %v8941_v6 = vmax.f32 %v8935_v31, 0.0 }
 0x951   : > { %v8939_v21 = vmax.f32 %v8927_v10, 0.0 }
 0x952   : > { %v8943_v44 = vpack.c.bf16 %v8941_v6, %v8940_v47 }
 0x953   : > { %v8942_v61 = vpack.c.bf16 %v8939_v21, %v8938_v13 }
 0x955   : > { %10675 = vmatprep.mubr.bf16.mxu1 %v8942_v61 }
 0x956   : > { %10676 = vmatmul.mubr.bf16.vlgmr.msra.gmra.mrb[244].mxu1 %v8943_v44 }
 0xa29   : > { %v10677_v58 = vpop.f32.mrb[244].mxu1 }
 0xa2a   : > { %v9049_v30 = vpop.f32.mrb[245].mxu1  ;;  %v9058_v8 = vadd.f32 %v10677_v58, %v10191_v52 }
 0xa2b   : > { %v9050_v51 = vadd.f32 %v10191_v52, %v9049_v30  ;;  %v10678_v11 = vpop.f32.mrb[246].mxu1 }
 0xa2c   : > { %v9052_v23 = vpop.f32.mrb[247].mxu1  ;;  %v9061_v9 = vadd.f32 %v10678_v11, %v10191_v52  ;;  %9066 = vst [vmem:[%s873_s13 + $0x10] sm:$0xff] %v9058_v8 }
 0xa2d   : > { %9064 = vst [vmem:[%s873_s13] sm:$0xff] %v9050_v51  ;;  %v9053_v59 = vadd.f32 %v10191_v52, %v9052_v23 }
 0xa2e   : > { %9067 = vst [vmem:[%s873_s13 + $0x18] sm:$0xff] %v9061_v9 }
 0xa2f   : > { %9065 = vst [vmem:[%s873_s13 + $0x8] sm:$0xff] %v9053_v59 }
 0xa30 PF: > { %p18_p9 = scmp.ge.s32.totalorder %s12372_s21, 4   ;;  %s14988_s17 = smov %s12287_s18 }
 0xa31   : > { %s14989_s18 = smov %s12381_s24  ;;  %s14990_s19 = smov %s12372_s21 }
 0xa32   :  { %20 = sbr.rel (!%p18_p9) target bundleno = 2 (0x2), region = 152 }

</bundles_post_ra>
